<compile_context>
chip_gen: v7x
topology: tpu7x:2x2x1
jax: 0.10.0
libtpu: 0.0.40
codegen_flags: <defaults>
</compile_context>

<pallas_src>
import functools
import math

import jax
import jax.numpy as jnp
from jax import lax
from jax.experimental import pallas as pl
from jax.experimental.pallas import tpu as pltpu


def _round_up(x, m):
  return ((x + m - 1) // m) * m


# -----------------------------------------------------------------------------
# Fused transformer-encoder-layer kernel
# -----------------------------------------------------------------------------

def _encoder_layer_kernel(
    x_ref,                   # (1, Sp, E) f32 : full (padded) sequence, batch b
    wqkv_ref, bqkv_ref,      # (E, 3E) bf16, (1, 3E) f32  (packed Q|K|V)
    wo_ref, bo_ref,          # (E, E) bf16,  (1, E) f32
    w1_ref, b1_ref,          # (E, FF) bf16, (1, FF) f32
    w2_ref, b2_ref,          # (FF, E) bf16, (1, E) f32
    g1_ref, beta1_ref,       # LayerNorm 1 (1, E) f32
    g2_ref, beta2_ref,       # LayerNorm 2 (1, E) f32
    o_ref,                   # (1, TQ, E)
    qkv_scratch,             # (Sp, 3E) bf16 VMEM (persists across qi steps)
    ctx_scratch,             # (TQ, E)  f32  VMEM
    *, num_heads, eps, s_valid, q_tile, ff_chunk, proj_chunk):
  f32, bf16 = jnp.float32, jnp.bfloat16
  Sp = x_ref.shape[1]
  E = x_ref.shape[2]
  H = num_heads
  Dh = E // H
  scale = 1.0 / math.sqrt(Dh)
  FF = w1_ref.shape[1]
  qi = pl.program_id(1)

  # ----- Fused QKV projection, once per batch element (cached in scratch) ---
  @pl.when(qi == 0)
  def _project_qkv():
    for r0 in range(0, Sp, proj_chunk):          # static chunking over rows
      r1 = min(r0 + proj_chunk, Sp)
      xb = x_ref[0, r0:r1, :].astype(bf16)
      qkv = jnp.dot(xb, wqkv_ref[...],
                    preferred_element_type=f32) + bqkv_ref[...]
      # Fold 1/sqrt(Dh) into the cached Q once (not per tile / per head).
      qkv_scratch[r0:r1, 0:E] = (qkv[:, 0:E] * scale).astype(bf16)
      qkv_scratch[r0:r1, E:3 * E] = qkv[:, E:3 * E].astype(bf16)

  row0 = pl.multiple_of(qi * q_tile, q_tile)
  xq = x_ref[0, pl.ds(row0, q_tile), :]          # (TQ, E) f32 residual path

  # Static key-padding mask (only emitted when the sequence was padded).
  if Sp > s_valid:
    key_valid = lax.broadcasted_iota(jnp.int32, (q_tile, Sp), 1) < s_valid

  # ----- per-head attention: no (H,S,S) tensor, no head transposes ----------
  for h in range(H):                             # H is small; static unroll
    lo = h * Dh
    qh = qkv_scratch[pl.ds(row0, q_tile), lo:lo + Dh]        # (TQ, Dh) bf16
    kh = qkv_scratch[:, E + lo:E + lo + Dh]                  # (Sp, Dh) bf16
    vh = qkv_scratch[:, 2 * E + lo:2 * E + lo + Dh]          # (Sp, Dh) bf16
    # scores[i, j] = qh[i, :] . kh[j, :]  (K^T contraction straight on MXU)
    s = lax.dot_general(qh, kh, (((1,), (1,)), ((), ())),
                        preferred_element_type=f32)          # (TQ, Sp)
    if Sp > s_valid:
      s = jnp.where(key_valid, s, -1e30)
    m = jnp.max(s, axis=-1, keepdims=True)
    p = jnp.exp(s - m)
    l = jnp.sum(p, axis=-1, keepdims=True)
    ctx_h = lax.dot_general(p.astype(bf16), vh, (((1,), (0,)), ((), ())),
                            preferred_element_type=f32)      # (TQ, Dh)
    ctx_scratch[:, lo:lo + Dh] = ctx_h * pl.reciprocal(l, approx=True)

  attn = jnp.dot(ctx_scratch[...].astype(bf16), wo_ref[...],
                 preferred_element_type=f32) + bo_ref[...]

  # TODO(synk): dropout is identity (eval semantics); src_mask /
  #             src_key_padding_mask of the PyTorch API are unsupported
  #             (not used by the reference module's forward).

  # ----- Residual + LayerNorm 1 (post-norm, f32) -----------------------------
  x1 = xq + attn
  mu1 = jnp.mean(x1, axis=-1, keepdims=True)
  var1 = jnp.mean(jnp.square(x1 - mu1), axis=-1, keepdims=True)
  x1n = (x1 - mu1) * lax.rsqrt(var1 + eps) * g1_ref[...] + beta1_ref[...]

  # ----- Feed-forward: single K=FF contraction unless explicitly chunked ----
  x1n_b = x1n.astype(bf16)
  ff = None
  for c0 in range(0, FF, ff_chunk):
    c1 = min(c0 + ff_chunk, FF)
    hc = jnp.dot(x1n_b, w1_ref[:, c0:c1],
                 preferred_element_type=f32) + b1_ref[:, c0:c1]
    hc = jnp.maximum(hc, 0.0)                    # ReLU
    part = jnp.dot(hc.astype(bf16), w2_ref[c0:c1, :],
                   preferred_element_type=f32)
    ff = part if ff is None else ff + part
  ff = ff + b2_ref[...]

  # ----- Residual + LayerNorm 2 (f32) ----------------------------------------
  x2 = x1n + ff
  mu2 = jnp.mean(x2, axis=-1, keepdims=True)
  var2 = jnp.mean(jnp.square(x2 - mu2), axis=-1, keepdims=True)
  x2n = (x2 - mu2) * lax.rsqrt(var2 + eps) * g2_ref[...] + beta2_ref[...]

  o_ref[0] = x2n.astype(o_ref.dtype)


# -----------------------------------------------------------------------------
# Wrapper
# -----------------------------------------------------------------------------

def _choose_tiling(S):
  """Return (padded_seq_len, q_tile)."""
  if S <= 256:
    return S, S                                  # single tile, no padding/mask
  Sp = _round_up(S, 128)
  q_tile = 256 if Sp % 256 == 0 else 128
  return Sp, q_tile


def encoder_layer(x, params, *, num_heads, eps=1e-5, ff_chunk=None):
  """One fused TransformerEncoderLayer. x: (B, S, E) float32, batch-first."""
  B, S, E = x.shape
  assert E % num_heads == 0
  (wqkv, bqkv, wo, bo, w1, b1, w2, b2, g1, beta1, g2, beta2) = params
  FF = w1.shape[1]

  Sp, q_tile = _choose_tiling(S)
  n_qt = Sp // q_tile
  x_in = x if Sp == S else jnp.pad(x, ((0, 0), (0, Sp - S), (0, 0)))

  if ff_chunk is None:
    ff_chunk = FF                                # no FFN chunking by default
  proj_chunk = min(512, Sp)                      # bounds the f32 QKV temp

  kernel = functools.partial(
      _encoder_layer_kernel, num_heads=num_heads, eps=eps, s_valid=S,
      q_tile=q_tile, ff_chunk=ff_chunk, proj_chunk=proj_chunk)

  def const_spec(p):
    # Whole-array block, same block for every grid step (weights / biases).
    # TODO(synk): single-buffer these (pipeline_mode=pl.Buffered(1)) once
    #             verified on the target jax version; saves ~weight_bytes VMEM.
    return pl.BlockSpec(p.shape, lambda b, qi: (0, 0))

  in_specs = [pl.BlockSpec((1, Sp, E), lambda b, qi: (b, 0, 0))]  # full sequence
  in_specs += [const_spec(p) for p in params]
  out_spec = pl.BlockSpec((1, q_tile, E), lambda b, qi: (b, qi, 0))

  # Footprint-derived VMEM budget (double-buffered blocks + scratch + working
  # set, with headroom), clamped to stay safe on v7x's 64 MiB physical VMEM.
  weight_bytes = sum(int(p.size) * p.dtype.itemsize for p in params)
  vmem_est = (2 * weight_bytes                   # constant blocks (dbl-buffer)
              + 2 * Sp * E * 4                   # x block (f32, dbl-buffer)
              + 2 * q_tile * E * 4               # output tile
              + Sp * 3 * E * 2                   # bf16 QKV scratch
              + q_tile * E * 4                   # ctx scratch
              + 6 * q_tile * max(Sp, FF) * 4)    # scores / probs / FFN temps
  vmem_limit = int(min(max(vmem_est * 3 // 2, 32 * 1024 * 1024),
                       60 * 1024 * 1024))

  flops = int(B * (2 * Sp * E * 3 * E                       # QKV proj (once/b)
                   + n_qt * (4 * q_tile * Sp * E            # scores + ctx
                             + 2 * q_tile * E * E           # out proj
                             + 4 * q_tile * E * FF)))       # FFN
  transcendentals = int(B * num_heads * Sp * Sp)
  bytes_accessed = int(weight_bytes + 2 * B * Sp * E * 4)

  out = pl.pallas_call(
      kernel,
      out_shape=jax.ShapeDtypeStruct((B, Sp, E), x.dtype),
      grid_spec=pltpu.PrefetchScalarGridSpec(
          num_scalar_prefetch=0,
          grid=(B, n_qt),
          in_specs=in_specs,
          out_specs=out_spec,
          scratch_shapes=[pltpu.VMEM((Sp, 3 * E), jnp.bfloat16),
                          pltpu.VMEM((q_tile, E), jnp.float32)]),
      compiler_params=pltpu.CompilerParams(
          # batch axis parallel (megacore / v7x 2-TC sharding); query-tile axis
          # arbitrary so the cached QKV scratch is reused across tiles.
          # TODO(synk): for B=1 with many tiles, split qi into an outer
          #             parallel axis of size 2 so both v7x TCs get work.
          dimension_semantics=("parallel", "arbitrary"),
          vmem_limit_bytes=vmem_limit),
      cost_estimate=pl.CostEstimate(flops=flops,
                                    transcendentals=transcendentals,
                                    bytes_accessed=bytes_accessed),
  )(x_in, *params)

  return out if Sp == S else out[:, :S, :]


def transformer_encoder(x, layer_params, *, num_heads):
  # TODO(synk): cross-layer weight-DMA prefetch (P10 cross-call futures) would
  #             hide each layer's weight load at small batch; layers run
  #             back-to-back here.
  for params in layer_params:
    x = encoder_layer(x, params, num_heads=num_heads)
  return x


# -----------------------------------------------------------------------------
# Deterministic parameter construction (mirrors nn.TransformerEncoderLayer)
# -----------------------------------------------------------------------------

def init_layer_params(key, embed_dim, dim_feedforward):
  E, FF = embed_dim, dim_feedforward
  ks = jax.random.split(key, 6)
  s = 0.02
  in_proj_w = jax.random.normal(ks[0], (3 * E, E), jnp.float32) * s   # (3E, E)
  in_proj_b = jax.random.normal(ks[1], (3 * E,), jnp.float32) * 0.01
  out_w = jax.random.normal(ks[2], (E, E), jnp.float32) * s           # (E, E)
  out_b = jnp.zeros((E,), jnp.float32)
  lin1_w = jax.random.normal(ks[3], (FF, E), jnp.float32) * s         # (FF, E)
  lin1_b = jax.random.normal(ks[4], (FF,), jnp.float32) * 0.01
  lin2_w = jax.random.normal(ks[5], (E, FF), jnp.float32) * s         # (E, FF)
  lin2_b = jnp.zeros((E,), jnp.float32)

  bf16 = jnp.bfloat16
  # Kernel layout: y = x @ W.T + b  ->  store W.T (bf16).  Q/K/V fused into a
  # single (E, 3E) operand (columns = [Wq^T | Wk^T | Wv^T]) so the projection
  # is one MXU matmul with N = 3E.
  wqkv = in_proj_w.T.astype(bf16)            # (E, 3E)
  bqkv = in_proj_b.reshape(1, 3 * E)
  wo = out_w.T.astype(bf16)                  # (E, E)
  bo = out_b.reshape(1, E)
  w1 = lin1_w.T.astype(bf16)                 # (E, FF)
  b1 = lin1_b.reshape(1, FF)
  w2 = lin2_w.T.astype(bf16)                 # (FF, E)
  b2 = lin2_b.reshape(1, E)
  g1 = jnp.ones((1, E), jnp.float32)
  beta1 = jnp.zeros((1, E), jnp.float32)
  g2 = jnp.ones((1, E), jnp.float32)
  beta2 = jnp.zeros((1, E), jnp.float32)

  # Note: bf16 weights + bf16 MXU operands => ~1e-2/1e-3 relative deviation vs
  # an f32 PyTorch reference; acceptable for inference, set tolerances
  # accordingly when comparing.
  return (wqkv, bqkv, wo, bo, w1, b1, w2, b2, g1, beta1, g2, beta2)


# -----------------------------------------------------------------------------

if __name__ == "__main__":
  # Module-consistent small shapes (nn.TransformerEncoderLayer defaults:
  # d_model=256, nhead=4, dim_feedforward=2048; num_layers=2).
  batch, seq_len = 2, 16
  embed_dim, num_heads, num_layers = 256, 4, 2
  dim_feedforward = 2048

  root = jax.random.PRNGKey(0)
  kx, *layer_keys = jax.random.split(root, num_layers + 1)

  x = jax.random.normal(kx, (batch, seq_len, embed_dim), jnp.float32)
  layer_params = [init_layer_params(k, embed_dim, dim_feedforward)
                  for k in layer_keys]

  out = transformer_encoder(x, layer_params, num_heads=num_heads)
  out = jax.block_until_ready(out)
  assert out.shape == (batch, seq_len, embed_dim)
  assert bool(jnp.all(jnp.isfinite(out)))
  print("KERNEL_OK")
</pallas_src>

<mosaic_0001>
module attributes {stable_mosaic.version = 11 : i64} {
  func.func @_encoder_layer_kernel(%arg0: i32, %arg1: i32, %arg2: memref<1x16x256xf32, #tpu.memory_space<vmem>>, %arg3: memref<256x768xbf16, #tpu.memory_space<vmem>>, %arg4: memref<1x768xf32, #tpu.memory_space<vmem>>, %arg5: memref<256x256xbf16, #tpu.memory_space<vmem>>, %arg6: memref<1x256xf32, #tpu.memory_space<vmem>>, %arg7: memref<256x2048xbf16, #tpu.memory_space<vmem>>, %arg8: memref<1x2048xf32, #tpu.memory_space<vmem>>, %arg9: memref<2048x256xbf16, #tpu.memory_space<vmem>>, %arg10: memref<1x256xf32, #tpu.memory_space<vmem>>, %arg11: memref<1x256xf32, #tpu.memory_space<vmem>>, %arg12: memref<1x256xf32, #tpu.memory_space<vmem>>, %arg13: memref<1x256xf32, #tpu.memory_space<vmem>>, %arg14: memref<1x256xf32, #tpu.memory_space<vmem>>, %arg15: memref<1x16x256xf32, #tpu.memory_space<vmem>>, %arg16: memref<16x768xbf16, #tpu.memory_space<vmem>>, %arg17: memref<16x256xf32, #tpu.memory_space<vmem>>) attributes {dimension_semantics = [#tpu.dimension_semantics<parallel>, #tpu.dimension_semantics<arbitrary>], iteration_bounds = array<i64: 2, 1>, scalar_prefetch = 0 : i64, scratch_operands = 2 : i64, tpu.core_type = #tpu.core_type<tc>, window_params = [{transform_indices = @transform_0, window_bounds = array<i64: 1, 16, 256>}, {pipeline_mode = #tpu.pipeline_mode<synchronous>, transform_indices = @transform_1, window_bounds = array<i64: 256, 768>}, {pipeline_mode = #tpu.pipeline_mode<synchronous>, transform_indices = @transform_2, window_bounds = array<i64: 1, 768>}, {pipeline_mode = #tpu.pipeline_mode<synchronous>, transform_indices = @transform_3, window_bounds = array<i64: 256, 256>}, {pipeline_mode = #tpu.pipeline_mode<synchronous>, transform_indices = @transform_4, window_bounds = array<i64: 1, 256>}, {pipeline_mode = #tpu.pipeline_mode<synchronous>, transform_indices = @transform_5, window_bounds = array<i64: 256, 2048>}, {pipeline_mode = #tpu.pipeline_mode<synchronous>, transform_indices = @transform_6, window_bounds = array<i64: 1, 2048>}, {pipeline_mode = #tpu.pipeline_mode<synchronous>, transform_indices = @transform_7, window_bounds = array<i64: 2048, 256>}, {pipeline_mode = #tpu.pipeline_mode<synchronous>, transform_indices = @transform_8, window_bounds = array<i64: 1, 256>}, {pipeline_mode = #tpu.pipeline_mode<synchronous>, transform_indices = @transform_9, window_bounds = array<i64: 1, 256>}, {pipeline_mode = #tpu.pipeline_mode<synchronous>, transform_indices = @transform_10, window_bounds = array<i64: 1, 256>}, {pipeline_mode = #tpu.pipeline_mode<synchronous>, transform_indices = @transform_11, window_bounds = array<i64: 1, 256>}, {pipeline_mode = #tpu.pipeline_mode<synchronous>, transform_indices = @transform_12, window_bounds = array<i64: 1, 256>}, {transform_indices = @transform_13, window_bounds = array<i64: 1, 16, 256>}]} {
    %c0_i32 = arith.constant 0 : i32
    %0 = arith.cmpi eq, %arg1, %c0_i32 : i32
    %1 = arith.extui %0 : i1 to i32
    %c0_i32_0 = arith.constant 0 : i32
    %2 = arith.cmpi ne, %1, %c0_i32_0 : i32
    scf.if %2 {
      %c0_73 = arith.constant 0 : index
      %c0_74 = arith.constant 0 : index
      %c0_75 = arith.constant 0 : index
      %154 = vector.load %arg2[%c0_73, %c0_74, %c0_75] : memref<1x16x256xf32, #tpu.memory_space<vmem>>, vector<1x16x256xf32>
      %155 = vector.shape_cast %154 : vector<1x16x256xf32> to vector<16x256xf32>
      %156 = arith.truncf %155 : vector<16x256xf32> to vector<16x256xbf16>
      %c0_76 = arith.constant 0 : index
      %c0_77 = arith.constant 0 : index
      %157 = vector.load %arg3[%c0_76, %c0_77] : memref<256x768xbf16, #tpu.memory_space<vmem>>, vector<256x768xbf16>
      %cst_78 = arith.constant dense<0.000000e+00> : vector<16x768xf32>
      %158 = tpu.matmul %156, %157, %cst_78 {dimension_numbers = #tpu.dot_dimension_numbers<[1], [0], [0], [1], [0, 0, 1, 1], [], []>} : vector<16x256xbf16>, vector<256x768xbf16>, vector<16x768xf32> -> vector<16x768xf32>
      %c0_79 = arith.constant 0 : index
      %c0_80 = arith.constant 0 : index
      %159 = vector.load %arg4[%c0_79, %c0_80] : memref<1x768xf32, #tpu.memory_space<vmem>>, vector<1x768xf32>
      %160 = vector.broadcast %159 : vector<1x768xf32> to vector<16x768xf32>
      %161 = arith.addf %158, %160 : vector<16x768xf32>
      %162 = vector.extract_strided_slice %161 {offsets = [0, 0], sizes = [16, 256], strides = [1, 1]} : vector<16x768xf32> to vector<16x256xf32>
      %cst_81 = arith.constant 1.250000e-01 : f32
      %163 = vector.broadcast %cst_81 : f32 to vector<16x256xf32>
      %164 = arith.mulf %162, %163 : vector<16x256xf32>
      %165 = arith.truncf %164 : vector<16x256xf32> to vector<16x256xbf16>
      %c0_82 = arith.constant 0 : index
      %c0_83 = arith.constant 0 : index
      %166 = vector.load %arg16[%c0_82, %c0_83] : memref<16x768xbf16, #tpu.memory_space<vmem>>, vector<16x256xbf16>
      tpu.vector_store %arg16[%c0_82, %c0_83], %165 {strides = array<i32>} : memref<16x768xbf16, #tpu.memory_space<vmem>>, vector<16x256xbf16>,
      %167 = vector.extract_strided_slice %161 {offsets = [0, 256], sizes = [16, 512], strides = [1, 1]} : vector<16x768xf32> to vector<16x512xf32>
      %168 = arith.truncf %167 : vector<16x512xf32> to vector<16x512xbf16>
      %c0_84 = arith.constant 0 : index
      %c256_85 = arith.constant 256 : index
      %169 = vector.load %arg16[%c0_84, %c256_85] : memref<16x768xbf16, #tpu.memory_space<vmem>>, vector<16x512xbf16>
      tpu.vector_store %arg16[%c0_84, %c256_85], %168 {strides = array<i32>} : memref<16x768xbf16, #tpu.memory_space<vmem>>, vector<16x512xbf16>,
    } else {
    }
    %c16_i32 = arith.constant 16 : i32
    %3 = arith.muli %arg1, %c16_i32 : i32
    %4 = tpu.assume_multiple %3, 16 : i32
    %c0 = arith.constant 0 : index
    %5 = arith.index_cast %4 : i32 to index
    %c0_1 = arith.constant 0 : index
    %6 = vector.load %arg2[%c0, %5, %c0_1] : memref<1x16x256xf32, #tpu.memory_space<vmem>>, vector<1x16x256xf32>
    %7 = vector.shape_cast %6 : vector<1x16x256xf32> to vector<16x256xf32>
    %8 = arith.index_cast %4 : i32 to index
    %c0_2 = arith.constant 0 : index
    %9 = vector.load %arg16[%8, %c0_2] : memref<16x768xbf16, #tpu.memory_space<vmem>>, vector<16x64xbf16>
    %c0_3 = arith.constant 0 : index
    %c256 = arith.constant 256 : index
    %10 = vector.load %arg16[%c0_3, %c256] : memref<16x768xbf16, #tpu.memory_space<vmem>>, vector<16x64xbf16>
    %c0_4 = arith.constant 0 : index
    %c512 = arith.constant 512 : index
    %11 = vector.load %arg16[%c0_4, %c512] : memref<16x768xbf16, #tpu.memory_space<vmem>>, vector<16x64xbf16>
    %cst = arith.constant dense<0.000000e+00> : vector<16x16xf32>
    %12 = tpu.matmul %9, %10, %cst {dimension_numbers = #tpu.dot_dimension_numbers<[1], [1], [0], [0], [0, 0, 1, 0], [], []>} : vector<16x64xbf16>, vector<16x64xbf16>, vector<16x16xf32> -> vector<16x16xf32>
    %cst_5 = arith.constant dense<0xFF800000> : vector<16xf32>
    %13 = vector.multi_reduction <maximumf>, %12, %cst_5 [1] : vector<16x16xf32> to vector<16xf32>
    %14 = vector.shape_cast %13 : vector<16xf32> to vector<16x1xf32>
    %15 = vector.broadcast %14 : vector<16x1xf32> to vector<16x16xf32>
    %16 = arith.subf %12, %15 : vector<16x16xf32>
    %17 = math.exp %16 : vector<16x16xf32>
    %cst_6 = arith.constant dense<0.000000e+00> : vector<16xf32>
    %18 = vector.multi_reduction <add>, %17, %cst_6 [1] : vector<16x16xf32> to vector<16xf32>
    %19 = vector.shape_cast %18 : vector<16xf32> to vector<16x1xf32>
    %20 = arith.truncf %17 : vector<16x16xf32> to vector<16x16xbf16>
    %cst_7 = arith.constant dense<0.000000e+00> : vector<16x64xf32>
    %21 = tpu.matmul %20, %11, %cst_7 {dimension_numbers = #tpu.dot_dimension_numbers<[1], [0], [0], [1], [0, 0, 1, 1], [], []>} : vector<16x16xbf16>, vector<16x64xbf16>, vector<16x64xf32> -> vector<16x64xf32>
    %22 = tpu.reciprocal %19 {approx = true} : vector<16x1xf32> -> vector<16x1xf32>
    %23 = vector.broadcast %22 : vector<16x1xf32> to vector<16x64xf32>
    %24 = arith.mulf %21, %23 : vector<16x64xf32>
    %c0_8 = arith.constant 0 : index
    %c0_9 = arith.constant 0 : index
    %25 = vector.load %arg17[%c0_8, %c0_9] : memref<16x256xf32, #tpu.memory_space<vmem>>, vector<16x64xf32>
    tpu.vector_store %arg17[%c0_8, %c0_9], %24 {strides = array<i32>} : memref<16x256xf32, #tpu.memory_space<vmem>>, vector<16x64xf32>,
    %26 = arith.index_cast %4 : i32 to index
    %c64 = arith.constant 64 : index
    %27 = vector.load %arg16[%26, %c64] : memref<16x768xbf16, #tpu.memory_space<vmem>>, vector<16x64xbf16>
    %c0_10 = arith.constant 0 : index
    %c320 = arith.constant 320 : index
    %28 = vector.load %arg16[%c0_10, %c320] : memref<16x768xbf16, #tpu.memory_space<vmem>>, vector<16x64xbf16>
    %c0_11 = arith.constant 0 : index
    %c576 = arith.constant 576 : index
    %29 = vector.load %arg16[%c0_11, %c576] : memref<16x768xbf16, #tpu.memory_space<vmem>>, vector<16x64xbf16>
    %cst_12 = arith.constant dense<0.000000e+00> : vector<16x16xf32>
    %30 = tpu.matmul %27, %28, %cst_12 {dimension_numbers = #tpu.dot_dimension_numbers<[1], [1], [0], [0], [0, 0, 1, 0], [], []>} : vector<16x64xbf16>, vector<16x64xbf16>, vector<16x16xf32> -> vector<16x16xf32>
    %cst_13 = arith.constant dense<0xFF800000> : vector<16xf32>
    %31 = vector.multi_reduction <maximumf>, %30, %cst_13 [1] : vector<16x16xf32> to vector<16xf32>
    %32 = vector.shape_cast %31 : vector<16xf32> to vector<16x1xf32>
    %33 = vector.broadcast %32 : vector<16x1xf32> to vector<16x16xf32>
    %34 = arith.subf %30, %33 : vector<16x16xf32>
    %35 = math.exp %34 : vector<16x16xf32>
    %cst_14 = arith.constant dense<0.000000e+00> : vector<16xf32>
    %36 = vector.multi_reduction <add>, %35, %cst_14 [1] : vector<16x16xf32> to vector<16xf32>
    %37 = vector.shape_cast %36 : vector<16xf32> to vector<16x1xf32>
    %38 = arith.truncf %35 : vector<16x16xf32> to vector<16x16xbf16>
    %cst_15 = arith.constant dense<0.000000e+00> : vector<16x64xf32>
    %39 = tpu.matmul %38, %29, %cst_15 {dimension_numbers = #tpu.dot_dimension_numbers<[1], [0], [0], [1], [0, 0, 1, 1], [], []>} : vector<16x16xbf16>, vector<16x64xbf16>, vector<16x64xf32> -> vector<16x64xf32>
    %40 = tpu.reciprocal %37 {approx = true} : vector<16x1xf32> -> vector<16x1xf32>
    %41 = vector.broadcast %40 : vector<16x1xf32> to vector<16x64xf32>
    %42 = arith.mulf %39, %41 : vector<16x64xf32>
    %c0_16 = arith.constant 0 : index
    %c64_17 = arith.constant 64 : index
    %43 = vector.load %arg17[%c0_16, %c64_17] : memref<16x256xf32, #tpu.memory_space<vmem>>, vector<16x64xf32>
    tpu.vector_store %arg17[%c0_16, %c64_17], %42 {strides = array<i32>} : memref<16x256xf32, #tpu.memory_space<vmem>>, vector<16x64xf32>,
    %44 = arith.index_cast %4 : i32 to index
    %c128 = arith.constant 128 : index
    %45 = vector.load %arg16[%44, %c128] : memref<16x768xbf16, #tpu.memory_space<vmem>>, vector<16x64xbf16>
    %c0_18 = arith.constant 0 : index
    %c384 = arith.constant 384 : index
    %46 = vector.load %arg16[%c0_18, %c384] : memref<16x768xbf16, #tpu.memory_space<vmem>>, vector<16x64xbf16>
    %c0_19 = arith.constant 0 : index
    %c640 = arith.constant 640 : index
    %47 = vector.load %arg16[%c0_19, %c640] : memref<16x768xbf16, #tpu.memory_space<vmem>>, vector<16x64xbf16>
    %cst_20 = arith.constant dense<0.000000e+00> : vector<16x16xf32>
    %48 = tpu.matmul %45, %46, %cst_20 {dimension_numbers = #tpu.dot_dimension_numbers<[1], [1], [0], [0], [0, 0, 1, 0], [], []>} : vector<16x64xbf16>, vector<16x64xbf16>, vector<16x16xf32> -> vector<16x16xf32>
    %cst_21 = arith.constant dense<0xFF800000> : vector<16xf32>
    %49 = vector.multi_reduction <maximumf>, %48, %cst_21 [1] : vector<16x16xf32> to vector<16xf32>
    %50 = vector.shape_cast %49 : vector<16xf32> to vector<16x1xf32>
    %51 = vector.broadcast %50 : vector<16x1xf32> to vector<16x16xf32>
    %52 = arith.subf %48, %51 : vector<16x16xf32>
    %53 = math.exp %52 : vector<16x16xf32>
    %cst_22 = arith.constant dense<0.000000e+00> : vector<16xf32>
    %54 = vector.multi_reduction <add>, %53, %cst_22 [1] : vector<16x16xf32> to vector<16xf32>
    %55 = vector.shape_cast %54 : vector<16xf32> to vector<16x1xf32>
    %56 = arith.truncf %53 : vector<16x16xf32> to vector<16x16xbf16>
    %cst_23 = arith.constant dense<0.000000e+00> : vector<16x64xf32>
    %57 = tpu.matmul %56, %47, %cst_23 {dimension_numbers = #tpu.dot_dimension_numbers<[1], [0], [0], [1], [0, 0, 1, 1], [], []>} : vector<16x16xbf16>, vector<16x64xbf16>, vector<16x64xf32> -> vector<16x64xf32>
    %58 = tpu.reciprocal %55 {approx = true} : vector<16x1xf32> -> vector<16x1xf32>
    %59 = vector.broadcast %58 : vector<16x1xf32> to vector<16x64xf32>
    %60 = arith.mulf %57, %59 : vector<16x64xf32>
    %c0_24 = arith.constant 0 : index
    %c128_25 = arith.constant 128 : index
    %61 = vector.load %arg17[%c0_24, %c128_25] : memref<16x256xf32, #tpu.memory_space<vmem>>, vector<16x64xf32>
    tpu.vector_store %arg17[%c0_24, %c128_25], %60 {strides = array<i32>} : memref<16x256xf32, #tpu.memory_space<vmem>>, vector<16x64xf32>,
    %62 = arith.index_cast %4 : i32 to index
    %c192 = arith.constant 192 : index
    %63 = vector.load %arg16[%62, %c192] : memref<16x768xbf16, #tpu.memory_space<vmem>>, vector<16x64xbf16>
    %c0_26 = arith.constant 0 : index
    %c448 = arith.constant 448 : index
    %64 = vector.load %arg16[%c0_26, %c448] : memref<16x768xbf16, #tpu.memory_space<vmem>>, vector<16x64xbf16>
    %c0_27 = arith.constant 0 : index
    %c704 = arith.constant 704 : index
    %65 = vector.load %arg16[%c0_27, %c704] : memref<16x768xbf16, #tpu.memory_space<vmem>>, vector<16x64xbf16>
    %cst_28 = arith.constant dense<0.000000e+00> : vector<16x16xf32>
    %66 = tpu.matmul %63, %64, %cst_28 {dimension_numbers = #tpu.dot_dimension_numbers<[1], [1], [0], [0], [0, 0, 1, 0], [], []>} : vector<16x64xbf16>, vector<16x64xbf16>, vector<16x16xf32> -> vector<16x16xf32>
    %cst_29 = arith.constant dense<0xFF800000> : vector<16xf32>
    %67 = vector.multi_reduction <maximumf>, %66, %cst_29 [1] : vector<16x16xf32> to vector<16xf32>
    %68 = vector.shape_cast %67 : vector<16xf32> to vector<16x1xf32>
    %69 = vector.broadcast %68 : vector<16x1xf32> to vector<16x16xf32>
    %70 = arith.subf %66, %69 : vector<16x16xf32>
    %71 = math.exp %70 : vector<16x16xf32>
    %cst_30 = arith.constant dense<0.000000e+00> : vector<16xf32>
    %72 = vector.multi_reduction <add>, %71, %cst_30 [1] : vector<16x16xf32> to vector<16xf32>
    %73 = vector.shape_cast %72 : vector<16xf32> to vector<16x1xf32>
    %74 = arith.truncf %71 : vector<16x16xf32> to vector<16x16xbf16>
    %cst_31 = arith.constant dense<0.000000e+00> : vector<16x64xf32>
    %75 = tpu.matmul %74, %65, %cst_31 {dimension_numbers = #tpu.dot_dimension_numbers<[1], [0], [0], [1], [0, 0, 1, 1], [], []>} : vector<16x16xbf16>, vector<16x64xbf16>, vector<16x64xf32> -> vector<16x64xf32>
    %76 = tpu.reciprocal %73 {approx = true} : vector<16x1xf32> -> vector<16x1xf32>
    %77 = vector.broadcast %76 : vector<16x1xf32> to vector<16x64xf32>
    %78 = arith.mulf %75, %77 : vector<16x64xf32>
    %c0_32 = arith.constant 0 : index
    %c192_33 = arith.constant 192 : index
    %79 = vector.load %arg17[%c0_32, %c192_33] : memref<16x256xf32, #tpu.memory_space<vmem>>, vector<16x64xf32>
    tpu.vector_store %arg17[%c0_32, %c192_33], %78 {strides = array<i32>} : memref<16x256xf32, #tpu.memory_space<vmem>>, vector<16x64xf32>,
    %c0_34 = arith.constant 0 : index
    %c0_35 = arith.constant 0 : index
    %80 = vector.load %arg17[%c0_34, %c0_35] : memref<16x256xf32, #tpu.memory_space<vmem>>, vector<16x256xf32>
    %81 = arith.truncf %80 : vector<16x256xf32> to vector<16x256xbf16>
    %c0_36 = arith.constant 0 : index
    %c0_37 = arith.constant 0 : index
    %82 = vector.load %arg5[%c0_36, %c0_37] : memref<256x256xbf16, #tpu.memory_space<vmem>>, vector<256x256xbf16>
    %cst_38 = arith.constant dense<0.000000e+00> : vector<16x256xf32>
    %83 = tpu.matmul %81, %82, %cst_38 {dimension_numbers = #tpu.dot_dimension_numbers<[1], [0], [0], [1], [0, 0, 1, 1], [], []>} : vector<16x256xbf16>, vector<256x256xbf16>, vector<16x256xf32> -> vector<16x256xf32>
    %c0_39 = arith.constant 0 : index
    %c0_40 = arith.constant 0 : index
    %84 = vector.load %arg6[%c0_39, %c0_40] : memref<1x256xf32, #tpu.memory_space<vmem>>, vector<1x256xf32>
    %85 = vector.broadcast %84 : vector<1x256xf32> to vector<16x256xf32>
    %86 = arith.addf %83, %85 : vector<16x256xf32>
    %87 = arith.addf %7, %86 : vector<16x256xf32>
    %cst_41 = arith.constant dense<0.000000e+00> : vector<16xf32>
    %88 = vector.multi_reduction <add>, %87, %cst_41 [1] : vector<16x256xf32> to vector<16xf32>
    %89 = vector.shape_cast %88 : vector<16xf32> to vector<16x1xf32>
    %cst_42 = arith.constant 2.560000e+02 : f32
    %90 = vector.broadcast %cst_42 : f32 to vector<16x1xf32>
    %91 = arith.divf %89, %90 : vector<16x1xf32>
    %92 = vector.broadcast %91 : vector<16x1xf32> to vector<16x256xf32>
    %93 = arith.subf %87, %92 : vector<16x256xf32>
    %94 = arith.mulf %93, %93 : vector<16x256xf32>
    %cst_43 = arith.constant dense<0.000000e+00> : vector<16xf32>
    %95 = vector.multi_reduction <add>, %94, %cst_43 [1] : vector<16x256xf32> to vector<16xf32>
    %96 = vector.shape_cast %95 : vector<16xf32> to vector<16x1xf32>
    %cst_44 = arith.constant 2.560000e+02 : f32
    %97 = vector.broadcast %cst_44 : f32 to vector<16x1xf32>
    %98 = arith.divf %96, %97 : vector<16x1xf32>
    %99 = vector.broadcast %91 : vector<16x1xf32> to vector<16x256xf32>
    %100 = arith.subf %87, %99 : vector<16x256xf32>
    %cst_45 = arith.constant 9.99999974E-6 : f32
    %101 = vector.broadcast %cst_45 : f32 to vector<16x1xf32>
    %102 = arith.addf %98, %101 : vector<16x1xf32>
    %103 = math.rsqrt %102 : vector<16x1xf32>
    %104 = vector.broadcast %103 : vector<16x1xf32> to vector<16x256xf32>
    %105 = arith.mulf %100, %104 : vector<16x256xf32>
    %c0_46 = arith.constant 0 : index
    %c0_47 = arith.constant 0 : index
    %106 = vector.load %arg11[%c0_46, %c0_47] : memref<1x256xf32, #tpu.memory_space<vmem>>, vector<1x256xf32>
    %107 = vector.broadcast %106 : vector<1x256xf32> to vector<16x256xf32>
    %108 = arith.mulf %105, %107 : vector<16x256xf32>
    %c0_48 = arith.constant 0 : index
    %c0_49 = arith.constant 0 : index
    %109 = vector.load %arg12[%c0_48, %c0_49] : memref<1x256xf32, #tpu.memory_space<vmem>>, vector<1x256xf32>
    %110 = vector.broadcast %109 : vector<1x256xf32> to vector<16x256xf32>
    %111 = arith.addf %108, %110 : vector<16x256xf32>
    %112 = arith.truncf %111 : vector<16x256xf32> to vector<16x256xbf16>
    %c0_50 = arith.constant 0 : index
    %c0_51 = arith.constant 0 : index
    %113 = vector.load %arg7[%c0_50, %c0_51] : memref<256x2048xbf16, #tpu.memory_space<vmem>>, vector<256x2048xbf16>
    %cst_52 = arith.constant dense<0.000000e+00> : vector<16x2048xf32>
    %114 = tpu.matmul %112, %113, %cst_52 {dimension_numbers = #tpu.dot_dimension_numbers<[1], [0], [0], [1], [0, 0, 1, 1], [], []>} : vector<16x256xbf16>, vector<256x2048xbf16>, vector<16x2048xf32> -> vector<16x2048xf32>
    %c0_53 = arith.constant 0 : index
    %c0_54 = arith.constant 0 : index
    %115 = vector.load %arg8[%c0_53, %c0_54] : memref<1x2048xf32, #tpu.memory_space<vmem>>, vector<1x2048xf32>
    %116 = vector.broadcast %115 : vector<1x2048xf32> to vector<16x2048xf32>
    %117 = arith.addf %114, %116 : vector<16x2048xf32>
    %cst_55 = arith.constant 0.000000e+00 : f32
    %118 = vector.broadcast %cst_55 : f32 to vector<16x2048xf32>
    %119 = arith.maximumf %117, %118 : vector<16x2048xf32>
    %120 = arith.truncf %119 : vector<16x2048xf32> to vector<16x2048xbf16>
    %c0_56 = arith.constant 0 : index
    %c0_57 = arith.constant 0 : index
    %121 = vector.load %arg9[%c0_56, %c0_57] : memref<2048x256xbf16, #tpu.memory_space<vmem>>, vector<2048x256xbf16>
    %cst_58 = arith.constant dense<0.000000e+00> : vector<16x256xf32>
    %122 = tpu.matmul %120, %121, %cst_58 {dimension_numbers = #tpu.dot_dimension_numbers<[1], [0], [0], [1], [0, 0, 1, 1], [], []>} : vector<16x2048xbf16>, vector<2048x256xbf16>, vector<16x256xf32> -> vector<16x256xf32>
    %c0_59 = arith.constant 0 : index
    %c0_60 = arith.constant 0 : index
    %123 = vector.load %arg10[%c0_59, %c0_60] : memref<1x256xf32, #tpu.memory_space<vmem>>, vector<1x256xf32>
    %124 = vector.broadcast %123 : vector<1x256xf32> to vector<16x256xf32>
    %125 = arith.addf %122, %124 : vector<16x256xf32>
    %126 = arith.addf %111, %125 : vector<16x256xf32>
    %cst_61 = arith.constant dense<0.000000e+00> : vector<16xf32>
    %127 = vector.multi_reduction <add>, %126, %cst_61 [1] : vector<16x256xf32> to vector<16xf32>
    %128 = vector.shape_cast %127 : vector<16xf32> to vector<16x1xf32>
    %cst_62 = arith.constant 2.560000e+02 : f32
    %129 = vector.broadcast %cst_62 : f32 to vector<16x1xf32>
    %130 = arith.divf %128, %129 : vector<16x1xf32>
    %131 = vector.broadcast %130 : vector<16x1xf32> to vector<16x256xf32>
    %132 = arith.subf %126, %131 : vector<16x256xf32>
    %133 = arith.mulf %132, %132 : vector<16x256xf32>
    %cst_63 = arith.constant dense<0.000000e+00> : vector<16xf32>
    %134 = vector.multi_reduction <add>, %133, %cst_63 [1] : vector<16x256xf32> to vector<16xf32>
    %135 = vector.shape_cast %134 : vector<16xf32> to vector<16x1xf32>
    %cst_64 = arith.constant 2.560000e+02 : f32
    %136 = vector.broadcast %cst_64 : f32 to vector<16x1xf32>
    %137 = arith.divf %135, %136 : vector<16x1xf32>
    %138 = vector.broadcast %130 : vector<16x1xf32> to vector<16x256xf32>
    %139 = arith.subf %126, %138 : vector<16x256xf32>
    %cst_65 = arith.constant 9.99999974E-6 : f32
    %140 = vector.broadcast %cst_65 : f32 to vector<16x1xf32>
    %141 = arith.addf %137, %140 : vector<16x1xf32>
    %142 = math.rsqrt %141 : vector<16x1xf32>
    %143 = vector.broadcast %142 : vector<16x1xf32> to vector<16x256xf32>
    %144 = arith.mulf %139, %143 : vector<16x256xf32>
    %c0_66 = arith.constant 0 : index
    %c0_67 = arith.constant 0 : index
    %145 = vector.load %arg13[%c0_66, %c0_67] : memref<1x256xf32, #tpu.memory_space<vmem>>, vector<1x256xf32>
    %146 = vector.broadcast %145 : vector<1x256xf32> to vector<16x256xf32>
    %147 = arith.mulf %144, %146 : vector<16x256xf32>
    %c0_68 = arith.constant 0 : index
    %c0_69 = arith.constant 0 : index
    %148 = vector.load %arg14[%c0_68, %c0_69] : memref<1x256xf32, #tpu.memory_space<vmem>>, vector<1x256xf32>
    %149 = vector.broadcast %148 : vector<1x256xf32> to vector<16x256xf32>
    %150 = arith.addf %147, %149 : vector<16x256xf32>
    %c0_70 = arith.constant 0 : index
    %c0_71 = arith.constant 0 : index
    %c0_72 = arith.constant 0 : index
    %151 = vector.load %arg15[%c0_70, %c0_71, %c0_72] : memref<1x16x256xf32, #tpu.memory_space<vmem>>, vector<1x16x256xf32>
    %152 = vector.shape_cast %151 : vector<1x16x256xf32> to vector<16x256xf32>
    %153 = vector.shape_cast %150 : vector<16x256xf32> to vector<1x16x256xf32>
    tpu.vector_store %arg15[%c0_70, %c0_71, %c0_72], %153 {strides = array<i32>} : memref<1x16x256xf32, #tpu.memory_space<vmem>>, vector<1x16x256xf32>,
    return
  }
  func.func @transform_0(%arg0: i32, %arg1: i32) -> (i32, i32, i32) {
    %c0_i32 = arith.constant 0 : i32
    %c0_i32_0 = arith.constant 0 : i32
    %c0_i32_1 = arith.constant 0 : i32
    return %arg0, %c0_i32, %c0_i32_0 : i32, i32, i32
  }
  func.func @transform_1(%arg0: i32, %arg1: i32) -> (i32, i32) {
    %c0_i32 = arith.constant 0 : i32
    %c0_i32_0 = arith.constant 0 : i32
    %c0_i32_1 = arith.constant 0 : i32
    return %c0_i32, %c0_i32_0 : i32, i32
  }
  func.func @transform_2(%arg0: i32, %arg1: i32) -> (i32, i32) {
    %c0_i32 = arith.constant 0 : i32
    %c0_i32_0 = arith.constant 0 : i32
    %c0_i32_1 = arith.constant 0 : i32
    return %c0_i32, %c0_i32_0 : i32, i32
  }
  func.func @transform_3(%arg0: i32, %arg1: i32) -> (i32, i32) {
    %c0_i32 = arith.constant 0 : i32
    %c0_i32_0 = arith.constant 0 : i32
    %c0_i32_1 = arith.constant 0 : i32
    return %c0_i32, %c0_i32_0 : i32, i32
  }
  func.func @transform_4(%arg0: i32, %arg1: i32) -> (i32, i32) {
    %c0_i32 = arith.constant 0 : i32
    %c0_i32_0 = arith.constant 0 : i32
    %c0_i32_1 = arith.constant 0 : i32
    return %c0_i32, %c0_i32_0 : i32, i32
  }
  func.func @transform_5(%arg0: i32, %arg1: i32) -> (i32, i32) {
    %c0_i32 = arith.constant 0 : i32
    %c0_i32_0 = arith.constant 0 : i32
    %c0_i32_1 = arith.constant 0 : i32
    return %c0_i32, %c0_i32_0 : i32, i32
  }
  func.func @transform_6(%arg0: i32, %arg1: i32) -> (i32, i32) {
    %c0_i32 = arith.constant 0 : i32
    %c0_i32_0 = arith.constant 0 : i32
    %c0_i32_1 = arith.constant 0 : i32
    return %c0_i32, %c0_i32_0 : i32, i32
  }
  func.func @transform_7(%arg0: i32, %arg1: i32) -> (i32, i32) {
    %c0_i32 = arith.constant 0 : i32
    %c0_i32_0 = arith.constant 0 : i32
    %c0_i32_1 = arith.constant 0 : i32
    return %c0_i32, %c0_i32_0 : i32, i32
  }
  func.func @transform_8(%arg0: i32, %arg1: i32) -> (i32, i32) {
    %c0_i32 = arith.constant 0 : i32
    %c0_i32_0 = arith.constant 0 : i32
    %c0_i32_1 = arith.constant 0 : i32
    return %c0_i32, %c0_i32_0 : i32, i32
  }
  func.func @transform_9(%arg0: i32, %arg1: i32) -> (i32, i32) {
    %c0_i32 = arith.constant 0 : i32
    %c0_i32_0 = arith.constant 0 : i32
    %c0_i32_1 = arith.constant 0 : i32
    return %c0_i32, %c0_i32_0 : i32, i32
  }
  func.func @transform_10(%arg0: i32, %arg1: i32) -> (i32, i32) {
    %c0_i32 = arith.constant 0 : i32
    %c0_i32_0 = arith.constant 0 : i32
    %c0_i32_1 = arith.constant 0 : i32
    return %c0_i32, %c0_i32_0 : i32, i32
  }
  func.func @transform_11(%arg0: i32, %arg1: i32) -> (i32, i32) {
    %c0_i32 = arith.constant 0 : i32
    %c0_i32_0 = arith.constant 0 : i32
    %c0_i32_1 = arith.constant 0 : i32
    return %c0_i32, %c0_i32_0 : i32, i32
  }
  func.func @transform_12(%arg0: i32, %arg1: i32) -> (i32, i32) {
    %c0_i32 = arith.constant 0 : i32
    %c0_i32_0 = arith.constant 0 : i32
    %c0_i32_1 = arith.constant 0 : i32
    return %c0_i32, %c0_i32_0 : i32, i32
  }
  func.func @transform_13(%arg0: i32, %arg1: i32) -> (i32, i32, i32) {
    %c0_i32 = arith.constant 0 : i32
    %c0_i32_0 = arith.constant 0 : i32
    return %arg0, %arg1, %c0_i32 : i32, i32, i32
  }
}

</mosaic_0001>

<bundles_post_ra>
// kernel: tpu_custom_call.1
= control target key start
LH: loop header
LB: loop body
LE: loop exit
PB: predicated region body
PF: predicated region fallthrough
CT: control target
= control target key end

     0   :  { %s8822_s0 = inlined_call_operand.hbm [shape: f32[2,16,256], index: 0, kind: input, shape index: {}]   ;;  %s8823_s1 = inlined_call_operand.hbm [shape: bf16[256,768], index: 1, kind: input, shape index: {}]   ;;  %s8824_s2 = inlined_call_operand.vmem [shape: f32[1,768], index: 2, kind: input, shape index: {}]   ;;  %s8825_s3 = inlined_call_operand.hbm [shape: bf16[256,256], index: 3, kind: input, shape index: {}]   ;;  %s8826_s4 = inlined_call_operand.hbm [shape: f32[1,256], index: 4, kind: input, shape index: {}]   ;;  %s8827_s5 = inlined_call_operand.hbm [shape: bf16[256,2048], index: 5, kind: input, shape index: {}]   ;;  %s8828_s6 = inlined_call_operand.vmem [shape: f32[1,2048], index: 6, kind: input, shape index: {}]   ;;  %s8829_s7 = inlined_call_operand.hbm [shape: bf16[2048,256], index: 7, kind: input, shape index: {}]   ;;  %s8830_s8 = inlined_call_operand.vmem [shape: f32[1,256], index: 8, kind: input, shape index: {}]   ;;  %s8831_s9 = inlined_call_operand.vmem [shape: f32[1,256], index: 9, kind: input, shape index: {}]   ;;  %s8832_s10 = inlined_call_operand.vmem [shape: f32[1,256], index: 10, kind: input, shape index: {}]   ;;  %s8833_s11 = inlined_call_operand.vmem [shape: f32[1,256], index: 11, kind: input, shape index: {}]   ;;  %s8834_s12 = inlined_call_operand.vmem [shape: f32[1,256], index: 12, kind: input, shape index: {}]   ;;  %s8835_s13 = inlined_call_operand.hbm [shape: f32[2,16,256], index: 13, kind: output, shape index: {}]  }
   0x1   :  { %8845 = sst [smem:[#allocation22_spill]] %s8828_s6 }
   0x2   :  { %8846 = sst [smem:[#allocation23_spill]] %s8830_s8 }
   0x3   :  { %8847 = sst [smem:[#allocation24_spill]] %s8832_s10 }
   0x4   :  { %8848 = sst [smem:[#allocation25_spill]] %s8833_s11 }
   0x5   :  { %8849 = sst [smem:[#allocation26_spill]] %s8834_s12 }
   0x6   :  { %8850 = sst [smem:[#allocation27_spill]] %s8835_s13 }
   0x7   :  { %18 = vsyncpa [#allocation5], 0 }
   0x8   :  { %20 = vsyncpa [#allocation5 + $0x1], 0 }
   0x9   :  { %21 = vsyncpa [#allocation8], 0 }
   0xa   :  { %22 = vsyncpa [#allocation11], 0 }
   0xb   :  { %23 = vsyncpa [#allocation14], 0 }
   0xc   :  { %24 = vsyncpa [#allocation6], 0 }
   0xd   :  { %26 = vsyncpa [#allocation6 + $0x1], 0  ;;  %s8162_s25 = smov 0   ;;  %s8164_s26 = smov 0  }
   0xe   :  { %s8166_s27 = smov 0   ;;  %s8168_s28 = smov 0  }
   0xf   :  { %s8170_s29 = smov 0   ;;  %s8172_s30 = smov 0  }
  0x10 LB: > { %8851 = sst [smem:[#allocation21_spill]] %s8062_s28  ;;  %s8836_s14 = sadd.s32 4294967295, %s8070_s30   ;;  %s8070_s30 = sphi %s8172_s30, %s32_s30   ;;  %s8066_s29 = sphi %s8170_s29, %s8881_s29   ;;  %s8062_s28 = sphi %s8168_s28, %s8880_s28   ;;  %s8058_s27 = sphi %s8166_s27, %s8879_s27   ;;  %s8054_s26 = sphi %s8164_s26, %s8878_s26   ;;  %s8050_s25 = sphi %s8162_s25, %s8877_s25  }
  0x11   : > { %p6294_p0 = scmp.ge.s32.totalorder %s8070_s30, 1  ;;  %p8196_p1 = scmp.eq.s32.totalorder %s8836_s14, 0 }
  0x12   : > { %p355_p2 = scmp.lt.s32.totalorder %s8070_s30, 3  ;;  %s8072_s17 = smov [#allocation7]  }
  0x13   : > { %s8852_s15 = scalar_select %p8196_p1, 1, 0 }
  0x14   : > { %p8201_p3 = pnand %p6294_p0, %p355_p2  ;;  %s367_s18 = sshll.u32 %s8072_s17, 4  ;;  %s8205_s18 = int_to_ptr.vmem [resolvable:$true] %s367_s18 }
  0x15   : > { %s8073_s20 = smov [#allocation10]   ;;  %s8074_s22 = smov [#allocation9]  }
  0x16   : > { %s8853_s16 = scalar_select %p8201_p3, 1, 0 }
  0x17   : > { %p7087_p4 = pneg %p8201_p3  ;;  %s397_s21 = sshll.u32 %s8073_s20, 4  ;;  %s8216_s21 = int_to_ptr.vmem [resolvable:$true] %s397_s21 }
  0x18   : > { %s8218_s23 = sshll.u32 %s8074_s22, 4  ;;  %s7806_s14 = scalar_lea.hbm %s8823_s1, 12288  ;;  %s384_s23 = int_to_ptr.vmem [resolvable:$true] %s8218_s23 }
  0x19   : > { %p8212_p6 = pnand %p7087_p4, %p8196_p1  ;;  %p7807_p7 = scmp.ne.s32.totalorder %s8823_s1, %s7806_s14 }
  0x1a   : > { %p7813_p11 = scmp.lt.u32.totalorder %s7806_s14, %s8823_s1 }
  0x1b   : > { %p8228_p8 = pneg %p8212_p6 }
  0x1d   : > { %p7809_p9 = pnand %p8228_p8, %p7807_p7 }
  0x1f   : > { %p7810_p10 = pneg %p7809_p9 }
  0x21   : > { %p7815_p12 = pnand %p7813_p11, %p7810_p10 }
  0x23   : > { %7818 = shalt.err (!%p7815_p12)
}
  0x24   : > { %s7819_s12 = scalar_lea.vmem %s8205_s18, 12288  ;;  %p7827_p4 = scmp.lt.s32.totalorder %s8205_s18, %s8205_s18 }
  0x25   : > { %p7820_p13 = scmp.ne.s32.totalorder %s8205_s18, %s7819_s12  ;;  %p7828_p5 = scmp.lt.s32.totalorder %s7819_s12, %s7819_s12 }
  0x27   : > { %p7822_p0 = pnand %p7820_p13, %p8228_p8  ;;  %p7829_p7 = por %p7828_p5, %p7827_p4 }
  0x29   : > { %p7823_p2 = pneg %p7822_p0 }
  0x2b   : > { %p7830_p9 = pnand %p7829_p7, %p7823_p2 }
  0x2d   : > { %7833 = shalt.err (!%p7830_p9)
}
  0x2e   : > { %s8075_s13 = smov 384   ;;  %s8076_s14 = smov 24  }
  0x2f   : > { %7090 = dma.hbm_to_vmem [thread:$0]  (!%p8212_p6), %s8823_s1, 12288, %s8205_s18, [#allocation8], %s8075_s13, %s8075_s13, %s8076_s14  }
  0x30   : > { %s7834_s28 = scalar_lea.hbm %s8826_s4, 32 }
  0x31   : > { %p7835_p5 = scmp.ne.s32.totalorder %s8826_s4, %s7834_s28  ;;  %p7841_p12 = scmp.lt.u32.totalorder %s7834_s28, %s8826_s4 }
  0x33   : > { %p7837_p10 = pnand %p7835_p5, %p8228_p8 }
  0x35   : > { %p7838_p11 = pneg %p7837_p10 }
  0x37   : > { %p7843_p13 = pnand %p7841_p12, %p7838_p11 }
  0x39   : > { %7846 = shalt.err (!%p7843_p13)
}
  0x3a   : > { %s7847_s18 = scalar_lea.vmem %s8216_s21, 32  ;;  %p7855_p7 = scmp.lt.s32.totalorder %s8216_s21, %s8216_s21 }
  0x3b   : > { %p7848_p0 = scmp.ne.s32.totalorder %s8216_s21, %s7847_s18  ;;  %p7856_p9 = scmp.lt.s32.totalorder %s7847_s18, %s7847_s18 }
  0x3d   : > { %p7850_p2 = pnand %p7848_p0, %p8228_p8  ;;  %p7857_p5 = por %p7856_p9, %p7855_p7 }
  0x3f   : > { %p7851_p4 = pneg %p7850_p2 }
  0x41   : > { %p7858_p10 = pnand %p7857_p5, %p7851_p4 }
  0x43   : > { %7861 = shalt.err (!%p7858_p10)
}
  0x44   : > { %7096 = dma.hbm_to_vmem [thread:$0]  (!%p8212_p6), %s8826_s4, 32, %s8216_s21, [#allocation11]  }
  0x45   : > { %s7862_s13 = scalar_lea.hbm %s8825_s3, 4096 }
  0x46   : > { %p7863_p11 = scmp.ne.s32.totalorder %s8825_s3, %s7862_s13  ;;  %p7869_p0 = scmp.lt.u32.totalorder %s7862_s13, %s8825_s3 }
  0x48   : > { %p7865_p12 = pnand %p7863_p11, %p8228_p8 }
  0x4a   : > { %p7866_p13 = pneg %p7865_p12 }
  0x4c   : > { %p7871_p2 = pnand %p7869_p0, %p7866_p13 }
  0x4e   : > { %7874 = shalt.err (!%p7871_p2)
}
  0x4f   : > { %s7875_s22 = scalar_lea.vmem %s384_s23, 4096  ;;  %p7883_p5 = scmp.lt.s32.totalorder %s384_s23, %s384_s23 }
  0x50   : > { %p7876_p4 = scmp.ne.s32.totalorder %s384_s23, %s7875_s22  ;;  %p7884_p10 = scmp.lt.s32.totalorder %s7875_s22, %s7875_s22 }
  0x52   : > { %p7878_p7 = pnand %p7876_p4, %p8228_p8  ;;  %p7885_p3 = por %p7884_p10, %p7883_p5 }
  0x54   : > { %p7879_p9 = pneg %p7878_p7 }
  0x56   : > { %p7886_p1 = pnand %p7885_p3, %p7879_p9 }
  0x58   : > { %7889 = shalt.err (!%p7886_p1)
}
  0x59   : > { %s8842_s21 = smov 128   ;;  %s8843_s12 = smov 8  }
  0x5a   : > { %7093 = dma.hbm_to_vmem [thread:$0]  (!%p8212_p6), %s8825_s3, 4096, %s384_s23, [#allocation8], %s8842_s21, %s8842_s21, %s8843_s12  }
  0x5b   : > { %s8079_s8 = smov [#allocation12]   ;;  %s7890_s14 = scalar_lea.hbm %s8827_s5, 32768 }
  0x5c   : > { %s407_s10 = sshll.u32 %s8079_s8, 4  ;;  %p7891_p1 = scmp.ne.s32.totalorder %s8827_s5, %s7890_s14  ;;  %s408_s10 = int_to_ptr.vmem [resolvable:$true] %s407_s10 }
  0x5d   : > { %p7897_p12 = scmp.lt.u32.totalorder %s7890_s14, %s8827_s5 }
  0x5e   : > { %p7893_p3 = pnand %p7891_p1, %p8228_p8 }
  0x60   : > { %p7894_p11 = pneg %p7893_p3 }
  0x62   : > { %p7899_p13 = pnand %p7897_p12, %p7894_p11 }
  0x64   : > { %7902 = shalt.err (!%p7899_p13)
}
  0x65   : > { %s7903_s23 = scalar_lea.vmem %s408_s10, 32768  ;;  %p7911_p7 = scmp.lt.s32.totalorder %s408_s10, %s408_s10 }
  0x66   : > { %p7904_p0 = scmp.ne.s32.totalorder %s408_s10, %s7903_s23  ;;  %p7912_p9 = scmp.lt.s32.totalorder %s7903_s23, %s7903_s23 }
  0x68   : > { %p7906_p2 = pnand %p7904_p0, %p8228_p8  ;;  %p7913_p5 = por %p7912_p9, %p7911_p7 }
  0x6a   : > { %p7907_p4 = pneg %p7906_p2 }
  0x6c   : > { %p7914_p10 = pnand %p7913_p5, %p7907_p4 }
  0x6e   : > { %7917 = shalt.err (!%p7914_p10)
}
  0x6f   : > { %s8080_s18 = smov 1024   ;;  %s8081_s6 = smov 64  }
  0x70   : > { %7099 = dma.hbm_to_vmem [thread:$0]  (!%p8212_p6), %s8827_s5, 32768, %s408_s10, [#allocation11], %s8080_s18, %s8080_s18, %s8081_s6  }
  0x71   : > { %s8082_s13 = smov [#allocation13]   ;;  %s7918_s20 = scalar_lea.hbm %s8829_s7, 32768 }
  0x72   : > { %s423_s14 = sshll.u32 %s8082_s13, 4  ;;  %p7919_p1 = scmp.ne.s32.totalorder %s8829_s7, %s7918_s20  ;;  %s424_s14 = int_to_ptr.vmem [resolvable:$true] %s423_s14 }
  0x73   : > { %p7925_p12 = scmp.lt.u32.totalorder %s7918_s20, %s8829_s7 }
  0x74   : > { %p7921_p3 = pnand %p7919_p1, %p8228_p8 }
  0x76   : > { %p7922_p11 = pneg %p7921_p3 }
  0x78   : > { %p7927_p13 = pnand %p7925_p12, %p7922_p11 }
  0x7a   : > { %7930 = shalt.err (!%p7927_p13)
}
  0x7b   : > { %s7931_s10 = scalar_lea.vmem %s424_s14, 32768  ;;  %p7939_p7 = scmp.lt.s32.totalorder %s424_s14, %s424_s14 }
  0x7c   : > { %p7932_p0 = scmp.ne.s32.totalorder %s424_s14, %s7931_s10  ;;  %p7940_p9 = scmp.lt.s32.totalorder %s7931_s10, %s7931_s10 }
  0x7e   : > { %p7934_p2 = pnand %p7932_p0, %p8228_p8  ;;  %p7941_p5 = por %p7940_p9, %p7939_p7 }
  0x80   : > { %p7935_p4 = pneg %p7934_p2 }
  0x82   : > { %p7942_p10 = pnand %p7941_p5, %p7935_p4 }
  0x84   : > { %7945 = shalt.err (!%p7942_p10)
}
  0x85   : > { %s8856_s18 = smov 8   ;;  %s8857_s6 = smov 128  }
  0x86   : > { %7102 = dma.hbm_to_vmem [thread:$0]  (!%p8212_p6), %s8829_s7, 32768, %s424_s14, [#allocation14], %s8857_s6, %s8857_s6, %s8856_s18  }
  0x87   : > { %s6293_s11 = sadd.s32 4294967294, %s8070_s30   ;;  %s44_s19 = sadd.s32 1, %s8066_s29 }
  0x88   : > { %s51_s8 = sadd.s32 1, %s8058_s27  ;;  %p46_p8 = scmp.ge.s32.totalorder %s44_s19, 2 }
  0x89   : > { %p58_p1 = scmp.ne.s32.totalorder %s8058_s27, %s8054_s26  ;;  %p59_p3 = scmp.eq.s32.totalorder %s8070_s30, 0 }
  0x8a   : > { %p64_p11 = scmp.ne.s32.totalorder %s8054_s26, %s8050_s25  ;;  %s8883_s19 = smov (%p46_p8, %s44_s19), 0 }
  0x8b   : > { %p8343_p12 = por %p59_p3, %p58_p1  ;;  %p8859_p13 = scmp.ne.s32.totalorder %s8852_s15, 0 }
  0x8c   : > { %s48_s14 = ssub.s32 %s8066_s29, %s8883_s19  ;;  %s8861_s24 = sadd.s32 4294967295, %s8070_s30  }
  0x8d   : > { %p8349_p6 = por %p8859_p13, %p64_p11  ;;  %p342_p0 = scmp.eq.s32.totalorder %s8861_s24, 1 }
  0x8e   : > { %p49_p2 = scmp.eq.s32.totalorder %s48_s14, 0  ;;  %p348_p4 = scmp.eq.s32.totalorder %s6293_s11, 1 }
  0x8f   : > { %p8357_p7 = por %p342_p0, %p58_p1  ;;  %p7116_p9 = scmp.lt.s32.totalorder %s8070_s30, 2 }
  0x90   : > { %s8363_s20 = scalar_select %p49_p2, %s8058_s27, %s51_s8  }
  0x91   : > { %s8862_s17 = scalar_select %p8357_p7, 1, 0 }
  0x92   : > { %p8365_p5 = por %p348_p4, %p64_p11  ;;  %s452_s23 = sand.u32 1, %s8058_s27  }
  0x93   : > { %s6301_s10 = sshll.u32 %s452_s23, 5  ;;  %s6965_s18 = sshll.u32 %s8066_s29, 9 }
  0x94   : > { %s8863_s22 = scalar_select %p8365_p5, 1, 0 }
  0x95   : > { %s8374_s12 = scalar_lea.hbm %s8822_s0, %s6965_s18  ;;  %s456_s11 = scalar_lea.vmem [#allocation4], %s6301_s10 }
  0x96   : > { %s463_s14 = sshll.u32 %s456_s11, 4  ;;  %p8380_p10 = pnand %p7116_p9, %p8343_p12  ;;  %s8376_s14 = int_to_ptr.vmem [resolvable:$true] %s463_s14 }
  0x97   : > { %s8384_s24 = scalar_lea.sflag [#allocation5], %s452_s23  ;;  %s7946_s6 = scalar_lea.hbm %s8374_s12, 512 }
  0x98   : > { %p7947_p8 = scmp.ne.s32.totalorder %s8374_s12, %s7946_s6  ;;  %p7948_p1 = pneg %p8380_p10 }
  0x99   : > { %s7951_s28 = scalar_lea.hbm %s8822_s0, 1024  ;;  %p7952_p12 = scmp.lt.u32.totalorder %s8374_s12, %s8822_s0 }
  0x9a   : > { %p7949_p3 = pnand %p7948_p1, %p7947_p8  ;;  %p7953_p13 = scmp.lt.u32.totalorder %s7951_s28, %s7946_s6 }
  0x9b   : > { %p7955_p2 = scmp.lt.u32.totalorder %s7946_s6, %s8374_s12 }
  0x9c   : > { %p7950_p11 = pneg %p7949_p3  ;;  %p7954_p0 = por %p7953_p13, %p7952_p12 }
  0x9e   : > { %p7956_p4 = por %p7955_p2, %p7954_p0 }
  0xa0   : > { %p7957_p9 = pnand %p7956_p4, %p7950_p11 }
  0xa2   : > { %7960 = shalt.err (!%p7957_p9)
}
  0xa3   : > { %s7961_s23 = scalar_lea.vmem %s8376_s14, 512  ;;  %s8083_s10 = smov [#allocation4]  }
  0xa4   : > { %p7962_p8 = scmp.ne.s32.totalorder %s8376_s14, %s7961_s23  ;;  %s7966_s18 = sshll.u32 %s8083_s10, 4  ;;  %s7967_s18 = int_to_ptr.vmem [resolvable:$false] %s7966_s18 }
  0xa5   : > { %s7968_s21 = scalar_lea.vmem %s7967_s18, 1024  ;;  %p7969_p7 = scmp.lt.s32.totalorder %s8376_s14, %s7967_s18 }
  0xa6   : > { %p7964_p3 = pnand %p7962_p8, %p7948_p1  ;;  %p7970_p12 = scmp.lt.s32.totalorder %s7968_s21, %s7961_s23 }
  0xa8   : > { %p7965_p5 = pneg %p7964_p3  ;;  %p7971_p13 = por %p7970_p12, %p7969_p7 }
  0xaa   : > { %p7972_p0 = pnand %p7971_p13, %p7965_p5 }
  0xac   : > { %7975 = shalt.err (!%p7972_p0)
}
  0xad   : > { %s8084_s6 = smov 256   ;;  %s8085_s28 = smov 16  }
  0xae   : > { %7106 = dma.hbm_to_vmem [thread:$0]  (!%p8380_p10), %s8374_s12, 512, %s8376_s14, %s8384_s24, %s8084_s6, %s8084_s6, %s8085_s28  }
  0xaf   : > { %p8865_p1 = scmp.ne.s32.totalorder %s8853_s16, 0 }
  0xb0   : > { %s8415_s11 = sand.u32 (!%p8865_p1), 1, %s8054_s26  }
  0xb1   : > { %475 = sbr.rel (%p8865_p1) target bundleno = 3416 (0xd58), region = 72  ;;  %s6305_s23 = sshll.u32 (!%p8865_p1), %s8415_s11, 5 }
  0xb2   : > { %s478_s10 = scalar_lea.sflag (!%p8865_p1), [#allocation5], %s8415_s11  ;;  %s8421_s18 = scalar_lea.vmem (!%p8865_p1), [#allocation4], %s6305_s23 }
  0xb8   : > { %8029 = dma.done.wait (%p8349_p6), %s478_s10, 512  }
  0xb9   : > { %8031 = vsyncadd (%p8349_p6), %s478_s10, 4294966784  ;;  %p8866_p7 = scmp.ne.s32.totalorder %s8852_s15, 0 }
  0xbb   : > { %8033 = dma.done.wait (%p8866_p7), [#allocation8], 16384  }
  0xbc   : > { %8035 = vsyncadd (%p8866_p7), [#allocation8], 4294950912 }
  0xbd   : > { %8037 = dma.done.wait (%p8866_p7), [#allocation11], 32800  }
  0xbe   : > { %8039 = vsyncadd (%p8866_p7), [#allocation11], 4294934496 }
  0xbf   : > { %8041 = dma.done.wait (%p8866_p7), [#allocation14], 32768  }
  0xc0   : > { %8043 = vsyncadd (%p8866_p7), [#allocation14], 4294934528  ;;  %v7189_v0 = vld [vmem:[#allocation7 + $0x4] ss:$24 sps:$4 sm:$0xff]   ;;  %v7191_v1 = vld [vmem:[#allocation7] ss:$24 sps:$4 sm:$0xff]  }
  0xc1   : > { %1164 = vmatprep.subr.bf16.mxu0 %v7189_v0  ;;  %v7192_v2 = vld [vmem:[#allocation7 + $0x34] ss:$24 sps:$4 sm:$0xff]   ;;  %v7194_v3 = vld [vmem:[#allocation7 + $0x30] ss:$24 sps:$4 sm:$0xff]   ;;  %v7195_v4 = vld [vmem:[#allocation7 + $0x64] ss:$24 sps:$4 sm:$0xff]  }
  0xc2   : > { %1165 = vmatpush1.bf16.msra.mxu0 %v7191_v1  ;;  %v7197_v5 = vld [vmem:[#allocation7 + $0x60] ss:$24 sps:$4 sm:$0xff]   ;;  %v7198_v6 = vld [vmem:[#allocation7 + $0x94] ss:$24 sps:$4 sm:$0xff]   ;;  %v7200_v7 = vld [vmem:[#allocation7 + $0x90] ss:$24 sps:$4 sm:$0xff]  }
  0xc3   : > { %1166 = vmatprep.subr.bf16.mxu0 %v7192_v2  ;;  %v7201_v8 = vld [vmem:[#allocation7 + $0xc4] ss:$24 sps:$4 sm:$0xff]   ;;  %v7203_v9 = vld [vmem:[#allocation7 + $0xc0] ss:$24 sps:$4 sm:$0xff]   ;;  %v7204_v10 = vld [vmem:[#allocation7 + $0xf4] ss:$24 sps:$4 sm:$0xff]  }
  0xc4   : > { %v7206_v11 = vld [vmem:[#allocation7 + $0xf0] ss:$24 sps:$4 sm:$0xff]   ;;  %v7207_v12 = vld [vmem:[#allocation7 + $0x124] ss:$24 sps:$4 sm:$0xff]   ;;  %v7209_v16 = vld [vmem:[#allocation7 + $0x120] ss:$24 sps:$4 sm:$0xff]  }
  0xc5   : > { %v551_v13 = vld [vmem:[%s8421_s18 + $0x8] sm:$0xff]  ;;  %v553_v14 = vld [vmem:[%s8421_s18 + $0x18] sm:$0xff]  ;;  %v550_v35 = vld [vmem:[%s8421_s18] sm:$0xff]  ;;  %vm8087_vm0 = vmmov 0   ;;  %vm1327_vm1 = vcmask 523264   ;;  %vm1375_vm2 = vcmask 130048  }
  0xc6   : > { %1167 = vmatpush1.bf16.msra.mxu0 %v7194_v3  ;;  %v8441_v15 = vpack.c.bf16 %v553_v14, %v551_v13  ;;  %v7210_v17 = vld [vmem:[#allocation7 + $0x154] ss:$24 sps:$4 sm:$0xff]   ;;  %v7212_v18 = vld [vmem:[#allocation7 + $0x150] ss:$24 sps:$4 sm:$0xff]   ;;  %v7213_v19 = vld [vmem:[#allocation7 + $0x184] ss:$24 sps:$4 sm:$0xff]  }
  0xc7   : > { %1168 = vmatprep.subr.bf16.mxu0 %v7195_v4  ;;  %v7215_v20 = vld [vmem:[#allocation7 + $0x180] ss:$24 sps:$4 sm:$0xff]   ;;  %v7216_v21 = vld [vmem:[#allocation7 + $0x1b4] ss:$24 sps:$4 sm:$0xff]   ;;  %v7218_v22 = vld [vmem:[#allocation7 + $0x1b0] ss:$24 sps:$4 sm:$0xff]  }
  0xc8   : > { %1196 = vmatprep.mubr.bf16.mxu0 %v8441_v15  ;;  %v7219_v23 = vld [vmem:[#allocation7 + $0x1e4] ss:$24 sps:$4 sm:$0xff]   ;;  %v7221_v24 = vld [vmem:[#allocation7 + $0x1e0] ss:$24 sps:$4 sm:$0xff]   ;;  %v7222_v25 = vld [vmem:[#allocation7 + $0x214] ss:$24 sps:$4 sm:$0xff]  }
  0xc9   : > { %v7224_v26 = vld [vmem:[#allocation7 + $0x210] ss:$24 sps:$4 sm:$0xff]   ;;  %v7225_v27 = vld [vmem:[#allocation7 + $0x244] ss:$24 sps:$4 sm:$0xff]   ;;  %v7227_v28 = vld [vmem:[#allocation7 + $0x240] ss:$24 sps:$4 sm:$0xff]  }
  0xca   : > { %1169 = vmatpush1.bf16.msra.mxu0 %v7197_v5  ;;  %v7228_v29 = vld [vmem:[#allocation7 + $0x274] ss:$24 sps:$4 sm:$0xff]   ;;  %v7230_v30 = vld [vmem:[#allocation7 + $0x270] ss:$24 sps:$4 sm:$0xff]   ;;  %v7231_v31 = vld [vmem:[#allocation7 + $0x2a4] ss:$24 sps:$4 sm:$0xff]  }
  0xcb   : > { %1170 = vmatprep.subr.bf16.mxu0 %v7198_v6  ;;  %v7233_v32 = vld [vmem:[#allocation7 + $0x2a0] ss:$24 sps:$4 sm:$0xff]   ;;  %v7234_v33 = vld [vmem:[#allocation7 + $0x2d4] ss:$24 sps:$4 sm:$0xff]   ;;  %v7236_v34 = vld [vmem:[#allocation7 + $0x2d0] ss:$24 sps:$4 sm:$0xff]  }
  0xcc   : > { %v552_v36 = vld [vmem:[%s8421_s18 + $0x10] sm:$0xff]  ;;  %v7239_v37 = vld [vmem:[#allocation7 + $0xc] ss:$24 sps:$4 sm:$0xff]   ;;  %v7237_v38 = vld [vmem:[#allocation7 + $0x8] ss:$24 sps:$4 sm:$0xff]   ;;  %s8088_s13 = smov 64  }
  0xcd   : > { %v8446_v39 = vpack.c.bf16 %v552_v36, %v550_v35  ;;  %v7242_v40 = vld [vmem:[#allocation7 + $0x3c] ss:$24 sps:$4 sm:$0xff]   ;;  %v7240_v41 = vld [vmem:[#allocation7 + $0x38] ss:$24 sps:$4 sm:$0xff]   ;;  %v7245_v42 = vld [vmem:[#allocation7 + $0x6c] ss:$24 sps:$4 sm:$0xff]  }
  0xce   : > { %1171 = vmatpush1.bf16.msra.mxu0 %v7200_v7  ;;  %v7243_v43 = vld [vmem:[#allocation7 + $0x68] ss:$24 sps:$4 sm:$0xff]   ;;  %v7248_v44 = vld [vmem:[#allocation7 + $0x9c] ss:$24 sps:$4 sm:$0xff]   ;;  %v7246_v45 = vld [vmem:[#allocation7 + $0x98] ss:$24 sps:$4 sm:$0xff]  }
  0xcf   : > { %1172 = vmatprep.subr.bf16.mxu0 %v7201_v8  ;;  %v7251_v46 = vld [vmem:[#allocation7 + $0xcc] ss:$24 sps:$4 sm:$0xff]   ;;  %v7249_v47 = vld [vmem:[#allocation7 + $0xc8] ss:$24 sps:$4 sm:$0xff]   ;;  %v7254_v48 = vld [vmem:[#allocation7 + $0xfc] ss:$24 sps:$4 sm:$0xff]  }
  0xd0   : > { %v7252_v49 = vld [vmem:[#allocation7 + $0xf8] ss:$24 sps:$4 sm:$0xff]   ;;  %v7257_v50 = vld [vmem:[#allocation7 + $0x12c] ss:$24 sps:$4 sm:$0xff]   ;;  %v7255_v51 = vld [vmem:[#allocation7 + $0x128] ss:$24 sps:$4 sm:$0xff]  }
  0xd1   : > { %v7260_v52 = vld [vmem:[#allocation7 + $0x15c] ss:$24 sps:$4 sm:$0xff]   ;;  %v7258_v53 = vld [vmem:[#allocation7 + $0x158] ss:$24 sps:$4 sm:$0xff]   ;;  %v7263_v54 = vld [vmem:[#allocation7 + $0x18c] ss:$24 sps:$4 sm:$0xff]  }
  0xd2   : > { %1173 = vmatpush1.bf16.msra.mxu0 %v7203_v9  ;;  %v7261_v55 = vld [vmem:[#allocation7 + $0x188] ss:$24 sps:$4 sm:$0xff]   ;;  %v7266_v56 = vld [vmem:[#allocation7 + $0x1bc] ss:$24 sps:$4 sm:$0xff]   ;;  %v7264_v57 = vld [vmem:[#allocation7 + $0x1b8] ss:$24 sps:$4 sm:$0xff]  }
  0xd3   : > { %1174 = vmatprep.subr.bf16.mxu0 %v7204_v10  ;;  %v7269_v58 = vld [vmem:[#allocation7 + $0x1ec] ss:$24 sps:$4 sm:$0xff]   ;;  %v7267_v59 = vld [vmem:[#allocation7 + $0x1e8] ss:$24 sps:$4 sm:$0xff]   ;;  %v7272_v60 = vld [vmem:[#allocation7 + $0x21c] ss:$24 sps:$4 sm:$0xff]  }
  0xd4   : > { %v7270_v61 = vld [vmem:[#allocation7 + $0x218] ss:$24 sps:$4 sm:$0xff]   ;;  %v7275_v62 = vld [vmem:[#allocation7 + $0x24c] ss:$24 sps:$4 sm:$0xff]   ;;  %v7273_v63 = vld [vmem:[#allocation7 + $0x248] ss:$24 sps:$4 sm:$0xff]  }
  0xd5   : > { %v7278_v0 = vld [vmem:[#allocation7 + $0x27c] ss:$24 sps:$4 sm:$0xff]   ;;  %v7276_v1 = vld [vmem:[#allocation7 + $0x278] ss:$24 sps:$4 sm:$0xff]   ;;  %v7281_v2 = vld [vmem:[#allocation7 + $0x2ac] ss:$24 sps:$4 sm:$0xff]  }
  0xd6   : > { %1175 = vmatpush1.bf16.msra.mxu0 %v7206_v11  ;;  %v7279_v3 = vld [vmem:[#allocation7 + $0x2a8] ss:$24 sps:$4 sm:$0xff]   ;;  %v7284_v4 = vld [vmem:[#allocation7 + $0x2dc] ss:$24 sps:$4 sm:$0xff]   ;;  %v7282_v5 = vld [vmem:[#allocation7 + $0x2d8] ss:$24 sps:$4 sm:$0xff]  }
  0xd7   : > { %1176 = vmatprep.subr.bf16.mxu0 %v7207_v12  ;;  %v7287_v6 = vld [vmem:[#allocation7 + $0x14] ss:$24 sps:$4 sm:$0xff]   ;;  %v7285_v7 = vld [vmem:[#allocation7 + $0x10] ss:$24 sps:$4 sm:$0xff]   ;;  %v7290_v8 = vld [vmem:[#allocation7 + $0x44] ss:$24 sps:$4 sm:$0xff]  }
  0xd8   : > { %v7288_v9 = vld [vmem:[#allocation7 + $0x40] ss:$24 sps:$4 sm:$0xff]   ;;  %v7291_v10 = vld [vmem:[#allocation7 + $0x70] ss:$24 sps:$4 sm:$0xff]   ;;  %v7293_v11 = vld [vmem:[#allocation7 + $0x74] ss:$24 sps:$4 sm:$0xff]  }
  0xd9   : > { %v7296_v12 = vld [vmem:[#allocation7 + $0xa4] ss:$24 sps:$4 sm:$0xff]   ;;  %v7294_v13 = vld [vmem:[#allocation7 + $0xa0] ss:$24 sps:$4 sm:$0xff]   ;;  %v7299_v14 = vld [vmem:[#allocation7 + $0xd4] ss:$24 sps:$4 sm:$0xff]  }
  0xda   : > { %1177 = vmatpush1.bf16.msra.mxu0 %v7209_v16  ;;  %v7297_v16 = vld [vmem:[#allocation7 + $0xd0] ss:$24 sps:$4 sm:$0xff]   ;;  %v7332_v36 = vld [vmem:[#allocation7 + $0x2e4] ss:$24 sps:$4 sm:$0xff]   ;;  %vm1580_vm3 = vcmask 1048064   ;;  %s8867_s21 = sld [smem:[#allocation24_spill]] }
  0xdb   : > { %1178 = vmatprep.subr.bf16.mxu0 %v7210_v17  ;;  %v7300_v17 = vld [vmem:[#allocation7 + $0x100] ss:$24 sps:$4 sm:$0xff]   ;;  %v7327_v35 = vld [vmem:[#allocation7 + $0x2b0] ss:$24 sps:$4 sm:$0xff]   ;;  %s8868_s10 = sld [smem:[#allocation22_spill]]  ;;  %s8869_s8 = sld [smem:[#allocation23_spill]] }
  0xdc   : > { %s8870_s24 = sld [smem:[#allocation21_spill]]  ;;  %s8871_s28 = sld [smem:[#allocation25_spill]] }
  0xdd   : > { %s8872_s16 = sld [smem:[#allocation26_spill]]  ;;  %s543_s12 = scalar_lea.vmem [#allocation15], %s6305_s23 }
  0xde   : > { %1179 = vmatpush1.bf16.msra.mxu0 %v7212_v18  ;;  %v7305_v18 = vld [vmem:[#allocation7 + $0x134] ss:$24 sps:$4 sm:$0xff]   ;;  %s6156_s14 = sshll.u32 %s543_s12, 4  ;;  %s8873_s6 = sld [smem:[#allocation27_spill]]  ;;  %s8773_s14 = int_to_ptr.vmem [resolvable:$true] %s6156_s14 }
  0xdf   : > { %1180 = vmatprep.subr.bf16.mxu0 %v7213_v19  ;;  %v7303_v19 = vld [vmem:[#allocation7 + $0x130] ss:$24 sps:$4 sm:$0xff]   ;;  %s6140_s23 = scalar_lea.sflag [#allocation6], %s8415_s11  ;;  %p8874_p5 = scmp.ne.s32.totalorder %s8862_s17, 0 }
  0xe2   : > { %1181 = vmatpush1.bf16.msra.mxu0 %v7215_v20  ;;  %v7308_v20 = vld [vmem:[#allocation7 + $0x164] ss:$24 sps:$4 sm:$0xff]  }
  0xe3   : > { %1182 = vmatprep.subr.bf16.mxu0 %v7216_v21  ;;  %v7306_v21 = vld [vmem:[#allocation7 + $0x160] ss:$24 sps:$4 sm:$0xff]  }
  0xe6   : > { %1183 = vmatpush1.bf16.msra.mxu0 %v7218_v22  ;;  %v7311_v22 = vld [vmem:[#allocation7 + $0x194] ss:$24 sps:$4 sm:$0xff]  }
  0xe7   : > { %1184 = vmatprep.subr.bf16.mxu0 %v7219_v23  ;;  %v7309_v23 = vld [vmem:[#allocation7 + $0x190] ss:$24 sps:$4 sm:$0xff]  }
  0xea   : > { %1185 = vmatpush1.bf16.msra.mxu0 %v7221_v24  ;;  %v7314_v24 = vld [vmem:[#allocation7 + $0x1c4] ss:$24 sps:$4 sm:$0xff]  }
  0xeb   : > { %1186 = vmatprep.subr.bf16.mxu0 %v7222_v25  ;;  %v7312_v25 = vld [vmem:[#allocation7 + $0x1c0] ss:$24 sps:$4 sm:$0xff]  }
  0xee   : > { %1187 = vmatpush1.bf16.msra.mxu0 %v7224_v26  ;;  %v7317_v26 = vld [vmem:[#allocation7 + $0x1f4] ss:$24 sps:$4 sm:$0xff]  }
  0xef   : > { %1188 = vmatprep.subr.bf16.mxu0 %v7225_v27  ;;  %v7315_v27 = vld [vmem:[#allocation7 + $0x1f0] ss:$24 sps:$4 sm:$0xff]  }
  0xf2   : > { %1189 = vmatpush1.bf16.msra.mxu0 %v7227_v28  ;;  %v7320_v28 = vld [vmem:[#allocation7 + $0x224] ss:$24 sps:$4 sm:$0xff]  }
  0xf3   : > { %1190 = vmatprep.subr.bf16.mxu0 %v7228_v29  ;;  %v7318_v29 = vld [vmem:[#allocation7 + $0x220] ss:$24 sps:$4 sm:$0xff]  }
  0xf6   : > { %1191 = vmatpush1.bf16.msra.mxu0 %v7230_v30  ;;  %v7323_v30 = vld [vmem:[#allocation7 + $0x254] ss:$24 sps:$4 sm:$0xff]  }
  0xf7   : > { %1192 = vmatprep.subr.bf16.mxu0 %v7231_v31  ;;  %v7321_v31 = vld [vmem:[#allocation7 + $0x250] ss:$24 sps:$4 sm:$0xff]  }
  0xfa   : > { %1193 = vmatpush1.bf16.msra.mxu0 %v7233_v32  ;;  %v7326_v32 = vld [vmem:[#allocation7 + $0x284] ss:$24 sps:$4 sm:$0xff]  }
  0xfb   : > { %1194 = vmatprep.subr.bf16.mxu0 %v7234_v33  ;;  %v7324_v33 = vld [vmem:[#allocation7 + $0x280] ss:$24 sps:$4 sm:$0xff]  }
  0xfe   : > { %1195 = vmatpush1.bf16.msra.mxu0 %v7236_v34  ;;  %v7329_v34 = vld [vmem:[#allocation7 + $0x2b4] ss:$24 sps:$4 sm:$0xff]  }
  0xff   : > { %1207 = vmatprep.subr.bf16.mxu0 %v7239_v37  ;;  %v7330_v37 = vld [vmem:[#allocation7 + $0x2e0] ss:$24 sps:$4 sm:$0xff]  }
 0x101   : > { %1197 = vmatmul.mubr.bf16.vlgmr.msra.gmra.mrb[0].mxu0 %v8446_v39 }
 0x102   : > { %1208 = vmatpush1.bf16.msra.mxu0 %v7237_v38  ;;  %1239 = vmatprep.mubr.bf16.mxu0 %v8441_v15  ;;  %v8086_v38 = vmov 0.0  }
 0x103   : > { %1209 = vmatprep.subr.bf16.mxu0 %v7242_v40  ;;  %7007 = vmatprep.subr.bf16.mxu1 %v8086_v38  ;;  %v654_v40 = vlaneseq }
 0x104   : > { %7009 = vmatprep.mubr.msk.bf16.mxu1 %vm8087_vm0, %v8086_v38 }
 0x106   : > { %1210 = vmatpush1.bf16.msra.mxu0 %v7240_v41  ;;  %v8459_v41 = vshrl.u32 %v654_v40, 7 }
 0x107   : > { %1211 = vmatprep.subr.bf16.mxu0 %v7245_v42 }
 0x108   : > { %v8462_v42 = vsub.s32 0, %v8459_v41 }
 0x10a   : > { %1212 = vmatpush1.bf16.msra.mxu0 %v7243_v43  ;;  %v8468_v43 = vsub.s32 1, %v8459_v41 }
 0x10b   : > { %1213 = vmatprep.subr.bf16.mxu0 %v7248_v44 }
 0x10e   : > { %1214 = vmatpush1.bf16.msra.mxu0 %v7246_v45 }
 0x10f   : > { %1215 = vmatprep.subr.bf16.mxu0 %v7251_v46 }
 0x112   : > { %1216 = vmatpush1.bf16.msra.mxu0 %v7249_v47 }
 0x113   : > { %1217 = vmatprep.subr.bf16.mxu0 %v7254_v48 }
 0x116   : > { %1218 = vmatpush1.bf16.msra.mxu0 %v7252_v49 }
 0x117   : > { %1219 = vmatprep.subr.bf16.mxu0 %v7257_v50 }
 0x11a   : > { %1220 = vmatpush1.bf16.msra.mxu0 %v7255_v51 }
 0x11b   : > { %1221 = vmatprep.subr.bf16.mxu0 %v7260_v52 }
 0x11e   : > { %1222 = vmatpush1.bf16.msra.mxu0 %v7258_v53 }
 0x11f   : > { %1223 = vmatprep.subr.bf16.mxu0 %v7263_v54 }
 0x122   : > { %1224 = vmatpush1.bf16.msra.mxu0 %v7261_v55 }
 0x123   : > { %1225 = vmatprep.subr.bf16.mxu0 %v7266_v56 }
 0x126   : > { %1226 = vmatpush1.bf16.msra.mxu0 %v7264_v57 }
 0x127   : > { %1227 = vmatprep.subr.bf16.mxu0 %v7269_v58 }
 0x12a   : > { %1228 = vmatpush1.bf16.msra.mxu0 %v7267_v59 }
 0x12b   : > { %1229 = vmatprep.subr.bf16.mxu0 %v7272_v60  ;;  %v8475_v60 = vsub.s32 2, %v8459_v41 }
 0x12e   : > { %1230 = vmatpush1.bf16.msra.mxu0 %v7270_v61  ;;  %v8478_v61 = vsub.s32 3, %v8459_v41 }
 0x12f   : > { %1231 = vmatprep.subr.bf16.mxu0 %v7275_v62 }
 0x132   : > { %1232 = vmatpush1.bf16.msra.mxu0 %v7273_v63 }
 0x133   : > { %1233 = vmatprep.subr.bf16.mxu0 %v7278_v0 }
 0x136   : > { %1234 = vmatpush1.bf16.msra.mxu0 %v7276_v1 }
 0x137   : > { %1235 = vmatprep.subr.bf16.mxu0 %v7281_v2 }
 0x13a   : > { %1236 = vmatpush1.bf16.msra.mxu0 %v7279_v3 }
 0x13b   : > { %1237 = vmatprep.subr.bf16.mxu0 %v7284_v4 }
 0x13e   : > { %1238 = vmatpush1.bf16.msra.mxu0 %v7282_v5 }
 0x13f   : > { %1250 = vmatprep.subr.bf16.mxu0 %v7287_v6 }
 0x141   : > { %1240 = vmatmul.mubr.bf16.vlgmr.msra.gmra.mrb[4].mxu0 %v8446_v39 }
 0x142   : > { %1282 = vmatprep.mubr.bf16.mxu0 %v8441_v15  ;;  %1251 = vmatpush1.bf16.msra.mxu0 %v7285_v7  ;;  %v7302_v15 = vld [vmem:[#allocation7 + $0x104] ss:$24 sps:$4 sm:$0xff]  }
 0x143   : > { %1252 = vmatprep.subr.bf16.mxu0 %v7290_v8 }
 0x146   : > { %1253 = vmatpush1.bf16.msra.mxu0 %v7288_v9 }
 0x147   : > { %1254 = vmatprep.subr.bf16.mxu0 %v7293_v11 }
 0x14a   : > { %1255 = vmatpush1.bf16.msra.mxu0 %v7291_v10 }
 0x14b   : > { %1256 = vmatprep.subr.bf16.mxu0 %v7296_v12  ;;  %v8494_v12 = vsub.s32 4, %v8459_v41 }
 0x14e   : > { %1257 = vmatpush1.bf16.msra.mxu0 %v7294_v13  ;;  %v8497_v13 = vsub.s32 5, %v8459_v41 }
 0x14f   : > { %1258 = vmatprep.subr.bf16.mxu0 %v7299_v14 }
 0x152   : > { %1259 = vmatpush1.bf16.msra.mxu0 %v7297_v16 }
 0x153   : > { %1260 = vmatprep.subr.bf16.mxu0 %v7302_v15 }
 0x156   : > { %1261 = vmatpush1.bf16.msra.mxu0 %v7300_v17 }
 0x157   : > { %1262 = vmatprep.subr.bf16.mxu0 %v7305_v18 }
 0x15a   : > { %1263 = vmatpush1.bf16.msra.mxu0 %v7303_v19 }
 0x15b   : > { %1264 = vmatprep.subr.bf16.mxu0 %v7308_v20 }
 0x15e   : > { %1265 = vmatpush1.bf16.msra.mxu0 %v7306_v21 }
 0x15f   : > { %1266 = vmatprep.subr.bf16.mxu0 %v7311_v22 }
 0x162   : > { %1267 = vmatpush1.bf16.msra.mxu0 %v7309_v23 }
 0x163   : > { %1268 = vmatprep.subr.bf16.mxu0 %v7314_v24 }
 0x166   : > { %1269 = vmatpush1.bf16.msra.mxu0 %v7312_v25 }
 0x167   : > { %1270 = vmatprep.subr.bf16.mxu0 %v7317_v26 }
 0x16a   : > { %1271 = vmatpush1.bf16.msra.mxu0 %v7315_v27 }
 0x16b   : > { %1272 = vmatprep.subr.bf16.mxu0 %v7320_v28 }
 0x16e   : > { %1273 = vmatpush1.bf16.msra.mxu0 %v7318_v29 }
 0x16f   : > { %1274 = vmatprep.subr.bf16.mxu0 %v7323_v30 }
 0x172   : > { %1275 = vmatpush1.bf16.msra.mxu0 %v7321_v31 }
 0x173   : > { %1276 = vmatprep.subr.bf16.mxu0 %v7326_v32 }
 0x176   : > { %1277 = vmatpush1.bf16.msra.mxu0 %v7324_v33 }
 0x177   : > { %1278 = vmatprep.subr.bf16.mxu0 %v7329_v34 }
 0x17a   : > { %1279 = vmatpush1.bf16.msra.mxu0 %v7327_v35 }
 0x17b   : > { %1280 = vmatprep.subr.bf16.mxu0 %v7332_v36 }
 0x17e   : > { %1281 = vmatpush1.bf16.msra.mxu0 %v7330_v37 }
 0x17f   : > { %6983 = vmatprep.subr.bf16.mxu0 %v8086_v38 }
 0x181   : > { %1283 = vmatmul.mubr.bf16.vlgmr.msra.gmra.mrb[8].mxu0 %v8446_v39  ;;  %v652_v39 = vld [vmem:[%s8824_s2] sm:$0x3f] }
 0x182   : > { %6985 = vmatprep.mubr.msk.bf16.mxu0 %vm8087_vm0, %v8086_v38  ;;  %v657_v44 = vrot.slane %v652_v39, %v8462_v42  ;;  %v661_v45 = vrot.slane %v652_v39, %v8468_v43  ;;  %v665_v62 = vrot.slane %v652_v39, %v8475_v60  ;;  %v669_v0 = vrot.slane %v652_v39, %v8478_v61 }
 0x183   : > { %v673_v14 = vrot.slane %v652_v39, %v8494_v12  ;;  %v677_v16 = vrot.slane %v652_v39, %v8497_v13 }
 0x1d4   : > { %v1198_v46 = vpop.f32.mrb[0].mxu0 }
 0x1d5   : > { %v1199_v47 = vadd.f32 %v1198_v46, %v657_v44  ;;  %v1200_v48 = vpop.f32.mrb[1].mxu0 }
 0x1d6   : > { %v1201_v49 = vadd.f32 %v1200_v48, %v661_v45  ;;  %v1202_v50 = vpop.f32.mrb[2].mxu0 }
 0x1d7   : > { %v1293_v51 = vmul.f32 0.125, %v1199_v47  ;;  %v1203_v52 = vadd.f32 %v1202_v50, %v657_v44  ;;  %v1204_v53 = vpop.f32.mrb[3].mxu0 }
 0x1d8   : > { %v1205_v54 = vadd.f32 %v1204_v53, %v661_v45  ;;  %v1294_v56 = vmul.f32 0.125, %v1201_v49 }
 0x1d9   : > { %v1295_v55 = vmul.f32 0.125, %v1203_v52 }
 0x1da   : > { %v1296_v57 = vmul.f32 0.125, %v1205_v54 }
 0x1db   : > { %v8472_v58 = vpack.c.bf16 %v1295_v55, %v1293_v51 }
 0x1dc   : > { %v1298_v59 = vpack.c.bf16 %v1296_v57, %v1294_v56 }
 0x214   : > { %v1241_v63 = vpop.f32.mrb[4].mxu0 }
 0x215   : > { %v1243_v1 = vpop.f32.mrb[5].mxu0  ;;  %v1242_v3 = vadd.f32 %v1241_v63, %v665_v62 }
 0x216   : > { %v1245_v2 = vpop.f32.mrb[6].mxu0  ;;  %v1244_v6 = vadd.f32 %v1243_v1, %v669_v0 }
 0x217   : > { %v1246_v4 = vadd.f32 %v1245_v2, %v665_v62  ;;  %v1247_v5 = vpop.f32.mrb[7].mxu0 }
 0x218   : > { %v1248_v7 = vadd.f32 %v1247_v5, %v669_v0 }
 0x219   : > { %v1301_v8 = vpack.c.bf16 %v1246_v4, %v1242_v3 }
 0x21a   : > { %v1302_v9 = vpack.c.bf16 %v1248_v7, %v1244_v6 }
 0x21b   : > { %v1332_v10 = vsel %vm1327_vm1, %v1301_v8, 0 }
 0x21c   : > { %6984 = vmatpush3.bf16.xpose.msra.mxu0 %v1332_v10  ;;  %v1590_v11 = vsel %vm1327_vm1, %v1302_v9, 0 }
 0x21d   : > { %7008 = vmatpush3.bf16.xpose.msra.mxu1 %v1590_v11  ;;  %6989 = vmatprep.subr.bf16.mxu0 %v8086_v38 }
 0x21e   : > { %7013 = vmatprep.subr.bf16.mxu1 %v8086_v38 }
 0x223   : > { %6986 = vmatmul.mubr.msk.bf16.vlgmr.msra.gmra.mrb[12].mxu0 %vm1327_vm1, %v8472_v58 }
 0x224   : > { %7010 = vmatmul.mubr.msk.bf16.vlgmr.msra.gmra.mrb[0].mxu1 %vm1327_vm1, %v1298_v59  ;;  %6991 = vmatprep.mubr.msk.bf16.mxu0 %vm8087_vm0, %v8086_v38 }
 0x225   : > { %7015 = vmatprep.mubr.msk.bf16.mxu1 %vm8087_vm0, %v8086_v38 }
 0x254   : > { %v1284_v15 = vpop.f32.mrb[8].mxu0 }
 0x255   : > { %v1285_v17 = vadd.f32 %v1284_v15, %v673_v14  ;;  %v1286_v18 = vpop.f32.mrb[9].mxu0 }
 0x256   : > { %v1287_v19 = vadd.f32 %v1286_v18, %v677_v16  ;;  %v1288_v20 = vpop.f32.mrb[10].mxu0 }
 0x257   : > { %v1289_v21 = vadd.f32 %v1288_v20, %v673_v14  ;;  %v1290_v22 = vpop.f32.mrb[11].mxu0 }
 0x258   : > { %v1291_v23 = vadd.f32 %v1290_v22, %v677_v16 }
 0x259   : > { %v8501_v24 = vpack.c.bf16 %v1289_v21, %v1285_v17 }
 0x25a   : > { %v8503_v25 = vpack.c.bf16 %v1291_v23, %v1287_v19 }
 0x25b   : > { %6990 = vmatpush3.bf16.msra.mxu0 %v8501_v24 }
 0x25c   : > { %7014 = vmatpush3.bf16.msra.mxu1 %v8503_v25  ;;  %6995 = vmatprep.subr.bf16.mxu0 %v8086_v38 }
 0x25d   : > { %7019 = vmatprep.subr.bf16.mxu1 %v8086_v38 }
 0x2f6   : > { %v1368_v26 = vpop.f32.mrb[12].mxu0 }
 0x2f7   : > { %v6987_v27 = vpop.f32.mrb[13].mxu0  ;;  %v1626_v28 = vpop.f32.mrb[0].mxu1  ;;  %v1376_v29 = vsel %vm1375_vm2, %v1368_v26, -inf }
 0x2f8   : > { %v7011_v30 = vpop.f32.mrb[1].mxu1  ;;  %1377 = vmax.xlane.f32.xlu1 %v1376_v29  ;;  %v1371_v31 = vpop.f32.mrb[14].mxu0  ;;  %v1633_v32 = vsel %vm1375_vm2, %v1626_v28, -inf }
 0x2f9   : > { %1634 = vmax.xlane.f32.xlu0 %v1633_v32  ;;  %v6988_v33 = vpop.f32.mrb[15].mxu0  ;;  %v1629_v34 = vpop.f32.mrb[2].mxu1  ;;  %v1379_v36 = vsel %vm1375_vm2, %v1371_v31, -inf }
 0x2fa   : > { %v7012_v35 = vpop.f32.mrb[3].mxu1  ;;  %v1636_v37 = vsel %vm1375_vm2, %v1629_v34, -inf }
 0x2fc   : > { %1380 = vmax.xlane.f32.xlu1 %v1379_v36 }
 0x2fd   : > { %1637 = vmax.xlane.f32.xlu0 %v1636_v37 }
 0x30d   : > { %1452 = vrot.lane.b32.xlu1 %v1301_v8, %s8088_s13 }
 0x311   : > { %1706 = vrot.lane.b32.xlu1 %v1298_v59, %s8088_s13 }
 0x313   : > { %1709 = vrot.lane.b32.xlu0 %v1302_v9, %s8088_s13 }
 0x315   : > { %1449 = vrot.lane.b32.xlu1 %v8472_v58, %s8088_s13 }
 0x385   : > { %v1378_v40 = vpop.xlane.xlu1 %1377 }
 0x386   : > { %v1382_v39 = vsub.f32 %v1368_v26, %v1378_v40  ;;  %v1635_v44 = vpop.xlane.xlu0 %1634 }
 0x387   : > { %v1639_v45 = vsub.f32 %v1626_v28, %v1635_v44 }
 0x388   : > { %v1384_v46 = vmul.f32 1.442695, %v1382_v39 }
 0x389   : > { %v1641_v47 = vmul.f32 1.442695, %v1639_v45  ;;  %v1381_v48 = vpop.xlane.xlu1 %1380 }
 0x38a   : > { %v1383_v49 = vsub.f32 %v1371_v31, %v1381_v48  ;;  %v1638_v50 = vpop.xlane.xlu0 %1637  ;;  %7765 = vpow2.f32 %v1384_v46 }
 0x38b   : > { %v1640_v51 = vsub.f32 %v1629_v34, %v1638_v50  ;;  %7767 = vpow2.f32 %v1641_v47 }
 0x38c   : > { %v1386_v52 = vmul.f32 1.442695, %v1383_v49 }
 0x38d   : > { %v1643_v53 = vmul.f32 1.442695, %v1640_v51  ;;  %v1453_v55 = vpop.permute.xlu1 %1452 }
 0x38e   : > { %7769 = vpow2.f32 %v1386_v52  ;;  %v1710_v59 = vpop.permute.xlu0 %1709  ;;  %v1458_v0 = vsel %vm1327_vm1, %v1453_v55, 0 }
 0x38f   : > { %7771 = vpow2.f32 %v1643_v53  ;;  %v1715_v1 = vsel %vm1327_vm1, %v1710_v59, 0 }
 0x391   : > { %v1707_v2 = vpop.permute.xlu1 %1706 }
 0x394   : > { %v8518_v54 = vpop.eup %7765 }
 0x395   : > { %v8520_v56 = vpop.eup %7767  ;;  %v1450_v3 = vpop.permute.xlu1 %1449  ;;  %v1388_v59 = vsel %vm1375_vm2, %v8518_v54, 0.0 }
 0x396   : > { %v1645_v53 = vsel %vm1375_vm2, %v8520_v56, 0.0 }
 0x398   : > { %v8522_v57 = vpop.eup %7769 }
 0x399   : > { %v8524_v58 = vpop.eup %7771  ;;  %v1394_v62 = vpack.c.bf16 %v8522_v57, %v8518_v54  ;;  %v7347_v54 = vld [vmem:[#allocation9 + $0x44] ss:$8 sps:$4 sm:$0xff]  }
 0x39a   : > { %v1651_v63 = vpack.c.bf16 %v8524_v58, %v8520_v56  ;;  %v1648_v55 = vsel %vm1375_vm2, %v8524_v58, 0.0  ;;  %v7341_v56 = vld [vmem:[#allocation9 + $0x24] ss:$8 sps:$4 sm:$0xff]   ;;  %v7344_v58 = vld [vmem:[#allocation9 + $0x34] ss:$8 sps:$4 sm:$0xff]  }
 0x39b   : > { %6992 = vmatmul.mubr.msk.bf16.vlgmr.msra.gmra.mrb[16].mxu0 %vm1375_vm2, %v1394_v62  ;;  %v1391_v62 = vsel %vm1375_vm2, %v8522_v57, 0.0  ;;  %v7350_v57 = vld [vmem:[#allocation9 + $0x54] ss:$8 sps:$4 sm:$0xff]  }
 0x39c   : > { %6996 = vmatpush3.bf16.xpose.msra.mxu0 %v1458_v0  ;;  %7016 = vmatmul.mubr.msk.bf16.vlgmr.msra.gmra.mrb[4].mxu1 %vm1375_vm2, %v1651_v63  ;;  %v7333_v63 = vld [vmem:[#allocation9] ss:$8 sps:$4 sm:$0xff]   ;;  %v7335_v0 = vld [vmem:[#allocation9 + $0x4] ss:$8 sps:$4 sm:$0xff]  }
 0x39d   : > { %7020 = vmatpush3.bf16.xpose.msra.mxu1 %v1715_v1  ;;  %6997 = vmatprep.mubr.msk.bf16.mxu0 %vm8087_vm0, %v8086_v38  ;;  %v7338_v1 = vld [vmem:[#allocation9 + $0x14] ss:$8 sps:$4 sm:$0xff]  }
 0x39e   : > { %7021 = vmatprep.mubr.msk.bf16.mxu1 %vm8087_vm0, %v8086_v38  ;;  %7001 = vmatprep.subr.bf16.mxu0 %v8086_v38 }
 0x39f   : > { %7025 = vmatprep.subr.bf16.mxu1 %v8086_v38 }
 0x3a3   : > { %6998 = vmatmul.mubr.msk.bf16.vlgmr.msra.gmra.mrb[20].mxu0 %vm1327_vm1, %v1450_v3  ;;  %v7339_v3 = vld [vmem:[#allocation9 + $0x20] ss:$8 sps:$4 sm:$0xff]  }
 0x3a4   : > { %7022 = vmatmul.mubr.msk.bf16.vlgmr.msra.gmra.mrb[8].mxu1 %vm1327_vm1, %v1707_v2  ;;  %7003 = vmatprep.mubr.msk.bf16.mxu0 %vm8087_vm0, %v8086_v38  ;;  %v7336_v2 = vld [vmem:[#allocation9 + $0x10] ss:$8 sps:$4 sm:$0xff]  }
 0x3a5   : > { %7027 = vmatprep.mubr.msk.bf16.mxu1 %vm8087_vm0, %v8086_v38 }
 0x46e   : > { %v8546_v4 = vpop.f32.mrb[16].mxu0 }
 0x46f   : > { %v6993_v5 = vpop.f32.mrb[17].mxu0  ;;  %v8548_v6 = vpop.f32.mrb[4].mxu1 }
 0x470   : > { %v8550_v7 = vpop.f32.mrb[18].mxu0  ;;  %v7017_v8 = vpop.f32.mrb[5].mxu1  ;;  %v7342_v5 = vld [vmem:[#allocation9 + $0x30] ss:$8 sps:$4 sm:$0xff]  }
 0x471   : > { %v6994_v9 = vpop.f32.mrb[19].mxu0  ;;  %v8552_v10 = vpop.f32.mrb[6].mxu1  ;;  %v7345_v8 = vld [vmem:[#allocation9 + $0x40] ss:$8 sps:$4 sm:$0xff]  }
 0x472   : > { %v7018_v11 = vpop.f32.mrb[7].mxu1  ;;  %v7348_v9 = vld [vmem:[#allocation9 + $0x50] ss:$8 sps:$4 sm:$0xff]  }
 0x473   : > { %v7353_v11 = vld [vmem:[#allocation9 + $0x64] ss:$8 sps:$4 sm:$0xff]  }
 0x476   : > { %v1494_v14 = vpop.f32.mrb[20].mxu0 }
 0x477   : > { %v6999_v16 = vpop.f32.mrb[21].mxu0  ;;  %v1751_v15 = vpop.f32.mrb[8].mxu1  ;;  %v1501_v17 = vsel %vm1375_vm2, %v1494_v14, -inf }
 0x478   : > { %v7023_v18 = vpop.f32.mrb[9].mxu1  ;;  %1502 = vmax.xlane.f32.xlu0 %v1501_v17  ;;  %v1497_v38 = vpop.f32.mrb[22].mxu0  ;;  %v1758_v23 = vsel %vm1375_vm2, %v1751_v15, -inf  ;;  %v7356_v16 = vld [vmem:[#allocation9 + $0x74] ss:$8 sps:$4 sm:$0xff]  }
 0x479   : > { %v7000_v19 = vpop.f32.mrb[23].mxu0  ;;  %v1754_v20 = vpop.f32.mrb[10].mxu1  ;;  %v1504_v26 = vsel %vm1375_vm2, %v1497_v38, -inf  ;;  %v7359_v17 = vld [vmem:[#allocation9 + $0x84] ss:$8 sps:$4 sm:$0xff]  }
 0x47a   : > { %v7024_v21 = vpop.f32.mrb[11].mxu1  ;;  %v1761_v22 = vsel %vm1375_vm2, %v1754_v20, -inf  ;;  %v7357_v18 = vld [vmem:[#allocation9 + $0x80] ss:$8 sps:$4 sm:$0xff]   ;;  %v7360_v19 = vld [vmem:[#allocation9 + $0x90] ss:$8 sps:$4 sm:$0xff]  }
 0x47b   : > { %1762 = vmax.xlane.f32.xlu1 %v1761_v22  ;;  %v7363_v21 = vld [vmem:[#allocation9 + $0xa0] ss:$8 sps:$4 sm:$0xff]  }
 0x47c   : > { %1759 = vmax.xlane.f32.xlu0 %v1758_v23 }
 0x480   : > { %1505 = vmax.xlane.f32.xlu0 %v1504_v26 }
 0x48c   : > { %1521 = vrot.lane.b32.xlu1 %v8501_v24, %s8088_s13 }
 0x496   : > { %1778 = vrot.lane.b32.xlu0 %v8503_v25, %s8088_s13 }
 0x505   : > { %v1503_v27 = vpop.xlane.xlu0 %1502 }
 0x506   : > { %v1507_v28 = vsub.f32 %v1494_v14, %v1503_v27  ;;  %v7351_v14 = vld [vmem:[#allocation9 + $0x60] ss:$8 sps:$4 sm:$0xff]  }
 0x508   : > { %v1763_v29 = vpop.xlane.xlu1 %1762  ;;  %v1509_v33 = vmul.f32 1.442695, %v1507_v28 }
 0x509   : > { %v1765_v30 = vsub.f32 %v1754_v20, %v1763_v29  ;;  %v1760_v31 = vpop.xlane.xlu0 %1759  ;;  %v7365_v20 = vld [vmem:[#allocation9 + $0xa4] ss:$8 sps:$4 sm:$0xff]  }
 0x50a   : > { %v1764_v32 = vsub.f32 %v1751_v15, %v1760_v31  ;;  %v7354_v15 = vld [vmem:[#allocation9 + $0x70] ss:$8 sps:$4 sm:$0xff]  }
 0x50b   : > { %v1768_v34 = vmul.f32 1.442695, %v1765_v30 }
 0x50c   : > { %v1766_v35 = vmul.f32 1.442695, %v1764_v32  ;;  %v1522_v36 = vpop.permute.xlu1 %1521 }
 0x50d   : > { %7773 = vpow2.f32 %v1768_v34  ;;  %7002 = vmatpush3.bf16.msra.mxu0 %v1522_v36  ;;  %v1506_v37 = vpop.xlane.xlu0 %1505 }
 0x50e   : > { %7775 = vpow2.f32 %v1766_v35  ;;  %v1508_v40 = vsub.f32 %v1497_v38, %v1506_v37  ;;  %2049 = vmatprep.subr.bf16.mxu0 %v7335_v0  ;;  %v7362_v38 = vld [vmem:[#allocation9 + $0x94] ss:$8 sps:$4 sm:$0xff]  }
 0x50f   : > { %7777 = vpow2.f32 %v1509_v33 }
 0x510   : > { %v1511_v24 = vmul.f32 1.442695, %v1508_v40 }
 0x511   : > { %v1779_v39 = vpop.permute.xlu0 %1778 }
 0x512   : > { %7779 = vpow2.f32 %v1511_v24  ;;  %7026 = vmatpush3.bf16.msra.mxu1 %v1779_v39  ;;  %v7366_v39 = vld [vmem:[#allocation9 + $0xb0] ss:$8 sps:$4 sm:$0xff]  }
 0x517   : > { %v7774_v25 = vpop.eup %7773 }
 0x518   : > { %v7776_v44 = vpop.eup %7775  ;;  %v1773_v45 = vsel %vm1375_vm2, %v7774_v25, 0.0 }
 0x519   : > { %v7778_v46 = vpop.eup %7777  ;;  %1774 = vadd.xlane.f32.xlu0 %v1773_v45  ;;  %v1770_v47 = vsel %vm1375_vm2, %v7776_v44, 0.0  ;;  %v1776_v48 = vpack.c.bf16 %v7774_v25, %v7776_v44  ;;  %v7368_v25 = vld [vmem:[#allocation9 + $0xb4] ss:$8 sps:$4 sm:$0xff]   ;;  %v7372_v44 = vld [vmem:[#allocation9 + $0xd0] ss:$8 sps:$4 sm:$0xff]  }
 0x51a   : > { %1771 = vadd.xlane.f32.xlu1 %v1770_v47  ;;  %v1513_v50 = vsel %vm1375_vm2, %v7778_v46, 0.0 }
 0x51b   : > { %7028 = vmatmul.mubr.msk.bf16.vlgmr.msra.gmra.mrb[12].mxu1 %vm1375_vm2, %v1776_v48 }
 0x51c   : > { %v7780_v49 = vpop.eup %7779 }
 0x51d   : > { %1514 = vadd.xlane.f32.xlu0 %v1513_v50  ;;  %v1516_v51 = vsel %vm1375_vm2, %v7780_v49, 0.0  ;;  %v1519_v52 = vpack.c.bf16 %v7780_v49, %v7778_v46  ;;  %v7375_v50 = vld [vmem:[#allocation9 + $0xe0] ss:$8 sps:$4 sm:$0xff]  }
 0x51e   : > { %1517 = vadd.xlane.f32.xlu1 %v1516_v51  ;;  %v7377_v51 = vld [vmem:[#allocation9 + $0xe4] ss:$8 sps:$4 sm:$0xff]  }
 0x51f   : > { %7004 = vmatmul.mubr.msk.bf16.vlgmr.msra.gmra.mrb[24].mxu0 %vm1375_vm2, %v1519_v52 }
 0x520   : > { %2050 = vmatpush1.bf16.msra.mxu0 %v7333_v63 }
 0x521   : > { %1646 = vadd.xlane.f32.xlu0 %v1645_v53  ;;  %2051 = vmatprep.subr.bf16.mxu0 %v7338_v1  ;;  %v7378_v1 = vld [vmem:[#allocation9 + $0xf0] ss:$8 sps:$4 sm:$0xff]  }
 0x522   : > { %1649 = vadd.xlane.f32.xlu1 %v1648_v55  ;;  %v7380_v55 = vld [vmem:[#allocation9 + $0xf4] ss:$8 sps:$4 sm:$0xff]  }
 0x524   : > { %2052 = vmatpush1.bf16.msra.mxu0 %v7336_v2 }
 0x525   : > { %1389 = vadd.xlane.f32.xlu0 %v1388_v59  ;;  %2053 = vmatprep.subr.bf16.mxu0 %v7341_v56 }
 0x526   : > { %1392 = vadd.xlane.f32.xlu1 %v1391_v62 }
 0x528   : > { %2054 = vmatpush1.bf16.msra.mxu0 %v7339_v3 }
 0x529   : > { %2055 = vmatprep.subr.bf16.mxu0 %v7344_v58 }
 0x52c   : > { %2056 = vmatpush1.bf16.msra.mxu0 %v7342_v5 }
 0x52d   : > { %2057 = vmatprep.subr.bf16.mxu0 %v7347_v54 }
 0x530   : > { %2058 = vmatpush1.bf16.msra.mxu0 %v7345_v8 }
 0x531   : > { %2059 = vmatprep.subr.bf16.mxu0 %v7350_v57 }
 0x534   : > { %2060 = vmatpush1.bf16.msra.mxu0 %v7348_v9 }
 0x535   : > { %2061 = vmatprep.subr.bf16.mxu0 %v7353_v11 }
 0x538   : > { %2062 = vmatpush1.bf16.msra.mxu0 %v7351_v14 }
 0x539   : > { %2063 = vmatprep.subr.bf16.mxu0 %v7356_v16 }
 0x53c   : > { %2064 = vmatpush1.bf16.msra.mxu0 %v7354_v15 }
 0x53d   : > { %2065 = vmatprep.subr.bf16.mxu0 %v7359_v17 }
 0x540   : > { %2066 = vmatpush1.bf16.msra.mxu0 %v7357_v18  ;;  %v1877_v18 = vld [vmem:[#allocation10] sm:$0x3] }
 0x541   : > { %2067 = vmatprep.subr.bf16.mxu0 %v7362_v38  ;;  %v1882_v38 = vrot.slane %v1877_v18, %v8462_v42 }
 0x544   : > { %2068 = vmatpush1.bf16.msra.mxu0 %v7360_v19  ;;  %v1886_v19 = vrot.slane %v1877_v18, %v8468_v43 }
 0x545   : > { %2069 = vmatprep.subr.bf16.mxu0 %v7365_v20  ;;  %v1315_v20 = vld [vmem:[%s8421_s18] sm:$0xff] }
 0x548   : > { %2070 = vmatpush1.bf16.msra.mxu0 %v7363_v21 }
 0x549   : > { %2071 = vmatprep.subr.bf16.mxu0 %v7368_v25  ;;  %v2171_v25 = vld [vmem:[#allocation12 + $0x40] sm:$0xff] }
 0x54c   : > { %2072 = vmatpush1.bf16.msra.mxu0 %v7366_v39  ;;  %v2163_v39 = vld [vmem:[#allocation12] sm:$0xff] }
 0x5a6   : > { %v1775_v22 = vpop.xlane.xlu0 %1774 }
 0x5a7   : > { %v1772_v23 = vpop.xlane.xlu1 %1771 }
 0x5aa   : > { %v1515_v26 = vpop.xlane.xlu0 %1514 }
 0x5ab   : > { %v1518_v27 = vpop.xlane.xlu1 %1517 }
 0x5ae   : > { %v1647_v28 = vpop.xlane.xlu0 %1646 }
 0x5af   : > { %7781 = vrcp.f32 %v1647_v28  ;;  %v1650_v29 = vpop.xlane.xlu1 %1649  ;;  %v1317_v28 = vld [vmem:[%s8421_s18 + $0x10] sm:$0xff] }
 0x5b0   : > { %7783 = vrcp.f32 %v1650_v29 }
 0x5b2   : > { %v1390_v30 = vpop.xlane.xlu0 %1389 }
 0x5b3   : > { %7785 = vrcp.f32 %v1390_v30  ;;  %v1393_v31 = vpop.xlane.xlu1 %1392 }
 0x5b4   : > { %7787 = vrcp.f32 %v1393_v31 }
 0x5b5   : > { %7789 = vrcp.f32 %v1772_v23  ;;  %v1316_v23 = vld [vmem:[%s8421_s18 + $0x8] sm:$0xff] }
 0x5b6   : > { %7791 = vrcp.f32 %v1775_v22 }
 0x5b7   : > { %7793 = vrcp.f32 %v1515_v26 }
 0x5b8   : > { %7795 = vrcp.f32 %v1518_v27 }
 0x5b9   : > { %v7782_v32 = vpop.eup %7781 }
 0x5ba   : > { %v7784_v33 = vpop.eup %7783  ;;  %v1698_v34 = vmul.f32 %v7782_v32, %v8548_v6  ;;  %v7369_v6 = vld [vmem:[#allocation9 + $0xc0] ss:$8 sps:$4 sm:$0xff]   ;;  %v1318_v32 = vld [vmem:[%s8421_s18 + $0x18] sm:$0xff]  ;;  %s8089_s18 = smov [#allocation15]  }
 0x5bb   : > { %v1699_v35 = vmul.f32 %v7784_v33, %v8552_v10  ;;  %v7371_v10 = vld [vmem:[#allocation9 + $0xc4] ss:$8 sps:$4 sm:$0xff]   ;;  %s7980_s15 = sshll.u32 %s8089_s18, 4  ;;  %s7981_s15 = int_to_ptr.vmem [resolvable:$false] %s7980_s15 }
 0x5bc   : > { %1700 = vst.msk [vmem:[#allocation3 + $0x8] sm:$0xff] %vm1327_vm1, %v1698_v34  ;;  %2073 = vmatprep.subr.bf16.mxu0 %v7371_v10  ;;  %v6448_v10 = vcombine.low %v2163_v39, %v2171_v25  ;;  %p7983_p2 = scmp.lt.s32.totalorder %s8773_s14, %s7981_s15 }
 0x5bd   : > { %v7786_v36 = vpop.eup %7785  ;;  %1701 = vst.msk [vmem:[#allocation3 + $0x18] sm:$0xff] %vm1327_vm1, %v1699_v35  ;;  %2074 = vmatpush1.bf16.msra.mxu0 %v7369_v6  ;;  %v2167_v6 = vld [vmem:[#allocation12 + $0x20] sm:$0xff] }
 0x5be   : > { %v7788_v37 = vpop.eup %7787  ;;  %v1441_v40 = vmul.f32 %v7786_v36, %v8546_v4  ;;  %v7374_v4 = vld [vmem:[#allocation9 + $0xd4] ss:$8 sps:$4 sm:$0xff]  }
 0x5bf   : > { %v1442_v24 = vmul.f32 %v7788_v37, %v8550_v7  ;;  %v7790_v45 = vpop.eup %7789  ;;  %2075 = vmatprep.subr.bf16.mxu0 %v7374_v4  ;;  %v2175_v4 = vld [vmem:[#allocation12 + $0x60] sm:$0xff] }
 0x5c0   : > { %1443 = vst.msk [vmem:[#allocation3] sm:$0xff] %vm1327_vm1, %v1441_v40  ;;  %v7792_v48 = vpop.eup %7791 }
 0x5c1   : > { %1444 = vst.msk [vmem:[#allocation3 + $0x10] sm:$0xff] %vm1327_vm1, %v1442_v24  ;;  %2076 = vmatpush1.bf16.msra.mxu0 %v7372_v44  ;;  %v7794_v59 = vpop.eup %7793  ;;  %v6449_v44 = vcombine.high %v2163_v39, %v2171_v25  ;;  %v2275_v25 = vld [vmem:[#allocation12 + $0x380] sm:$0xff] }
 0x5c2   : > { %2077 = vmatprep.subr.bf16.mxu0 %v7377_v51  ;;  %v7796_v2 = vpop.eup %7795  ;;  %v2195_v51 = vld [vmem:[#allocation12 + $0x100] sm:$0xff] }
 0x5c5   : > { %2078 = vmatpush1.bf16.msra.mxu0 %v7375_v50  ;;  %v2191_v50 = vld [vmem:[#allocation12 + $0xe0] sm:$0xff] }
 0x5c6   : > { %2079 = vmatprep.subr.bf16.mxu0 %v7380_v55  ;;  %v2199_v55 = vld [vmem:[#allocation12 + $0x120] sm:$0xff] }
 0x5c9   : > { %2080 = vmatpush1.bf16.msra.mxu0 %v7378_v1 }
 0x5ca   : > { %3783 = vmatprep.subr.bf16.mxu0 %v6449_v44  ;;  %v2287_v44 = vld [vmem:[#allocation12 + $0x3e0] sm:$0xff] }
 0x5ee   : > { %v1818_v7 = vpop.f32.mrb[12].mxu1 }
 0x5ef   : > { %v1827_v46 = vmul.f32 %v7790_v45, %v1818_v7  ;;  %v7029_v47 = vpop.f32.mrb[13].mxu1  ;;  %v2179_v45 = vld [vmem:[#allocation12 + $0x80] sm:$0xff] }
 0x5f0   : > { %v1821_v49 = vpop.f32.mrb[14].mxu1  ;;  %v2187_v7 = vld [vmem:[#allocation12 + $0xc0] sm:$0xff]  ;;  %v6457_v47 = vcombine.high %v2167_v6, %v2175_v4 }
 0x5f1   : > { %v1828_v52 = vmul.f32 %v7792_v48, %v1821_v49  ;;  %1831 = vrot.lane.b32.xlu0 %v1827_v46, %s8088_s13  ;;  %v7030_v53 = vpop.f32.mrb[15].mxu1  ;;  %v6456_v46 = vcombine.low %v2167_v6, %v2175_v4  ;;  %v6465_v48 = vcombine.high %v2179_v45, %v2187_v7  ;;  %v2183_v49 = vld [vmem:[#allocation12 + $0xa0] sm:$0xff] }
 0x5f2   : > { %v1561_v62 = vpop.f32.mrb[24].mxu0  ;;  %v2203_v53 = vld [vmem:[#allocation12 + $0x140] sm:$0xff]  ;;  %3955 = vmatprep.subr.bf16.mxu1 %v6457_v47 }
 0x5f3   : > { %v1570_v63 = vmul.f32 %v7794_v59, %v1561_v62  ;;  %v7005_v0 = vpop.f32.mrb[25].mxu0  ;;  %v2207_v59 = vld [vmem:[#allocation12 + $0x160] sm:$0xff]  ;;  %v6464_v62 = vcombine.low %v2179_v45, %v2187_v7  ;;  %3956 = vmatpush1.bf16.msra.mxu1 %v6456_v46 }
 0x5f4   : > { %v1564_v56 = vpop.f32.mrb[26].mxu0  ;;  %v6481_v0 = vcombine.high %v2195_v51, %v2203_v53  ;;  %v6489_v1 = vcombine.high %v2199_v55, %v2207_v59  ;;  %v2283_v6 = vld [vmem:[#allocation12 + $0x3c0] sm:$0xff] }
 0x5f5   : > { %v1571_v3 = vmul.f32 %v7796_v2, %v1564_v56  ;;  %1574 = vrot.lane.b32.xlu1 %v1570_v63, %s8088_s13  ;;  %v7006_v58 = vpop.f32.mrb[27].mxu0  ;;  %v6472_v63 = vcombine.low %v2183_v49, %v2191_v50  ;;  %v2211_v2 = vld [vmem:[#allocation12 + $0x180] sm:$0xff]  ;;  %v6561_v7 = vcombine.high %v2275_v25, %v2283_v6 }
 0x5f6   : > { %v2219_v56 = vld [vmem:[#allocation12 + $0x1c0] sm:$0xff] }
 0x5f7   : > { %v2223_v58 = vld [vmem:[#allocation12 + $0x1e0] sm:$0xff] }
 0x5f8   : > { %v2291_v47 = vld [vmem:[#allocation12 + $0x400] sm:$0xff] }
 0x5f9   : > { %1833 = vrot.lane.b32.xlu1 %v1828_v52, %s8088_s13  ;;  %v6473_v52 = vcombine.high %v2183_v49, %v2191_v50  ;;  %v2295_v49 = vld [vmem:[#allocation12 + $0x420] sm:$0xff] }
 0x5fa   : > { %v2303_v50 = vld [vmem:[#allocation12 + $0x460] sm:$0xff] }
 0x5fb   : > { %3957 = vmatprep.subr.bf16.mxu1 %v6473_v52 }
 0x5fc   : > { %3958 = vmatpush1.bf16.msra.mxu1 %v6472_v63  ;;  %v2311_v63 = vld [vmem:[#allocation12 + $0x4a0] sm:$0xff] }
 0x5fd   : > { %1576 = vrot.lane.b32.xlu1 %v1571_v3, %s8088_s13  ;;  %v2215_v3 = vld [vmem:[#allocation12 + $0x1a0] sm:$0xff]  ;;  %3959 = vmatprep.subr.bf16.mxu1 %v6489_v1  ;;  %s6966_s13 = sshll.u32 %s8870_s24, 9  ;;  %s7976_s24 = scalar_lea.vmem %s8773_s14, 512 }
 0x5fe   : > { %p7977_p6 = scmp.ne.s32.totalorder %s8773_s14, %s7976_s24 }
 0x600   : > { %p7978_p10 = pnand %p7977_p6, %p8874_p5 }
 0x602   : > { %p7979_p11 = pneg %p7978_p10 }
 0x663   : > { %v1832_v5 = vpop.permute.xlu0 %1831 }
 0x664   : > { %1837 = vst.msk [vmem:[#allocation3 + $0x8] sm:$0xff] %vm1580_vm3, %v1832_v5  ;;  %v6480_v5 = vcombine.low %v2195_v51, %v2203_v53  ;;  %v6560_v51 = vcombine.low %v2275_v25, %v2283_v6  ;;  %v2363_v25 = vld [vmem:[#allocation12 + $0x640] sm:$0xff] }
 0x665   : > { %v2359_v6 = vld [vmem:[#allocation12 + $0x620] sm:$0xff] }
 0x667   : > { %v1575_v54 = vpop.permute.xlu1 %1574 }
 0x668   : > { %1581 = vst.msk [vmem:[#allocation3] sm:$0xff] %vm1580_vm3, %v1575_v54  ;;  %v6488_v54 = vcombine.low %v2199_v55, %v2207_v59  ;;  %v6585_v55 = vcombine.high %v2295_v49, %v2303_v50  ;;  %v2307_v59 = vld [vmem:[#allocation12 + $0x480] sm:$0xff] }
 0x66a   : > { %3960 = vmatpush1.bf16.msra.mxu1 %v6488_v54 }
 0x66b   : > { %v1834_v8 = vpop.permute.xlu1 %1833  ;;  %v1840_v9 = vld [vmem:[#allocation3 + $0x8] sm:$0xff] }
 0x66c   : > { %1838 = vst.msk [vmem:[#allocation3 + $0x18] sm:$0xff] %vm1580_vm3, %v1834_v8  ;;  %v6497_v8 = vcombine.high %v2211_v2, %v2219_v56 }
 0x66f   : > { %v1577_v57 = vpop.permute.xlu1 %1576  ;;  %v1839_v16 = vld [vmem:[#allocation3] sm:$0xff] }
 0x670   : > { %1582 = vst.msk [vmem:[#allocation3 + $0x10] sm:$0xff] %vm1580_vm3, %v1577_v57  ;;  %v6505_v57 = vcombine.high %v2215_v3, %v2223_v58 }
 0x672   : > { %3961 = vmatprep.subr.bf16.mxu1 %v6505_v57 }
 0x673   : > { %v1842_v11 = vld [vmem:[#allocation3 + $0x18] sm:$0xff] }
 0x674   : > { %v1844_v14 = vpack.c.bf16 %v1842_v11, %v1840_v9  ;;  %v2227_v9 = vld [vmem:[#allocation12 + $0x200] sm:$0xff] }
 0x675   : > { %v2235_v11 = vld [vmem:[#allocation12 + $0x240] sm:$0xff] }
 0x676   : > { %2081 = vmatprep.mubr.bf16.mxu0 %v1844_v14  ;;  %v2231_v14 = vld [vmem:[#allocation12 + $0x220] sm:$0xff]  ;;  %v6513_v18 = vcombine.high %v2227_v9, %v2235_v11 }
 0x677   : > { %v1841_v15 = vld [vmem:[#allocation3 + $0x10] sm:$0xff] }
 0x678   : > { %v1843_v17 = vpack.c.bf16 %v1841_v15, %v1839_v16  ;;  %v2239_v16 = vld [vmem:[#allocation12 + $0x260] sm:$0xff]  ;;  %v6496_v15 = vcombine.low %v2211_v2, %v2219_v56  ;;  %v6584_v2 = vcombine.low %v2295_v49, %v2303_v50 }
 0x679   : > { %v2383_v50 = vld [vmem:[#allocation12 + $0x6e0] sm:$0xff] }
 0x67a   : > { %2082 = vmatmul.mubr.bf16.vlgmr.msra.gmra.mrb[28].mxu0 %v1843_v17  ;;  %v6504_v17 = vcombine.low %v2215_v3, %v2223_v58 }
 0x67b   : > { %3784 = vmatpush1.bf16.msra.mxu0 %v6448_v10  ;;  %v2279_v10 = vld [vmem:[#allocation12 + $0x3a0] sm:$0xff] }
 0x67c   : > { %3785 = vmatprep.subr.bf16.mxu0 %v6465_v48  ;;  %3962 = vmatpush1.bf16.msra.mxu1 %v6504_v17  ;;  %v6569_v46 = vcombine.high %v2279_v10, %v2287_v44  ;;  %v2299_v48 = vld [vmem:[#allocation12 + $0x440] sm:$0xff]  ;;  %v6568_v52 = vcombine.low %v2279_v10, %v2287_v44 }
 0x67d   : > { %v6577_v53 = vcombine.high %v2291_v47, %v2299_v48  ;;  %v6576_v1 = vcombine.low %v2291_v47, %v2299_v48  ;;  %v2367_v44 = vld [vmem:[#allocation12 + $0x660] sm:$0xff] }
 0x67e   : > { %v2379_v47 = vld [vmem:[#allocation12 + $0x6c0] sm:$0xff] }
 0x67f   : > { %3786 = vmatpush1.bf16.msra.mxu0 %v6464_v62  ;;  %v2315_v62 = vld [vmem:[#allocation12 + $0x4c0] sm:$0xff] }
 0x680   : > { %3787 = vmatprep.subr.bf16.mxu0 %v6481_v0  ;;  %v2319_v0 = vld [vmem:[#allocation12 + $0x4e0] sm:$0xff]  ;;  %v6593_v56 = vcombine.high %v2307_v59, %v2315_v62  ;;  %v6592_v58 = vcombine.low %v2307_v59, %v2315_v62 }
 0x681   : > { %v6601_v3 = vcombine.high %v2311_v63, %v2319_v0  ;;  %v2375_v48 = vld [vmem:[#allocation12 + $0x6a0] sm:$0xff] }
 0x682   : > { %v2395_v59 = vld [vmem:[#allocation12 + $0x740] sm:$0xff] }
 0x683   : > { %3788 = vmatpush1.bf16.msra.mxu0 %v6480_v5  ;;  %v6600_v5 = vcombine.low %v2311_v63, %v2319_v0  ;;  %v2391_v62 = vld [vmem:[#allocation12 + $0x720] sm:$0xff] }
 0x684   : > { %3789 = vmatprep.subr.bf16.mxu0 %v6497_v8  ;;  %v2399_v0 = vld [vmem:[#allocation12 + $0x760] sm:$0xff] }
 0x687   : > { %3790 = vmatpush1.bf16.msra.mxu0 %v6496_v15 }
 0x688   : > { %3791 = vmatprep.subr.bf16.mxu0 %v6513_v18 }
 0x74d   : > { %v2083_v21 = vpop.f32.mrb[28].mxu0 }
 0x74e   : > { %v2084_v22 = vadd.f32 %v2083_v21, %v1882_v38  ;;  %v2085_v26 = vpop.f32.mrb[29].mxu0  ;;  %v2247_v21 = vld [vmem:[#allocation12 + $0x2a0] sm:$0xff] }
 0x74f   : > { %v2086_v27 = vadd.f32 %v2085_v26, %v1886_v19  ;;  %v2087_v29 = vpop.f32.mrb[30].mxu0  ;;  %v6520_v26 = vcombine.low %v2231_v14, %v2239_v16 }
 0x750   : > { %v8593_v30 = vadd.f32 %v2084_v22, %v1315_v20  ;;  %v2088_v31 = vadd.f32 %v2087_v29, %v1882_v38  ;;  %v2089_v33 = vpop.f32.mrb[31].mxu0  ;;  %v6521_v38 = vcombine.high %v2231_v14, %v2239_v16  ;;  %v2251_v20 = vld [vmem:[#allocation12 + $0x2c0] sm:$0xff] }
 0x751   : > { %v8596_v34 = vadd.f32 %v2086_v27, %v1316_v23  ;;  %v2090_v35 = vadd.f32 %v2089_v33, %v1886_v19  ;;  %v2243_v19 = vld [vmem:[#allocation12 + $0x280] sm:$0xff]  ;;  %v6512_v23 = vcombine.low %v2227_v9, %v2235_v11 }
 0x752   : > { %v8598_v36 = vadd.f32 %v2088_v31, %v1317_v28  ;;  %v2255_v22 = vld [vmem:[#allocation12 + $0x2e0] sm:$0xff]  ;;  %v6529_v27 = vcombine.high %v2243_v19, %v2251_v20  ;;  %3963 = vmatprep.subr.bf16.mxu1 %v6521_v38 }
 0x753   : > { %v8600_v37 = vadd.f32 %v2090_v35, %v1318_v32  ;;  %v2096_v40 = vadd.f32 %v8596_v34, %v8593_v30  ;;  %v6537_v28 = vcombine.high %v2247_v21, %v2255_v22  ;;  %v2259_v29 = vld [vmem:[#allocation12 + $0x300] sm:$0xff]  ;;  %3792 = vmatpush1.bf16.msra.mxu0 %v6512_v23  ;;  %v6528_v35 = vcombine.low %v2243_v19, %v2251_v20 }
 0x754   : > { %v2267_v31 = vld [vmem:[#allocation12 + $0x340] sm:$0xff]  ;;  %3964 = vmatpush1.bf16.msra.mxu1 %v6520_v26  ;;  %3793 = vmatprep.subr.bf16.mxu0 %v6529_v27 }
 0x755   : > { %2097 = vadd.xlane.f32.xlu0 %v2096_v40  ;;  %v2099_v24 = vadd.f32 %v8600_v37, %v8598_v36  ;;  %v2263_v32 = vld [vmem:[#allocation12 + $0x320] sm:$0xff]  ;;  %v6536_v40 = vcombine.low %v2247_v21, %v2255_v22  ;;  %3965 = vmatprep.subr.bf16.mxu1 %v6537_v28  ;;  %v6544_v4 = vcombine.low %v2259_v29, %v2267_v31 }
 0x756   : > { %v2271_v33 = vld [vmem:[#allocation12 + $0x360] sm:$0xff] }
 0x757   : > { %2100 = vadd.xlane.f32.xlu1 %v2099_v24  ;;  %v6545_v24 = vcombine.high %v2259_v29, %v2267_v31  ;;  %v6553_v39 = vcombine.high %v2263_v32, %v2271_v33  ;;  %3794 = vmatpush1.bf16.msra.mxu0 %v6528_v35  ;;  %v6552_v45 = vcombine.low %v2263_v32, %v2271_v33  ;;  %v2331_v20 = vld [vmem:[#allocation12 + $0x540] sm:$0xff] }
 0x758   : > { %3966 = vmatpush1.bf16.msra.mxu1 %v6536_v40  ;;  %v2335_v22 = vld [vmem:[#allocation12 + $0x560] sm:$0xff] }
 0x759   : > { %3795 = vmatprep.subr.bf16.mxu0 %v6545_v24  ;;  %3967 = vmatprep.subr.bf16.mxu1 %v6553_v39  ;;  %v2339_v28 = vld [vmem:[#allocation12 + $0x580] sm:$0xff] }
 0x75a   : > { %v2347_v29 = vld [vmem:[#allocation12 + $0x5c0] sm:$0xff] }
 0x75b   : > { %3796 = vmatpush1.bf16.msra.mxu0 %v6544_v4  ;;  %v2343_v31 = vld [vmem:[#allocation12 + $0x5a0] sm:$0xff]  ;;  %v6625_v32 = vcombine.high %v2339_v28, %v2347_v29  ;;  %v6624_v35 = vcombine.low %v2339_v28, %v2347_v29  ;;  %v2129_v29 = vld [vmem:[%s8831_s9] sm:$0x3] }
 0x75c   : > { %3968 = vmatpush1.bf16.msra.mxu1 %v6552_v45  ;;  %3797 = vmatprep.subr.bf16.mxu0 %v6561_v7  ;;  %v2351_v33 = vld [vmem:[#allocation12 + $0x5e0] sm:$0xff]  ;;  %v6648_v45 = vcombine.low %v2359_v6, %v2367_v44  ;;  %v6649_v7 = vcombine.high %v2359_v6, %v2367_v44 }
 0x75d   : > { %3969 = vmatprep.subr.bf16.mxu1 %v6569_v46  ;;  %v6632_v40 = vcombine.low %v2343_v31, %v2351_v33  ;;  %v6633_v24 = vcombine.high %v2343_v31, %v2351_v33  ;;  %v2355_v39 = vld [vmem:[#allocation12 + $0x600] sm:$0xff]  ;;  %v2138_v33 = vrot.slane %v2129_v29, %v8468_v43 }
 0x75e   : > { %v6641_v10 = vcombine.high %v2355_v39, %v2363_v25  ;;  %v6640_v4 = vcombine.low %v2355_v39, %v2363_v25  ;;  %v2371_v46 = vld [vmem:[#allocation12 + $0x680] sm:$0xff] }
 0x75f   : > { %3798 = vmatpush1.bf16.msra.mxu0 %v6560_v51  ;;  %v6657_v49 = vcombine.high %v2371_v46, %v2379_v47  ;;  %v6656_v51 = vcombine.low %v2371_v46, %v2379_v47 }
 0x760   : > { %3970 = vmatpush1.bf16.msra.mxu1 %v6568_v52  ;;  %3799 = vmatprep.subr.bf16.mxu0 %v6577_v53  ;;  %v6664_v52 = vcombine.low %v2375_v48, %v2383_v50  ;;  %v6665_v53 = vcombine.high %v2375_v48, %v2383_v50  ;;  %v2188_v50 = vld [vmem:[#allocation12 + $0xc8] sm:$0xff] }
 0x761   : > { %3971 = vmatprep.subr.bf16.mxu1 %v6585_v55  ;;  %v2387_v55 = vld [vmem:[#allocation12 + $0x700] sm:$0xff] }
 0x762   : > { %v6673_v63 = vcombine.high %v2387_v55, %v2395_v59 }
 0x763   : > { %3800 = vmatpush1.bf16.msra.mxu0 %v6576_v1  ;;  %v6672_v1 = vcombine.low %v2387_v55, %v2395_v59 }
 0x764   : > { %3972 = vmatpush1.bf16.msra.mxu1 %v6584_v2  ;;  %3801 = vmatprep.subr.bf16.mxu0 %v6593_v56  ;;  %v6680_v2 = vcombine.low %v2391_v62, %v2399_v0  ;;  %v6681_v56 = vcombine.high %v2391_v62, %v2399_v0  ;;  %v2204_v62 = vld [vmem:[#allocation12 + $0x148] sm:$0xff]  ;;  %v2209_v0 = vld [vmem:[#allocation12 + $0x170] sm:$0xff] }
 0x765   : > { %3973 = vmatprep.subr.bf16.mxu1 %v6601_v3  ;;  %v2403_v3 = vld [vmem:[#allocation12 + $0x780] sm:$0xff] }
 0x767   : > { %3802 = vmatpush1.bf16.msra.mxu0 %v6592_v58  ;;  %v2411_v58 = vld [vmem:[#allocation12 + $0x7c0] sm:$0xff] }
 0x768   : > { %3974 = vmatpush1.bf16.msra.mxu1 %v6600_v5  ;;  %v2407_v5 = vld [vmem:[#allocation12 + $0x7a0] sm:$0xff] }
 0x7e2   : > { %v2098_v54 = vpop.xlane.xlu0 %2097 }
 0x7e3   : > { %v2103_v8 = vmul.f32 0.00390625, %v2098_v54  ;;  %v6689_v54 = vcombine.high %v2403_v3, %v2411_v58 }
 0x7e4   : > { %v2101_v57 = vpop.xlane.xlu1 %2100 }
 0x7e5   : > { %v8607_v9 = vsub.f32 %v8593_v30, %v2103_v8  ;;  %v8610_v11 = vsub.f32 %v8596_v34, %v2103_v8  ;;  %v2104_v14 = vmul.f32 0.00390625, %v2101_v57  ;;  %v2415_v8 = vld [vmem:[#allocation12 + $0x7e0] sm:$0xff]  ;;  %v6688_v57 = vcombine.low %v2403_v3, %v2411_v58  ;;  %v2212_v58 = vld [vmem:[#allocation12 + $0x188] sm:$0xff] }
 0x7e7   : > { %v8613_v16 = vsub.f32 %v8598_v36, %v2104_v14  ;;  %v8616_v15 = vsub.f32 %v8600_v37, %v2104_v14  ;;  %v2109_v17 = vmul.f32 %v8607_v9, %v8607_v9  ;;  %v2110_v18 = vmul.f32 %v8610_v11, %v8610_v11  ;;  %v2323_v36 = vld [vmem:[#allocation12 + $0x500] sm:$0xff] }
 0x7e8   : > { %v2327_v37 = vld [vmem:[#allocation12 + $0x520] sm:$0xff]  ;;  %v6609_v21 = vcombine.high %v2323_v36, %v2331_v20  ;;  %v6608_v23 = vcombine.low %v2323_v36, %v2331_v20  ;;  %v6696_v14 = vcombine.low %v2407_v5, %v2415_v8 }
 0x7e9   : > { %v2113_v38 = vadd.f32 %v2110_v18, %v2109_v17  ;;  %v2111_v30 = vmul.f32 %v8613_v16, %v8613_v16  ;;  %v2112_v34 = vmul.f32 %v8616_v15, %v8616_v15  ;;  %v6616_v26 = vcombine.low %v2327_v37, %v2335_v22  ;;  %v2164_v18 = vld [vmem:[#allocation12 + $0x8] sm:$0xff] }
 0x7ea   : > { %v6617_v27 = vcombine.high %v2327_v37, %v2335_v22  ;;  %3803 = vmatprep.subr.bf16.mxu0 %v6609_v21  ;;  %v6697_v17 = vcombine.high %v2407_v5, %v2415_v8  ;;  %v2220_v5 = vld [vmem:[#allocation12 + $0x1c8] sm:$0xff]  ;;  %v2225_v8 = vld [vmem:[#allocation12 + $0x1f0] sm:$0xff] }
 0x7eb   : > { %2114 = vadd.xlane.f32.xlu0 %v2113_v38  ;;  %v2116_v19 = vadd.f32 %v2112_v34, %v2111_v30  ;;  %3804 = vmatpush1.bf16.msra.mxu0 %v6608_v23  ;;  %v2172_v38 = vld [vmem:[#allocation12 + $0x48] sm:$0xff]  ;;  %v2169_v30 = vld [vmem:[#allocation12 + $0x30] sm:$0xff] }
 0x7ec   : > { %3975 = vmatprep.subr.bf16.mxu1 %v6617_v27  ;;  %3805 = vmatprep.subr.bf16.mxu0 %v6625_v32  ;;  %v6451_v34 = vcombine.high %v2164_v18, %v2172_v38  ;;  %v6450_v36 = vcombine.low %v2164_v18, %v2172_v38  ;;  %v2134_v32 = vrot.slane %v2129_v29, %v8462_v42  ;;  %v2228_v38 = vld [vmem:[#allocation12 + $0x208] sm:$0xff] }
 0x7ed   : > { %3976 = vmatpush1.bf16.msra.mxu1 %v6616_v26 }
 0x7ee   : > { %3977 = vmatprep.subr.bf16.mxu1 %v6633_v24 }
 0x7ef   : > { %2117 = vadd.xlane.f32.xlu0 %v2116_v19  ;;  %3806 = vmatpush1.bf16.msra.mxu0 %v6624_v35  ;;  %v2177_v19 = vld [vmem:[#allocation12 + $0x70] sm:$0xff]  ;;  %v2145_v35 = vld [vmem:[%s8867_s21] sm:$0x3] }
 0x7f0   : > { %3807 = vmatprep.subr.bf16.mxu0 %v6641_v10  ;;  %v6460_v20 = vcombine.low %v2169_v30, %v2177_v19  ;;  %v6461_v37 = vcombine.high %v2169_v30, %v2177_v19  ;;  %v2150_v25 = vrot.slane %v2145_v35, %v8462_v42  ;;  %v2154_v6 = vrot.slane %v2145_v35, %v8468_v43  ;;  %v2236_v30 = vld [vmem:[#allocation12 + $0x248] sm:$0xff]  ;;  %v2241_v19 = vld [vmem:[#allocation12 + $0x270] sm:$0xff] }
 0x7f1   : > { %3978 = vmatpush1.bf16.msra.mxu1 %v6632_v40  ;;  %v2268_v35 = vld [vmem:[#allocation12 + $0x348] sm:$0xff] }
 0x7f2   : > { %3979 = vmatprep.subr.bf16.mxu1 %v6649_v7 }
 0x7f3   : > { %3808 = vmatpush1.bf16.msra.mxu0 %v6640_v4 }
 0x7f4   : > { %3809 = vmatprep.subr.bf16.mxu0 %v6657_v49  ;;  %v2180_v49 = vld [vmem:[#allocation12 + $0x88] sm:$0xff] }
 0x7f5   : > { %3980 = vmatpush1.bf16.msra.mxu1 %v6648_v45  ;;  %v6467_v55 = vcombine.high %v2180_v49, %v2188_v50 }
 0x7f6   : > { %3981 = vmatprep.subr.bf16.mxu1 %v6665_v53 }
 0x7f7   : > { %3810 = vmatpush1.bf16.msra.mxu0 %v6656_v51  ;;  %v2185_v51 = vld [vmem:[#allocation12 + $0xb0] sm:$0xff] }
 0x7f8   : > { %3811 = vmatprep.subr.bf16.mxu0 %v6673_v63  ;;  %v2201_v63 = vld [vmem:[#allocation12 + $0x130] sm:$0xff] }
 0x7f9   : > { %3982 = vmatpush1.bf16.msra.mxu1 %v6664_v52  ;;  %v2193_v52 = vld [vmem:[#allocation12 + $0xf0] sm:$0xff]  ;;  %v6493_v3 = vcombine.high %v2201_v63, %v2209_v0 }
 0x7fa   : > { %3983 = vmatprep.subr.bf16.mxu1 %v6681_v56  ;;  %v6477_v59 = vcombine.high %v2185_v51, %v2193_v52 }
 0x7fb   : > { %3812 = vmatpush1.bf16.msra.mxu0 %v6672_v1  ;;  %v6466_v1 = vcombine.low %v2180_v49, %v2188_v50 }
 0x7fc   : > { %3813 = vmatprep.subr.bf16.mxu0 %v6689_v54  ;;  %v2217_v54 = vld [vmem:[#allocation12 + $0x1b0] sm:$0xff] }
 0x7fd   : > { %3984 = vmatpush1.bf16.msra.mxu1 %v6680_v2  ;;  %v6476_v2 = vcombine.low %v2185_v51, %v2193_v52  ;;  %v6509_v18 = vcombine.high %v2217_v54, %v2225_v8  ;;  %v2292_v52 = vld [vmem:[#allocation12 + $0x408] sm:$0xff] }
 0x7fe   : > { %3985 = vmatprep.subr.bf16.mxu1 %v6697_v17  ;;  %v6499_v17 = vcombine.high %v2212_v58, %v2220_v5 }
 0x7ff   : > { %3814 = vmatpush1.bf16.msra.mxu0 %v6688_v57 }
 0x800   : > { %3826 = vmatprep.subr.bf16.mxu0 %v6451_v34  ;;  %v2233_v34 = vld [vmem:[#allocation12 + $0x230] sm:$0xff] }
 0x801   : > { %3986 = vmatpush1.bf16.msra.mxu1 %v6696_v14  ;;  %v6492_v14 = vcombine.low %v2201_v63, %v2209_v0  ;;  %v6524_v29 = vcombine.low %v2233_v34, %v2241_v19 }
 0x802   : > { %4041 = vmatprep.subr.bf16.mxu1 %v6461_v37  ;;  %v6515_v37 = vcombine.high %v2228_v38, %v2236_v30 }
 0x878   : > { %v2115_v21 = vpop.xlane.xlu0 %2114 }
 0x879   : > { %v2119_v22 = vmul.f32 0.00390625, %v2115_v21  ;;  %v6525_v21 = vcombine.high %v2233_v34, %v2241_v19 }
 0x87b   : > { %v2121_v23 = vadd.f32 1e-05, %v2119_v22  ;;  %v2244_v22 = vld [vmem:[#allocation12 + $0x288] sm:$0xff] }
 0x87c   : > { %v2118_v26 = vpop.xlane.xlu0 %2117 }
 0x87d   : > { %7797 = vrsqrt.f32 %v2121_v23  ;;  %v2120_v27 = vmul.f32 0.00390625, %v2118_v26  ;;  %v2252_v23 = vld [vmem:[#allocation12 + $0x2c8] sm:$0xff]  ;;  %v2249_v26 = vld [vmem:[#allocation12 + $0x2b0] sm:$0xff] }
 0x87f   : > { %v2122_v28 = vadd.f32 1e-05, %v2120_v27  ;;  %v2257_v27 = vld [vmem:[#allocation12 + $0x2f0] sm:$0xff] }
 0x881   : > { %7799 = vrsqrt.f32 %v2122_v28  ;;  %v6514_v28 = vcombine.low %v2228_v38, %v2236_v30  ;;  %v2337_v38 = vld [vmem:[#allocation12 + $0x570] sm:$0xff] }
 0x887   : > { %v7798_v31 = vpop.eup %7797 }
 0x888   : > { %v2125_v40 = vmul.f32 %v7798_v31, %v8607_v9  ;;  %v2126_v24 = vmul.f32 %v7798_v31, %v8610_v11  ;;  %v6531_v31 = vcombine.high %v2244_v22, %v2252_v23 }
 0x88a   : > { %v2141_v10 = vmul.f32 %v2134_v32, %v2125_v40  ;;  %v2142_v44 = vmul.f32 %v2138_v33, %v2126_v24  ;;  %v2265_v40 = vld [vmem:[#allocation12 + $0x330] sm:$0xff] }
 0x88b   : > { %v7800_v39 = vpop.eup %7799  ;;  %v2273_v24 = vld [vmem:[#allocation12 + $0x370] sm:$0xff] }
 0x88c   : > { %v2127_v4 = vmul.f32 %v7800_v39, %v8613_v16  ;;  %v2128_v45 = vmul.f32 %v7800_v39, %v8616_v15  ;;  %v8640_v47 = vadd.f32 %v2150_v25, %v2141_v10  ;;  %v8642_v48 = vadd.f32 %v2154_v6, %v2142_v44  ;;  %v2196_v15 = vld [vmem:[#allocation12 + $0x108] sm:$0xff] }
 0x88d   : > { %v6483_v56 = vcombine.high %v2196_v15, %v2204_v62  ;;  %v6482_v57 = vcombine.low %v2196_v15, %v2204_v62  ;;  %v6530_v39 = vcombine.low %v2244_v22, %v2252_v23  ;;  %v6557_v10 = vcombine.high %v2265_v40, %v2273_v24  ;;  %v2276_v44 = vld [vmem:[#allocation12 + $0x388] sm:$0xff]  ;;  %v2353_v22 = vld [vmem:[#allocation12 + $0x5f0] sm:$0xff] }
 0x88e   : > { %v2143_v7 = vmul.f32 %v2134_v32, %v2127_v4  ;;  %v2144_v46 = vmul.f32 %v2138_v33, %v2128_v45  ;;  %v6541_v32 = vcombine.high %v2249_v26, %v2257_v27  ;;  %v2260_v33 = vld [vmem:[#allocation12 + $0x308] sm:$0xff]  ;;  %v2281_v45 = vld [vmem:[#allocation12 + $0x3b0] sm:$0xff]  ;;  %v6556_v49 = vcombine.low %v2265_v40, %v2273_v24 }
 0x88f   : > { %v2284_v4 = vld [vmem:[#allocation12 + $0x3c8] sm:$0xff] }
 0x890   : > { %v8644_v9 = vadd.f32 %v2150_v25, %v2143_v7  ;;  %v8646_v11 = vadd.f32 %v2154_v6, %v2144_v46  ;;  %v6540_v25 = vcombine.low %v2249_v26, %v2257_v27  ;;  %v6547_v6 = vcombine.high %v2260_v33, %v2268_v35  ;;  %v2289_v7 = vld [vmem:[#allocation12 + $0x3f0] sm:$0xff]  ;;  %v2300_v15 = vld [vmem:[#allocation12 + $0x448] sm:$0xff] }
 0x891   : > { %v6546_v46 = vcombine.low %v2260_v33, %v2268_v35  ;;  %v6563_v50 = vcombine.high %v2276_v44, %v2284_v4  ;;  %v6573_v51 = vcombine.high %v2281_v45, %v2289_v7  ;;  %v6562_v62 = vcombine.low %v2276_v44, %v2284_v4  ;;  %v2369_v33 = vld [vmem:[#allocation12 + $0x670] sm:$0xff] }
 0x892   : > { %v8650_v53 = vpack.c.bf16 %v8644_v9, %v8640_v47  ;;  %v8654_v16 = vpack.c.bf16 %v8646_v11, %v8642_v48  ;;  %v6572_v63 = vcombine.low %v2281_v45, %v2289_v7  ;;  %v6579_v0 = vcombine.high %v2292_v52, %v2300_v15  ;;  %v2385_v44 = vld [vmem:[#allocation12 + $0x6f0] sm:$0xff] }
 0x894   : > { %3815 = vmatprep.mubr.bf16.mxu0 %v8654_v16  ;;  %3987 = vmatprep.mubr.bf16.mxu1 %v8654_v16 }
 0x895   : > { %3816 = vmatmul.mubr.bf16.vlgmr.msra.gmra.mrb[32].mxu0 %v8650_v53  ;;  %3988 = vmatmul.mubr.bf16.vlgmr.msra.gmra.mrb[16].mxu1 %v8650_v53 }
 0x896   : > { %3827 = vmatpush1.bf16.msra.mxu0 %v6450_v36  ;;  %4042 = vmatpush1.bf16.msra.mxu1 %v6460_v20  ;;  %v6498_v36 = vcombine.low %v2212_v58, %v2220_v5  ;;  %v6508_v20 = vcombine.low %v2217_v54, %v2225_v8  ;;  %v2321_v58 = vld [vmem:[#allocation12 + $0x4f0] sm:$0xff]  ;;  %v6578_v5 = vcombine.low %v2292_v52, %v2300_v15 }
 0x897   : > { %3858 = vmatprep.mubr.bf16.mxu0 %v8654_v16  ;;  %4073 = vmatprep.mubr.bf16.mxu1 %v8654_v16  ;;  %v2401_v52 = vld [vmem:[#allocation12 + $0x770] sm:$0xff] }
 0x898   : > { %3828 = vmatprep.subr.bf16.mxu0 %v6467_v55  ;;  %4043 = vmatprep.subr.bf16.mxu1 %v6477_v59  ;;  %v2297_v55 = vld [vmem:[#allocation12 + $0x430] sm:$0xff] }
 0x899   : > { %v2305_v59 = vld [vmem:[#allocation12 + $0x470] sm:$0xff] }
 0x89a   : > { %3829 = vmatpush1.bf16.msra.mxu0 %v6466_v1  ;;  %4044 = vmatpush1.bf16.msra.mxu1 %v6476_v2  ;;  %v6589_v1 = vcombine.high %v2297_v55, %v2305_v59  ;;  %v2308_v2 = vld [vmem:[#allocation12 + $0x488] sm:$0xff]  ;;  %v6588_v54 = vcombine.low %v2297_v55, %v2305_v59 }
 0x89b   : > { %3830 = vmatprep.subr.bf16.mxu0 %v6483_v56  ;;  %4045 = vmatprep.subr.bf16.mxu1 %v6493_v3  ;;  %v2316_v56 = vld [vmem:[#allocation12 + $0x4c8] sm:$0xff]  ;;  %v2313_v3 = vld [vmem:[#allocation12 + $0x4b0] sm:$0xff] }
 0x89c   : > { %v6595_v8 = vcombine.high %v2308_v2, %v2316_v56  ;;  %v6594_v30 = vcombine.low %v2308_v2, %v2316_v56  ;;  %v6604_v34 = vcombine.low %v2313_v3, %v2321_v58  ;;  %v2417_v2 = vld [vmem:[#allocation12 + $0x7f0] sm:$0xff] }
 0x89e   : > { %3831 = vmatpush1.bf16.msra.mxu0 %v6482_v57  ;;  %4046 = vmatpush1.bf16.msra.mxu1 %v6492_v14  ;;  %v6605_v57 = vcombine.high %v2313_v3, %v2321_v58  ;;  %v2324_v14 = vld [vmem:[#allocation12 + $0x508] sm:$0xff] }
 0x89f   : > { %3832 = vmatprep.subr.bf16.mxu0 %v6499_v17  ;;  %4047 = vmatprep.subr.bf16.mxu1 %v6509_v18  ;;  %v2332_v17 = vld [vmem:[#allocation12 + $0x548] sm:$0xff]  ;;  %v2329_v18 = vld [vmem:[#allocation12 + $0x530] sm:$0xff] }
 0x8a0   : > { %v6611_v19 = vcombine.high %v2324_v14, %v2332_v17  ;;  %v6610_v23 = vcombine.low %v2324_v14, %v2332_v17  ;;  %v6620_v26 = vcombine.low %v2329_v18, %v2337_v38 }
 0x8a2   : > { %3833 = vmatpush1.bf16.msra.mxu0 %v6498_v36  ;;  %4048 = vmatpush1.bf16.msra.mxu1 %v6508_v20  ;;  %v6621_v36 = vcombine.high %v2329_v18, %v2337_v38  ;;  %v2340_v20 = vld [vmem:[#allocation12 + $0x588] sm:$0xff]  ;;  %v2181_v38 = vld [vmem:[#allocation12 + $0x90] sm:$0xff] }
 0x8a3   : > { %3834 = vmatprep.subr.bf16.mxu0 %v6515_v37  ;;  %4049 = vmatprep.subr.bf16.mxu1 %v6525_v21  ;;  %v2348_v37 = vld [vmem:[#allocation12 + $0x5c8] sm:$0xff]  ;;  %v2345_v21 = vld [vmem:[#allocation12 + $0x5b0] sm:$0xff] }
 0x8a4   : > { %v6627_v27 = vcombine.high %v2340_v20, %v2348_v37  ;;  %v6626_v35 = vcombine.low %v2340_v20, %v2348_v37  ;;  %v6636_v40 = vcombine.low %v2345_v21, %v2353_v22  ;;  %v7383_v18 = vld [vmem:[#allocation13 + $0x4] ss:$8 sps:$4 sm:$0xff]   ;;  %v2197_v20 = vld [vmem:[#allocation12 + $0x110] sm:$0xff] }
 0x8a5   : > { %v2205_v37 = vld [vmem:[#allocation12 + $0x150] sm:$0xff] }
 0x8a6   : > { %3835 = vmatpush1.bf16.msra.mxu0 %v6514_v28  ;;  %4050 = vmatpush1.bf16.msra.mxu1 %v6524_v29  ;;  %v6637_v28 = vcombine.high %v2345_v21, %v2353_v22  ;;  %v2356_v29 = vld [vmem:[#allocation12 + $0x608] sm:$0xff]  ;;  %v7386_v21 = vld [vmem:[#allocation13 + $0x14] ss:$8 sps:$4 sm:$0xff]  }
 0x8a7   : > { %3836 = vmatprep.subr.bf16.mxu0 %v6531_v31  ;;  %4051 = vmatprep.subr.bf16.mxu1 %v6541_v32  ;;  %v2364_v31 = vld [vmem:[#allocation12 + $0x648] sm:$0xff]  ;;  %v2361_v32 = vld [vmem:[#allocation12 + $0x630] sm:$0xff] }
 0x8a8   : > { %v6643_v24 = vcombine.high %v2356_v29, %v2364_v31  ;;  %v6642_v4 = vcombine.low %v2356_v29, %v2364_v31  ;;  %v6652_v45 = vcombine.low %v2361_v32, %v2369_v33  ;;  %v7389_v29 = vld [vmem:[#allocation13 + $0x24] ss:$8 sps:$4 sm:$0xff]   ;;  %v6484_v31 = vcombine.low %v2197_v20, %v2205_v37 }
 0x8aa   : > { %3837 = vmatpush1.bf16.msra.mxu0 %v6530_v39  ;;  %4052 = vmatpush1.bf16.msra.mxu1 %v6540_v25  ;;  %v6653_v39 = vcombine.high %v2361_v32, %v2369_v33  ;;  %v2372_v25 = vld [vmem:[#allocation12 + $0x688] sm:$0xff] }
 0x8ab   : > { %3838 = vmatprep.subr.bf16.mxu0 %v6547_v6  ;;  %4053 = vmatprep.subr.bf16.mxu1 %v6557_v10  ;;  %v2380_v6 = vld [vmem:[#allocation12 + $0x6c8] sm:$0xff]  ;;  %v2377_v10 = vld [vmem:[#allocation12 + $0x6b0] sm:$0xff] }
 0x8ac   : > { %v6659_v7 = vcombine.high %v2372_v25, %v2380_v6  ;;  %v6658_v15 = vcombine.low %v2372_v25, %v2380_v6  ;;  %v6668_v55 = vcombine.low %v2377_v10, %v2385_v44  ;;  %v7387_v33 = vld [vmem:[#allocation13 + $0x20] ss:$8 sps:$4 sm:$0xff]   ;;  %v7390_v6 = vld [vmem:[#allocation13 + $0x30] ss:$8 sps:$4 sm:$0xff]  }
 0x8ae   : > { %3839 = vmatpush1.bf16.msra.mxu0 %v6546_v46  ;;  %4054 = vmatpush1.bf16.msra.mxu1 %v6556_v49  ;;  %v6669_v46 = vcombine.high %v2377_v10, %v2385_v44  ;;  %v2388_v49 = vld [vmem:[#allocation12 + $0x708] sm:$0xff]  ;;  %v2245_v10 = vld [vmem:[#allocation12 + $0x290] sm:$0xff] }
 0x8af   : > { %3840 = vmatprep.subr.bf16.mxu0 %v6563_v50  ;;  %4055 = vmatprep.subr.bf16.mxu1 %v6573_v51  ;;  %v2396_v50 = vld [vmem:[#allocation12 + $0x748] sm:$0xff]  ;;  %v2393_v51 = vld [vmem:[#allocation12 + $0x730] sm:$0xff] }
 0x8b0   : > { %v6675_v59 = vcombine.high %v2388_v49, %v2396_v50  ;;  %v6674_v56 = vcombine.low %v2388_v49, %v2396_v50  ;;  %v6684_v3 = vcombine.low %v2393_v51, %v2401_v52  ;;  %v2253_v44 = vld [vmem:[#allocation12 + $0x2d0] sm:$0xff] }
 0x8b1   : > { %v2261_v49 = vld [vmem:[#allocation12 + $0x310] sm:$0xff] }
 0x8b2   : > { %3841 = vmatpush1.bf16.msra.mxu0 %v6562_v62  ;;  %4056 = vmatpush1.bf16.msra.mxu1 %v6572_v63  ;;  %v6685_v62 = vcombine.high %v2393_v51, %v2401_v52  ;;  %v2404_v63 = vld [vmem:[#allocation12 + $0x788] sm:$0xff]  ;;  %v2269_v50 = vld [vmem:[#allocation12 + $0x350] sm:$0xff]  ;;  %v6532_v52 = vcombine.low %v2245_v10, %v2253_v44 }
 0x8b3   : > { %3842 = vmatprep.subr.bf16.mxu0 %v6579_v0  ;;  %4057 = vmatprep.subr.bf16.mxu1 %v6589_v1  ;;  %v2412_v0 = vld [vmem:[#allocation12 + $0x7c8] sm:$0xff]  ;;  %v2409_v1 = vld [vmem:[#allocation12 + $0x7b0] sm:$0xff] }
 0x8b4   : > { %v6691_v58 = vcombine.high %v2404_v63, %v2412_v0  ;;  %v6700_v14 = vcombine.low %v2409_v1, %v2417_v2  ;;  %v7398_v51 = vld [vmem:[#allocation13 + $0x54] ss:$8 sps:$4 sm:$0xff]  }
 0x8b6   : > { %3843 = vmatpush1.bf16.msra.mxu0 %v6578_v5  ;;  %4058 = vmatpush1.bf16.msra.mxu1 %v6588_v54  ;;  %v6701_v5 = vcombine.high %v2409_v1, %v2417_v2  ;;  %v2165_v54 = vld [vmem:[#allocation12 + $0x10] sm:$0xff]  ;;  %v7399_v2 = vld [vmem:[#allocation13 + $0x60] ss:$8 sps:$4 sm:$0xff]  }
 0x8b7   : > { %3844 = vmatprep.subr.bf16.mxu0 %v6595_v8  ;;  %4059 = vmatprep.subr.bf16.mxu1 %v6605_v57  ;;  %v2173_v8 = vld [vmem:[#allocation12 + $0x50] sm:$0xff]  ;;  %v6690_v57 = vcombine.low %v2404_v63, %v2412_v0  ;;  %v7401_v63 = vld [vmem:[#allocation13 + $0x64] ss:$8 sps:$4 sm:$0xff]   ;;  %v6548_v0 = vcombine.low %v2261_v49, %v2269_v50 }
 0x8b8   : > { %v6453_v17 = vcombine.high %v2165_v54, %v2173_v8 }
 0x8ba   : > { %3845 = vmatpush1.bf16.msra.mxu0 %v6594_v30  ;;  %4060 = vmatpush1.bf16.msra.mxu1 %v6604_v34  ;;  %v2189_v30 = vld [vmem:[#allocation12 + $0xd0] sm:$0xff]  ;;  %v6452_v34 = vcombine.low %v2165_v54, %v2173_v8 }
 0x8bb   : > { %3846 = vmatprep.subr.bf16.mxu0 %v6611_v19  ;;  %4061 = vmatprep.subr.bf16.mxu1 %v6621_v36  ;;  %v6469_v19 = vcombine.high %v2181_v38, %v2189_v30  ;;  %v7381_v36 = vld [vmem:[#allocation13] ss:$8 sps:$4 sm:$0xff]   ;;  %v6468_v22 = vcombine.low %v2181_v38, %v2189_v30  ;;  %v7402_v8 = vld [vmem:[#allocation13 + $0x70] ss:$8 sps:$4 sm:$0xff]  }
 0x8bc   : > { %v7405_v30 = vld [vmem:[#allocation13 + $0x80] ss:$8 sps:$4 sm:$0xff]  }
 0x8be   : > { %3847 = vmatpush1.bf16.msra.mxu0 %v6610_v23  ;;  %4062 = vmatpush1.bf16.msra.mxu1 %v6620_v26  ;;  %v6485_v23 = vcombine.high %v2197_v20, %v2205_v37  ;;  %v7384_v26 = vld [vmem:[#allocation13 + $0x10] ss:$8 sps:$4 sm:$0xff]  }
 0x8bf   : > { %3848 = vmatprep.subr.bf16.mxu0 %v6627_v27  ;;  %4063 = vmatprep.subr.bf16.mxu1 %v6637_v28  ;;  %v2213_v27 = vld [vmem:[#allocation12 + $0x190] sm:$0xff] }
 0x8c0   : > { %v2221_v28 = vld [vmem:[#allocation12 + $0x1d0] sm:$0xff] }
 0x8c1   : > { %v6501_v32 = vcombine.high %v2213_v27, %v2221_v28 }
 0x8c2   : > { %3849 = vmatpush1.bf16.msra.mxu0 %v6626_v35  ;;  %4064 = vmatpush1.bf16.msra.mxu1 %v6636_v40  ;;  %v2229_v35 = vld [vmem:[#allocation12 + $0x210] sm:$0xff] }
 0x8c3   : > { %3850 = vmatprep.subr.bf16.mxu0 %v6643_v24  ;;  %4065 = vmatprep.subr.bf16.mxu1 %v6653_v39  ;;  %v2237_v40 = vld [vmem:[#allocation12 + $0x250] sm:$0xff]  ;;  %v6500_v39 = vcombine.low %v2213_v27, %v2221_v28 }
 0x8c4   : > { %v7392_v24 = vld [vmem:[#allocation13 + $0x34] ss:$8 sps:$4 sm:$0xff]   ;;  %v6517_v25 = vcombine.high %v2229_v35, %v2237_v40 }
 0x8c6   : > { %3851 = vmatpush1.bf16.msra.mxu0 %v6642_v4  ;;  %4066 = vmatpush1.bf16.msra.mxu1 %v6652_v45  ;;  %v7395_v4 = vld [vmem:[#allocation13 + $0x44] ss:$8 sps:$4 sm:$0xff]   ;;  %v6516_v45 = vcombine.low %v2229_v35, %v2237_v40 }
 0x8c7   : > { %3852 = vmatprep.subr.bf16.mxu0 %v6659_v7  ;;  %4067 = vmatprep.subr.bf16.mxu1 %v6669_v46  ;;  %v6533_v7 = vcombine.high %v2245_v10, %v2253_v44  ;;  %v7393_v46 = vld [vmem:[#allocation13 + $0x40] ss:$8 sps:$4 sm:$0xff]  }
 0x8ca   : > { %3853 = vmatpush1.bf16.msra.mxu0 %v6658_v15  ;;  %4068 = vmatpush1.bf16.msra.mxu1 %v6668_v55  ;;  %v6549_v15 = vcombine.high %v2261_v49, %v2269_v50  ;;  %v7396_v55 = vld [vmem:[#allocation13 + $0x50] ss:$8 sps:$4 sm:$0xff]  }
 0x8cb   : > { %3854 = vmatprep.subr.bf16.mxu0 %v6675_v59  ;;  %4069 = vmatprep.subr.bf16.mxu1 %v6685_v62  ;;  %v2277_v59 = vld [vmem:[#allocation12 + $0x390] sm:$0xff] }
 0x8cc   : > { %v2285_v62 = vld [vmem:[#allocation12 + $0x3d0] sm:$0xff] }
 0x8cd   : > { %v6565_v1 = vcombine.high %v2277_v59, %v2285_v62 }
 0x8ce   : > { %3855 = vmatpush1.bf16.msra.mxu0 %v6674_v56  ;;  %4070 = vmatpush1.bf16.msra.mxu1 %v6684_v3  ;;  %v2293_v56 = vld [vmem:[#allocation12 + $0x410] sm:$0xff] }
 0x8cf   : > { %3856 = vmatprep.subr.bf16.mxu0 %v6691_v58  ;;  %4071 = vmatprep.subr.bf16.mxu1 %v6701_v5  ;;  %v2301_v3 = vld [vmem:[#allocation12 + $0x450] sm:$0xff]  ;;  %v6564_v5 = vcombine.low %v2277_v59, %v2285_v62 }
 0x8d0   : > { %v7404_v58 = vld [vmem:[#allocation13 + $0x74] ss:$8 sps:$4 sm:$0xff]   ;;  %v6581_v54 = vcombine.high %v2293_v56, %v2301_v3 }
 0x8d2   : > { %3857 = vmatpush1.bf16.msra.mxu0 %v6690_v57  ;;  %4072 = vmatpush1.bf16.msra.mxu1 %v6700_v14  ;;  %v2309_v57 = vld [vmem:[#allocation12 + $0x490] sm:$0xff] }
 0x8d3   : > { %3869 = vmatprep.subr.bf16.mxu0 %v6453_v17  ;;  %5723 = vmatprep.subr.bf16.mxu1 %v7383_v18  ;;  %v2317_v14 = vld [vmem:[#allocation12 + $0x4d0] sm:$0xff]  ;;  %v7407_v17 = vld [vmem:[#allocation13 + $0x84] ss:$8 sps:$4 sm:$0xff]   ;;  %v6580_v18 = vcombine.low %v2293_v56, %v2301_v3 }
 0x8d4   : > { %v6597_v38 = vcombine.high %v2309_v57, %v2317_v14  ;;  %v6596_v20 = vcombine.low %v2309_v57, %v2317_v14 }
 0x8d5   : > { %3859 = vmatmul.mubr.bf16.vlgmr.msra.gmra.mrb[36].mxu0 %v8650_v53  ;;  %4074 = vmatmul.mubr.bf16.vlgmr.msra.gmra.mrb[20].mxu1 %v8650_v53 }
 0x8d6   : > { %3870 = vmatpush1.bf16.msra.mxu0 %v6452_v34  ;;  %3901 = vmatprep.mubr.bf16.mxu0 %v8654_v16  ;;  %v2325_v34 = vld [vmem:[#allocation12 + $0x510] sm:$0xff] }
 0x8d7   : > { %3871 = vmatprep.subr.bf16.mxu0 %v6469_v19  ;;  %5724 = vmatpush1.bf16.msra.mxu1 %v7381_v36  ;;  %v2333_v19 = vld [vmem:[#allocation12 + $0x550] sm:$0xff] }
 0x8d8   : > { %5725 = vmatprep.subr.bf16.mxu1 %v7386_v21  ;;  %v7410_v36 = vld [vmem:[#allocation13 + $0x94] ss:$8 sps:$4 sm:$0xff]   ;;  %v6613_v37 = vcombine.high %v2325_v34, %v2333_v19  ;;  %v7408_v21 = vld [vmem:[#allocation13 + $0x90] ss:$8 sps:$4 sm:$0xff]   ;;  %v6612_v27 = vcombine.low %v2325_v34, %v2333_v19 }
 0x8d9   : > { %v2214_v34 = vld [vmem:[#allocation12 + $0x198] sm:$0xff] }
 0x8da   : > { %3872 = vmatpush1.bf16.msra.mxu0 %v6468_v22  ;;  %v2341_v22 = vld [vmem:[#allocation12 + $0x590] sm:$0xff]  ;;  %v2222_v19 = vld [vmem:[#allocation12 + $0x1d8] sm:$0xff] }
 0x8db   : > { %3873 = vmatprep.subr.bf16.mxu0 %v6485_v23  ;;  %5726 = vmatpush1.bf16.msra.mxu1 %v7384_v26  ;;  %v2349_v23 = vld [vmem:[#allocation12 + $0x5d0] sm:$0xff]  ;;  %v7413_v26 = vld [vmem:[#allocation13 + $0xa4] ss:$8 sps:$4 sm:$0xff]  }
 0x8dc   : > { %5727 = vmatprep.subr.bf16.mxu1 %v7389_v29  ;;  %v6629_v28 = vcombine.high %v2341_v22, %v2349_v23  ;;  %v7411_v29 = vld [vmem:[#allocation13 + $0xa0] ss:$8 sps:$4 sm:$0xff]   ;;  %v6628_v35 = vcombine.low %v2341_v22, %v2349_v23  ;;  %v6502_v22 = vcombine.low %v2214_v34, %v2222_v19 }
 0x8de   : > { %3874 = vmatpush1.bf16.msra.mxu0 %v6484_v31  ;;  %v2357_v31 = vld [vmem:[#allocation12 + $0x610] sm:$0xff] }
 0x8df   : > { %3875 = vmatprep.subr.bf16.mxu0 %v6501_v32  ;;  %5728 = vmatpush1.bf16.msra.mxu1 %v7387_v33  ;;  %v2365_v32 = vld [vmem:[#allocation12 + $0x650] sm:$0xff] }
 0x8e0   : > { %5729 = vmatprep.subr.bf16.mxu1 %v7392_v24  ;;  %v7416_v33 = vld [vmem:[#allocation13 + $0xb4] ss:$8 sps:$4 sm:$0xff]   ;;  %v6645_v40 = vcombine.high %v2357_v31, %v2365_v32  ;;  %v7414_v24 = vld [vmem:[#allocation13 + $0xb0] ss:$8 sps:$4 sm:$0xff]   ;;  %v6644_v10 = vcombine.low %v2357_v31, %v2365_v32 }
 0x8e1   : > { %v2262_v31 = vld [vmem:[#allocation12 + $0x318] sm:$0xff] }
 0x8e2   : > { %3876 = vmatpush1.bf16.msra.mxu0 %v6500_v39  ;;  %v2373_v39 = vld [vmem:[#allocation12 + $0x690] sm:$0xff]  ;;  %v2270_v32 = vld [vmem:[#allocation12 + $0x358] sm:$0xff] }
 0x8e3   : > { %3877 = vmatprep.subr.bf16.mxu0 %v6517_v25  ;;  %5730 = vmatpush1.bf16.msra.mxu1 %v7390_v6  ;;  %v2381_v25 = vld [vmem:[#allocation12 + $0x6d0] sm:$0xff]  ;;  %v7419_v6 = vld [vmem:[#allocation13 + $0xc4] ss:$8 sps:$4 sm:$0xff]  }
 0x8e4   : > { %5731 = vmatprep.subr.bf16.mxu1 %v7395_v4  ;;  %v6661_v44 = vcombine.high %v2373_v39, %v2381_v25  ;;  %v7417_v4 = vld [vmem:[#allocation13 + $0xc0] ss:$8 sps:$4 sm:$0xff]   ;;  %v6660_v49 = vcombine.low %v2373_v39, %v2381_v25  ;;  %v6550_v39 = vcombine.low %v2262_v31, %v2270_v32 }
 0x8e6   : > { %3878 = vmatpush1.bf16.msra.mxu0 %v6516_v45  ;;  %v2389_v45 = vld [vmem:[#allocation12 + $0x710] sm:$0xff] }
 0x8e7   : > { %3879 = vmatprep.subr.bf16.mxu0 %v6533_v7  ;;  %5732 = vmatpush1.bf16.msra.mxu1 %v7393_v46  ;;  %v2397_v7 = vld [vmem:[#allocation12 + $0x750] sm:$0xff] }
 0x8e8   : > { %5733 = vmatprep.subr.bf16.mxu1 %v7398_v51  ;;  %v7422_v46 = vld [vmem:[#allocation13 + $0xd4] ss:$8 sps:$4 sm:$0xff]   ;;  %v6677_v50 = vcombine.high %v2389_v45, %v2397_v7  ;;  %v7420_v51 = vld [vmem:[#allocation13 + $0xd0] ss:$8 sps:$4 sm:$0xff]   ;;  %v6676_v59 = vcombine.low %v2389_v45, %v2397_v7 }
 0x8e9   : > { %v2310_v45 = vld [vmem:[#allocation12 + $0x498] sm:$0xff] }
 0x8ea   : > { %3880 = vmatpush1.bf16.msra.mxu0 %v6532_v52  ;;  %v2405_v52 = vld [vmem:[#allocation12 + $0x790] sm:$0xff]  ;;  %v2318_v7 = vld [vmem:[#allocation12 + $0x4d8] sm:$0xff] }
 0x8eb   : > { %3881 = vmatprep.subr.bf16.mxu0 %v6549_v15  ;;  %5734 = vmatpush1.bf16.msra.mxu1 %v7396_v55  ;;  %v2413_v15 = vld [vmem:[#allocation12 + $0x7d0] sm:$0xff]  ;;  %v7425_v55 = vld [vmem:[#allocation13 + $0xe4] ss:$8 sps:$4 sm:$0xff]  }
 0x8ec   : > { %5735 = vmatprep.subr.bf16.mxu1 %v7401_v63  ;;  %v6693_v62 = vcombine.high %v2405_v52, %v2413_v15  ;;  %v7423_v63 = vld [vmem:[#allocation13 + $0xe0] ss:$8 sps:$4 sm:$0xff]   ;;  %v6692_v56 = vcombine.low %v2405_v52, %v2413_v15  ;;  %v6598_v52 = vcombine.low %v2310_v45, %v2318_v7 }
 0x8ee   : > { %3882 = vmatpush1.bf16.msra.mxu0 %v6548_v0  ;;  %v2166_v0 = vld [vmem:[#allocation12 + $0x18] sm:$0xff] }
 0x8ef   : > { %3883 = vmatprep.subr.bf16.mxu0 %v6565_v1  ;;  %5736 = vmatpush1.bf16.msra.mxu1 %v7399_v2  ;;  %v2174_v1 = vld [vmem:[#allocation12 + $0x58] sm:$0xff] }
 0x8f0   : > { %5737 = vmatprep.subr.bf16.mxu1 %v7404_v58  ;;  %v7428_v2 = vld [vmem:[#allocation13 + $0xf4] ss:$8 sps:$4 sm:$0xff]   ;;  %v6455_v3 = vcombine.high %v2166_v0, %v2174_v1  ;;  %v7426_v58 = vld [vmem:[#allocation13 + $0xf0] ss:$8 sps:$4 sm:$0xff]   ;;  %v6454_v57 = vcombine.low %v2166_v0, %v2174_v1 }
 0x8f1   : > { %v2358_v0 = vld [vmem:[#allocation12 + $0x618] sm:$0xff] }
 0x8f2   : > { %3884 = vmatpush1.bf16.msra.mxu0 %v6564_v5  ;;  %v2182_v5 = vld [vmem:[#allocation12 + $0x98] sm:$0xff] }
 0x8f3   : > { %3885 = vmatprep.subr.bf16.mxu0 %v6581_v54  ;;  %5738 = vmatpush1.bf16.msra.mxu1 %v7402_v8  ;;  %v2190_v54 = vld [vmem:[#allocation12 + $0xd8] sm:$0xff]  ;;  %v7431_v8 = vld [vmem:[#allocation13 + $0x104] ss:$8 sps:$4 sm:$0xff]  }
 0x8f4   : > { %5739 = vmatprep.subr.bf16.mxu1 %v7407_v17  ;;  %v6471_v14 = vcombine.high %v2182_v5, %v2190_v54  ;;  %v2198_v17 = vld [vmem:[#allocation12 + $0x118] sm:$0xff] }
 0x8f5   : > { %v2366_v1 = vld [vmem:[#allocation12 + $0x658] sm:$0xff] }
 0x8f6   : > { %3886 = vmatpush1.bf16.msra.mxu0 %v6580_v18  ;;  %v2206_v18 = vld [vmem:[#allocation12 + $0x158] sm:$0xff] }
 0x8f7   : > { %3887 = vmatprep.subr.bf16.mxu0 %v6597_v38  ;;  %5740 = vmatpush1.bf16.msra.mxu1 %v7405_v30  ;;  %v6470_v38 = vcombine.low %v2182_v5, %v2190_v54  ;;  %v6487_v30 = vcombine.high %v2198_v17, %v2206_v18  ;;  %v6646_v5 = vcombine.low %v2358_v0, %v2366_v1 }
 0x8f8   : > { %5741 = vmatprep.subr.bf16.mxu1 %v7410_v36  ;;  %v6486_v36 = vcombine.low %v2198_v17, %v2206_v18  ;;  %v2406_v18 = vld [vmem:[#allocation12 + $0x798] sm:$0xff] }
 0x8fa   : > { %3888 = vmatpush1.bf16.msra.mxu0 %v6596_v20  ;;  %v6503_v20 = vcombine.high %v2214_v34, %v2222_v19  ;;  %v2168_v19 = vld [vmem:[#allocation12 + $0x28] sm:$0xff] }
 0x8fb   : > { %3889 = vmatprep.subr.bf16.mxu0 %v6613_v37  ;;  %5742 = vmatpush1.bf16.msra.mxu1 %v7408_v21  ;;  %v2230_v37 = vld [vmem:[#allocation12 + $0x218] sm:$0xff] }
 0x8fc   : > { %5743 = vmatprep.subr.bf16.mxu1 %v7413_v26  ;;  %v2238_v21 = vld [vmem:[#allocation12 + $0x258] sm:$0xff] }
 0x8fd   : > { %v6519_v23 = vcombine.high %v2230_v37, %v2238_v21  ;;  %v2246_v26 = vld [vmem:[#allocation12 + $0x298] sm:$0xff] }
 0x8fe   : > { %3890 = vmatpush1.bf16.msra.mxu0 %v6612_v27  ;;  %v2254_v27 = vld [vmem:[#allocation12 + $0x2d8] sm:$0xff] }
 0x8ff   : > { %3891 = vmatprep.subr.bf16.mxu0 %v6629_v28  ;;  %5744 = vmatpush1.bf16.msra.mxu1 %v7411_v29  ;;  %v6518_v28 = vcombine.low %v2230_v37, %v2238_v21  ;;  %v6535_v29 = vcombine.high %v2246_v26, %v2254_v27  ;;  %v2184_v21 = vld [vmem:[#allocation12 + $0xa8] sm:$0xff] }
 0x900   : > { %5745 = vmatprep.subr.bf16.mxu1 %v7416_v33  ;;  %v6534_v33 = vcombine.low %v2246_v26, %v2254_v27  ;;  %v2200_v27 = vld [vmem:[#allocation12 + $0x128] sm:$0xff] }
 0x902   : > { %3892 = vmatpush1.bf16.msra.mxu0 %v6628_v35  ;;  %v6551_v35 = vcombine.high %v2262_v31, %v2270_v32  ;;  %v2216_v32 = vld [vmem:[#allocation12 + $0x1a8] sm:$0xff] }
 0x903   : > { %3893 = vmatprep.subr.bf16.mxu0 %v6645_v40  ;;  %5746 = vmatpush1.bf16.msra.mxu1 %v7414_v24  ;;  %v2278_v40 = vld [vmem:[#allocation12 + $0x398] sm:$0xff] }
 0x904   : > { %5747 = vmatprep.subr.bf16.mxu1 %v7419_v6  ;;  %v2286_v24 = vld [vmem:[#allocation12 + $0x3d8] sm:$0xff] }
 0x905   : > { %v6567_v25 = vcombine.high %v2278_v40, %v2286_v24  ;;  %v2294_v6 = vld [vmem:[#allocation12 + $0x418] sm:$0xff] }
 0x906   : > { %3894 = vmatpush1.bf16.msra.mxu0 %v6644_v10  ;;  %v2302_v10 = vld [vmem:[#allocation12 + $0x458] sm:$0xff] }
 0x907   : > { %3895 = vmatprep.subr.bf16.mxu0 %v6661_v44  ;;  %5748 = vmatpush1.bf16.msra.mxu1 %v7417_v4  ;;  %v6566_v44 = vcombine.low %v2278_v40, %v2286_v24  ;;  %v6583_v4 = vcombine.high %v2294_v6, %v2302_v10  ;;  %v2232_v24 = vld [vmem:[#allocation12 + $0x228] sm:$0xff] }
 0x908   : > { %5749 = vmatprep.subr.bf16.mxu1 %v7422_v46  ;;  %v6582_v46 = vcombine.low %v2294_v6, %v2302_v10  ;;  %v2248_v10 = vld [vmem:[#allocation12 + $0x2a8] sm:$0xff] }
 0x90a   : > { %3896 = vmatpush1.bf16.msra.mxu0 %v6660_v49  ;;  %v6599_v49 = vcombine.high %v2310_v45, %v2318_v7  ;;  %v8672_v45 = vld [vmem:[%s8868_s10] sm:$0xff]  ;;  %v8677_v7 = vld [vmem:[%s8868_s10 + $0x8] sm:$0xff] }
 0x90b   : > { %3897 = vmatprep.subr.bf16.mxu0 %v6677_v50  ;;  %5750 = vmatpush1.bf16.msra.mxu1 %v7420_v51  ;;  %v2326_v50 = vld [vmem:[#allocation12 + $0x518] sm:$0xff] }
 0x90c   : > { %5751 = vmatprep.subr.bf16.mxu1 %v7425_v55  ;;  %v2334_v51 = vld [vmem:[#allocation12 + $0x558] sm:$0xff] }
 0x90d   : > { %v6615_v15 = vcombine.high %v2326_v50, %v2334_v51  ;;  %v2342_v55 = vld [vmem:[#allocation12 + $0x598] sm:$0xff] }
 0x90e   : > { %3898 = vmatpush1.bf16.msra.mxu0 %v6676_v59  ;;  %v2350_v59 = vld [vmem:[#allocation12 + $0x5d8] sm:$0xff] }
 0x90f   : > { %3899 = vmatprep.subr.bf16.mxu0 %v6693_v62  ;;  %5752 = vmatpush1.bf16.msra.mxu1 %v7423_v63  ;;  %v6614_v62 = vcombine.low %v2326_v50, %v2334_v51  ;;  %v6631_v63 = vcombine.high %v2342_v55, %v2350_v59  ;;  %v2272_v50 = vld [vmem:[#allocation12 + $0x368] sm:$0xff]  ;;  %v2426_v51 = vrot.slane %v8672_v45, %v8462_v42 }
 0x910   : > { %5753 = vmatprep.subr.bf16.mxu1 %v7428_v2  ;;  %v6630_v2 = vcombine.low %v2342_v55, %v2350_v59  ;;  %v2430_v55 = vrot.slane %v8672_v45, %v8468_v43  ;;  %v2462_v59 = vrot.slane %v8677_v7, %v8468_v43 }
 0x912   : > { %3900 = vmatpush1.bf16.msra.mxu0 %v6692_v56  ;;  %v6647_v56 = vcombine.high %v2358_v0, %v2366_v1  ;;  %v2280_v1 = vld [vmem:[#allocation12 + $0x3a8] sm:$0xff] }
 0x913   : > { %3912 = vmatprep.subr.bf16.mxu0 %v6455_v3  ;;  %5754 = vmatpush1.bf16.msra.mxu1 %v7426_v58  ;;  %v2374_v3 = vld [vmem:[#allocation12 + $0x698] sm:$0xff] }
 0x914   : > { %5766 = vmatprep.subr.bf16.mxu1 %v7431_v8  ;;  %v2382_v58 = vld [vmem:[#allocation12 + $0x6d8] sm:$0xff] }
 0x915   : > { %3902 = vmatmul.mubr.bf16.vlgmr.msra.gmra.mrb[40].mxu0 %v8650_v53  ;;  %v6663_v54 = vcombine.high %v2374_v3, %v2382_v58  ;;  %v2390_v8 = vld [vmem:[#allocation12 + $0x718] sm:$0xff] }
 0x916   : > { %3913 = vmatpush1.bf16.msra.mxu0 %v6454_v57  ;;  %3944 = vmatprep.mubr.bf16.mxu0 %v8654_v16  ;;  %v2398_v57 = vld [vmem:[#allocation12 + $0x758] sm:$0xff] }
 0x917   : > { %3914 = vmatprep.subr.bf16.mxu0 %v6471_v14  ;;  %v6662_v14 = vcombine.low %v2374_v3, %v2382_v58  ;;  %v6679_v17 = vcombine.high %v2390_v8, %v2398_v57 }
 0x91a   : > { %3915 = vmatpush1.bf16.msra.mxu0 %v6470_v38  ;;  %v2414_v38 = vld [vmem:[#allocation12 + $0x7d8] sm:$0xff] }
 0x91b   : > { %3916 = vmatprep.subr.bf16.mxu0 %v6487_v30  ;;  %v6678_v30 = vcombine.low %v2390_v8, %v2398_v57  ;;  %v6695_v34 = vcombine.high %v2406_v18, %v2414_v38 }
 0x91e   : > { %3917 = vmatpush1.bf16.msra.mxu0 %v6486_v36  ;;  %v2176_v36 = vld [vmem:[#allocation12 + $0x68] sm:$0xff] }
 0x91f   : > { %3918 = vmatprep.subr.bf16.mxu0 %v6503_v20  ;;  %v6694_v20 = vcombine.low %v2406_v18, %v2414_v38  ;;  %v6459_v37 = vcombine.high %v2168_v19, %v2176_v36 }
 0x922   : > { %3919 = vmatpush1.bf16.msra.mxu0 %v6502_v22  ;;  %v2192_v22 = vld [vmem:[#allocation12 + $0xe8] sm:$0xff] }
 0x923   : > { %3920 = vmatprep.subr.bf16.mxu0 %v6519_v23  ;;  %v6458_v23 = vcombine.low %v2168_v19, %v2176_v36  ;;  %v6475_v26 = vcombine.high %v2184_v21, %v2192_v22 }
 0x926   : > { %3921 = vmatpush1.bf16.msra.mxu0 %v6518_v28  ;;  %v2208_v28 = vld [vmem:[#allocation12 + $0x168] sm:$0xff] }
 0x927   : > { %3922 = vmatprep.subr.bf16.mxu0 %v6535_v29  ;;  %v6474_v29 = vcombine.low %v2184_v21, %v2192_v22  ;;  %v6491_v31 = vcombine.high %v2200_v27, %v2208_v28  ;;  %v2296_v21 = vld [vmem:[#allocation12 + $0x428] sm:$0xff] }
 0x928   : > { %v2304_v22 = vld [vmem:[#allocation12 + $0x468] sm:$0xff] }
 0x92a   : > { %3923 = vmatpush1.bf16.msra.mxu0 %v6534_v33  ;;  %v2224_v33 = vld [vmem:[#allocation12 + $0x1e8] sm:$0xff] }
 0x92b   : > { %3924 = vmatprep.subr.bf16.mxu0 %v6551_v35  ;;  %v6490_v35 = vcombine.low %v2200_v27, %v2208_v28  ;;  %v6507_v40 = vcombine.high %v2216_v32, %v2224_v33 }
 0x92e   : > { %3925 = vmatpush1.bf16.msra.mxu0 %v6550_v39  ;;  %v2240_v39 = vld [vmem:[#allocation12 + $0x268] sm:$0xff] }
 0x92f   : > { %3926 = vmatprep.subr.bf16.mxu0 %v6567_v25  ;;  %v6506_v25 = vcombine.low %v2216_v32, %v2224_v33  ;;  %v6523_v6 = vcombine.high %v2232_v24, %v2240_v39 }
 0x932   : > { %3927 = vmatpush1.bf16.msra.mxu0 %v6566_v44  ;;  %v2256_v44 = vld [vmem:[#allocation12 + $0x2e8] sm:$0xff] }
 0x933   : > { %3928 = vmatprep.subr.bf16.mxu0 %v6583_v4  ;;  %v6522_v4 = vcombine.low %v2232_v24, %v2240_v39  ;;  %v6587_v24 = vcombine.high %v2296_v21, %v2304_v22 }
 0x936   : > { %3929 = vmatpush1.bf16.msra.mxu0 %v6582_v46  ;;  %v6539_v46 = vcombine.high %v2248_v10, %v2256_v44 }
 0x937   : > { %3930 = vmatprep.subr.bf16.mxu0 %v6599_v49  ;;  %v2264_v49 = vld [vmem:[#allocation12 + $0x328] sm:$0xff] }
 0x93a   : > { %3931 = vmatpush1.bf16.msra.mxu0 %v6598_v52  ;;  %v2458_v52 = vrot.slane %v8677_v7, %v8462_v42 }
 0x93b   : > { %3932 = vmatprep.subr.bf16.mxu0 %v6615_v15  ;;  %v6538_v15 = vcombine.low %v2248_v10, %v2256_v44  ;;  %v2312_v10 = vld [vmem:[#allocation12 + $0x4a8] sm:$0xff] }
 0x93c   : > { %v2320_v44 = vld [vmem:[#allocation12 + $0x4e8] sm:$0xff] }
 0x93e   : > { %3933 = vmatpush1.bf16.msra.mxu0 %v6614_v62  ;;  %v6555_v62 = vcombine.high %v2264_v49, %v2272_v50 }
 0x93f   : > { %3934 = vmatprep.subr.bf16.mxu0 %v6631_v63 }
 0x942   : > { %3935 = vmatpush1.bf16.msra.mxu0 %v6630_v2  ;;  %v2288_v2 = vld [vmem:[#allocation12 + $0x3e8] sm:$0xff] }
 0x943   : > { %3936 = vmatprep.subr.bf16.mxu0 %v6647_v56  ;;  %v6571_v19 = vcombine.high %v2280_v1, %v2288_v2 }
 0x946   : > { %3937 = vmatpush1.bf16.msra.mxu0 %v6646_v5 }
 0x947   : > { %3938 = vmatprep.subr.bf16.mxu0 %v6663_v54 }
 0x94a   : > { %3939 = vmatpush1.bf16.msra.mxu0 %v6662_v14 }
 0x94b   : > { %3940 = vmatprep.subr.bf16.mxu0 %v6679_v17  ;;  %v6554_v17 = vcombine.low %v2264_v49, %v2272_v50  ;;  %v6603_v49 = vcombine.high %v2312_v10, %v2320_v44  ;;  %v7432_v50 = vld [vmem:[#allocation13 + $0x110] ss:$8 sps:$4 sm:$0xff]  }
 0x94e   : > { %3941 = vmatpush1.bf16.msra.mxu0 %v6678_v30 }
 0x94f   : > { %3942 = vmatprep.subr.bf16.mxu0 %v6695_v34 }
 0x952   : > { %3943 = vmatpush1.bf16.msra.mxu0 %v6694_v20 }
 0x953   : > { %3998 = vmatprep.subr.bf16.mxu0 %v6459_v37  ;;  %v6570_v37 = vcombine.low %v2280_v1, %v2288_v2  ;;  %v7440_v1 = vld [vmem:[#allocation13 + $0x134] ss:$8 sps:$4 sm:$0xff]  }
 0x955   : > { %3945 = vmatmul.mubr.bf16.vlgmr.msra.gmra.mrb[44].mxu0 %v8650_v53 }
 0x956   : > { %3999 = vmatpush1.bf16.msra.mxu0 %v6458_v23  ;;  %4030 = vmatprep.mubr.bf16.mxu0 %v8654_v16 }
 0x957   : > { %4000 = vmatprep.subr.bf16.mxu0 %v6475_v26 }
 0x95a   : > { %4001 = vmatpush1.bf16.msra.mxu0 %v6474_v29 }
 0x95b   : > { %4002 = vmatprep.subr.bf16.mxu0 %v6491_v31 }
 0x95e   : > { %4003 = vmatpush1.bf16.msra.mxu0 %v6490_v35 }
 0x95f   : > { %4004 = vmatprep.subr.bf16.mxu0 %v6507_v40 }
 0x962   : > { %4005 = vmatpush1.bf16.msra.mxu0 %v6506_v25 }
 0x963   : > { %4006 = vmatprep.subr.bf16.mxu0 %v6523_v6  ;;  %v7429_v6 = vld [vmem:[#allocation13 + $0x100] ss:$8 sps:$4 sm:$0xff]  }
 0x966   : > { %4007 = vmatpush1.bf16.msra.mxu0 %v6522_v4  ;;  %v7434_v4 = vld [vmem:[#allocation13 + $0x114] ss:$8 sps:$4 sm:$0xff]  }
 0x967   : > { %4008 = vmatprep.subr.bf16.mxu0 %v6539_v46  ;;  %v6586_v46 = vcombine.low %v2296_v21, %v2304_v22 }
 0x968   : > { %v3817_v63 = vpop.f32.mrb[32].mxu0  ;;  %v3989_v0 = vpop.f32.mrb[16].mxu1 }
 0x969   : > { %v3818_v56 = vadd.f32 %v3817_v63, %v2426_v51  ;;  %v3990_v3 = vadd.f32 %v3989_v0, %v2458_v52  ;;  %v3819_v58 = vpop.f32.mrb[33].mxu0  ;;  %v3991_v5 = vpop.f32.mrb[17].mxu1  ;;  %v2344_v63 = vld [vmem:[#allocation12 + $0x5a8] sm:$0xff] }
 0x96a   : > { %v3820_v54 = vadd.f32 %v3819_v58, %v2430_v55  ;;  %v3992_v8 = vadd.f32 %v3991_v5, %v2462_v59  ;;  %4009 = vmatpush1.bf16.msra.mxu0 %v6538_v15  ;;  %v3821_v57 = vpop.f32.mrb[34].mxu0  ;;  %v3993_v14 = vpop.f32.mrb[18].mxu1  ;;  %v7437_v15 = vld [vmem:[#allocation13 + $0x124] ss:$8 sps:$4 sm:$0xff]  }
 0x96b   : > { %v3822_v18 = vadd.f32 %v3821_v57, %v2426_v51  ;;  %v3994_v38 = vadd.f32 %v3993_v14, %v2458_v52  ;;  %v3823_v30 = vpop.f32.mrb[35].mxu0  ;;  %v3995_v34 = vpop.f32.mrb[19].mxu1  ;;  %4010 = vmatprep.subr.bf16.mxu0 %v6555_v62  ;;  %v4127_v23 = vmax.f32 %v3818_v56, 0.0  ;;  %v4135_v26 = vmax.f32 %v3990_v3, 0.0  ;;  %v2328_v51 = vld [vmem:[#allocation12 + $0x528] sm:$0xff] }
 0x96c   : > { %v3824_v36 = vadd.f32 %v3823_v30, %v2430_v55  ;;  %v3996_v20 = vadd.f32 %v3995_v34, %v2462_v59  ;;  %v4128_v29 = vmax.f32 %v3820_v54, 0.0  ;;  %v4136_v31 = vmax.f32 %v3992_v8, 0.0  ;;  %v2336_v52 = vld [vmem:[#allocation12 + $0x568] sm:$0xff]  ;;  %v7438_v3 = vld [vmem:[#allocation13 + $0x130] ss:$8 sps:$4 sm:$0xff]  }
 0x96d   : > { %v4143_v27 = vmax.f32 %v3822_v18, 0.0  ;;  %v4151_v28 = vmax.f32 %v3994_v38, 0.0  ;;  %v6602_v55 = vcombine.low %v2312_v10, %v2320_v44  ;;  %v6619_v59 = vcombine.high %v2328_v51, %v2336_v52  ;;  %v7435_v62 = vld [vmem:[#allocation13 + $0x120] ss:$8 sps:$4 sm:$0xff]   ;;  %v7443_v54 = vld [vmem:[#allocation13 + $0x144] ss:$8 sps:$4 sm:$0xff]  }
 0x96e   : > { %v4144_v32 = vmax.f32 %v3824_v36, 0.0  ;;  %v4152_v33 = vmax.f32 %v3996_v20, 0.0  ;;  %4011 = vmatpush1.bf16.msra.mxu0 %v6554_v17  ;;  %v2352_v0 = vld [vmem:[#allocation12 + $0x5e8] sm:$0xff]  ;;  %v6618_v2 = vcombine.low %v2328_v51, %v2336_v52  ;;  %v7446_v38 = vld [vmem:[#allocation13 + $0x154] ss:$8 sps:$4 sm:$0xff]  }
 0x96f   : > { %v4159_v35 = vpack.c.bf16 %v4143_v27, %v4127_v23  ;;  %v8687_v40 = vpack.c.bf16 %v4151_v28, %v4135_v26  ;;  %4012 = vmatprep.subr.bf16.mxu0 %v6571_v19  ;;  %v6635_v56 = vcombine.high %v2344_v63, %v2352_v0  ;;  %v2360_v58 = vld [vmem:[#allocation12 + $0x628] sm:$0xff]  ;;  %v6634_v8 = vcombine.low %v2344_v63, %v2352_v0  ;;  %v7444_v19 = vld [vmem:[#allocation13 + $0x150] ss:$8 sps:$4 sm:$0xff]   ;;  %v7452_v28 = vld [vmem:[#allocation13 + $0x174] ss:$8 sps:$4 sm:$0xff]  }
 0x970   : > { %v4160_v39 = vpack.c.bf16 %v4144_v32, %v4128_v29  ;;  %v8689_v25 = vpack.c.bf16 %v4152_v33, %v4136_v31  ;;  %v2368_v5 = vld [vmem:[#allocation12 + $0x668] sm:$0xff]  ;;  %v7450_v32 = vld [vmem:[#allocation13 + $0x170] ss:$8 sps:$4 sm:$0xff]  }
 0x971   : > { %v6651_v57 = vcombine.high %v2360_v58, %v2368_v5  ;;  %v7441_v14 = vld [vmem:[#allocation13 + $0x140] ss:$8 sps:$4 sm:$0xff]   ;;  %v6650_v30 = vcombine.low %v2360_v58, %v2368_v5  ;;  %v2170_v33 = vld [vmem:[#allocation12 + $0x38] sm:$0xff] }
 0x972   : > { %4013 = vmatpush1.bf16.msra.mxu0 %v6570_v37  ;;  %5755 = vmatprep.mubr.bf16.mxu1 %v4160_v39  ;;  %v2376_v17 = vld [vmem:[#allocation12 + $0x6a8] sm:$0xff]  ;;  %v2186_v44 = vld [vmem:[#allocation12 + $0xb8] sm:$0xff] }
 0x973   : > { %5756 = vmatmul.mubr.bf16.vlgmr.msra.gmra.mrb[24].mxu1 %v4159_v35  ;;  %4014 = vmatprep.subr.bf16.mxu0 %v6587_v24  ;;  %v2384_v18 = vld [vmem:[#allocation12 + $0x6e8] sm:$0xff]  ;;  %v2178_v35 = vld [vmem:[#allocation12 + $0x78] sm:$0xff] }
 0x974   : > { %5767 = vmatpush1.bf16.msra.mxu1 %v7429_v6  ;;  %v6667_v34 = vcombine.high %v2376_v17, %v2384_v18  ;;  %v2392_v36 = vld [vmem:[#allocation12 + $0x728] sm:$0xff]  ;;  %v6666_v21 = vcombine.low %v2376_v17, %v2384_v18  ;;  %v6463_v6 = vcombine.high %v2170_v33, %v2178_v35  ;;  %v7456_v51 = vld [vmem:[#allocation13 + $0x190] ss:$8 sps:$4 sm:$0xff]  }
 0x975   : > { %5768 = vmatprep.subr.bf16.mxu1 %v7434_v4  ;;  %v2400_v20 = vld [vmem:[#allocation12 + $0x768] sm:$0xff]  ;;  %v2194_v4 = vld [vmem:[#allocation12 + $0xf8] sm:$0xff] }
 0x976   : > { %4015 = vmatpush1.bf16.msra.mxu0 %v6586_v46  ;;  %v7449_v37 = vld [vmem:[#allocation13 + $0x164] ss:$8 sps:$4 sm:$0xff]   ;;  %v6683_v22 = vcombine.high %v2392_v36, %v2400_v20  ;;  %v7447_v23 = vld [vmem:[#allocation13 + $0x160] ss:$8 sps:$4 sm:$0xff]   ;;  %v6682_v29 = vcombine.low %v2392_v36, %v2400_v20  ;;  %v7458_v46 = vld [vmem:[#allocation13 + $0x194] ss:$8 sps:$4 sm:$0xff]  }
 0x977   : > { %4016 = vmatprep.subr.bf16.mxu0 %v6603_v49  ;;  %v2408_v26 = vld [vmem:[#allocation12 + $0x7a8] sm:$0xff]  ;;  %v6462_v49 = vcombine.low %v2170_v33, %v2178_v35  ;;  %v2202_v52 = vld [vmem:[#allocation12 + $0x138] sm:$0xff] }
 0x978   : > { %5769 = vmatpush1.bf16.msra.mxu1 %v7432_v50  ;;  %v2416_v27 = vld [vmem:[#allocation12 + $0x7e8] sm:$0xff]  ;;  %v6479_v50 = vcombine.high %v2186_v44, %v2194_v4  ;;  %v2218_v0 = vld [vmem:[#allocation12 + $0x1b8] sm:$0xff] }
 0x979   : > { %5770 = vmatprep.subr.bf16.mxu1 %v7437_v15  ;;  %v6699_v31 = vcombine.high %v2408_v26, %v2416_v27  ;;  %v7455_v24 = vld [vmem:[#allocation13 + $0x184] ss:$8 sps:$4 sm:$0xff]   ;;  %v6698_v39 = vcombine.low %v2408_v26, %v2416_v27  ;;  %v7453_v10 = vld [vmem:[#allocation13 + $0x180] ss:$8 sps:$4 sm:$0xff]   ;;  %v2210_v15 = vld [vmem:[#allocation12 + $0x178] sm:$0xff]  ;;  %v2478_v26 = vrot.slane %v8677_v7, %v8497_v13 }
 0x97a   : > { %4017 = vmatpush1.bf16.msra.mxu0 %v6602_v55  ;;  %v7461_v55 = vld [vmem:[#allocation13 + $0x1a4] ss:$8 sps:$4 sm:$0xff]   ;;  %v7459_v63 = vld [vmem:[#allocation13 + $0x1a0] ss:$8 sps:$4 sm:$0xff]   ;;  %v7462_v58 = vld [vmem:[#allocation13 + $0x1b0] ss:$8 sps:$4 sm:$0xff]  }
 0x97b   : > { %4018 = vmatprep.subr.bf16.mxu0 %v6619_v59  ;;  %v6478_v59 = vcombine.low %v2186_v44, %v2194_v4  ;;  %v2234_v5 = vld [vmem:[#allocation12 + $0x238] sm:$0xff] }
 0x97c   : > { %5771 = vmatpush1.bf16.msra.mxu1 %v7435_v62  ;;  %v6495_v62 = vcombine.high %v2202_v52, %v2210_v15  ;;  %v2250_v17 = vld [vmem:[#allocation12 + $0x2b8] sm:$0xff] }
 0x97d   : > { %5772 = vmatprep.subr.bf16.mxu1 %v7440_v1  ;;  %v2226_v1 = vld [vmem:[#allocation12 + $0x1f8] sm:$0xff] }
 0x97e   : > { %4019 = vmatpush1.bf16.msra.mxu0 %v6618_v2  ;;  %v7464_v2 = vld [vmem:[#allocation13 + $0x1b4] ss:$8 sps:$4 sm:$0xff]  }
 0x97f   : > { %4020 = vmatprep.subr.bf16.mxu0 %v6635_v56  ;;  %v6494_v56 = vcombine.low %v2202_v52, %v2210_v15  ;;  %v2258_v18 = vld [vmem:[#allocation12 + $0x2f8] sm:$0xff] }
 0x980   : > { %5773 = vmatpush1.bf16.msra.mxu1 %v7438_v3  ;;  %v6511_v3 = vcombine.high %v2218_v0, %v2226_v1  ;;  %v2266_v36 = vld [vmem:[#allocation12 + $0x338] sm:$0xff]  ;;  %v6542_v27 = vcombine.low %v2250_v17, %v2258_v18 }
 0x981   : > { %5774 = vmatprep.subr.bf16.mxu1 %v7443_v54  ;;  %v2242_v54 = vld [vmem:[#allocation12 + $0x278] sm:$0xff] }
 0x982   : > { %4021 = vmatpush1.bf16.msra.mxu0 %v6634_v8  ;;  %v7467_v8 = vld [vmem:[#allocation13 + $0x1c4] ss:$8 sps:$4 sm:$0xff]   ;;  %v2274_v20 = vld [vmem:[#allocation12 + $0x378] sm:$0xff] }
 0x983   : > { %4022 = vmatprep.subr.bf16.mxu0 %v6651_v57  ;;  %v6527_v57 = vcombine.high %v2234_v5, %v2242_v54  ;;  %v2282_v33 = vld [vmem:[#allocation12 + $0x3b8] sm:$0xff] }
 0x984   : > { %5775 = vmatpush1.bf16.msra.mxu1 %v7441_v14  ;;  %v7465_v14 = vld [vmem:[#allocation13 + $0x1c0] ss:$8 sps:$4 sm:$0xff]   ;;  %v2290_v35 = vld [vmem:[#allocation12 + $0x3f8] sm:$0xff] }
 0x985   : > { %5776 = vmatprep.subr.bf16.mxu1 %v7446_v38  ;;  %v7470_v38 = vld [vmem:[#allocation13 + $0x1d4] ss:$8 sps:$4 sm:$0xff]  }
 0x986   : > { %4023 = vmatpush1.bf16.msra.mxu0 %v6650_v30  ;;  %v6526_v30 = vcombine.low %v2234_v5, %v2242_v54  ;;  %v7476_v44 = vld [vmem:[#allocation13 + $0x1f4] ss:$8 sps:$4 sm:$0xff]  }
 0x987   : > { %4024 = vmatprep.subr.bf16.mxu0 %v6667_v34  ;;  %v6543_v34 = vcombine.high %v2250_v17, %v2258_v18 }
 0x988   : > { %5777 = vmatpush1.bf16.msra.mxu1 %v7444_v19  ;;  %v7468_v19 = vld [vmem:[#allocation13 + $0x1d0] ss:$8 sps:$4 sm:$0xff]  }
 0x989   : > { %5778 = vmatprep.subr.bf16.mxu1 %v7449_v37  ;;  %v2434_v37 = vrot.slane %v8672_v45, %v8475_v60 }
 0x98a   : > { %4025 = vmatpush1.bf16.msra.mxu0 %v6666_v21  ;;  %v2474_v21 = vrot.slane %v8677_v7, %v8494_v12  ;;  %v6558_v7 = vcombine.low %v2266_v36, %v2274_v20 }
 0x98b   : > { %4026 = vmatprep.subr.bf16.mxu0 %v6683_v22  ;;  %v7473_v22 = vld [vmem:[#allocation13 + $0x1e4] ss:$8 sps:$4 sm:$0xff]  }
 0x98c   : > { %5779 = vmatpush1.bf16.msra.mxu1 %v7447_v23  ;;  %v2438_v23 = vrot.slane %v8672_v45, %v8478_v61 }
 0x98d   : > { %5780 = vmatprep.subr.bf16.mxu1 %v7452_v28  ;;  %v6559_v28 = vcombine.high %v2266_v36, %v2274_v20  ;;  %v7477_v36 = vld [vmem:[#allocation13 + $0x200] ss:$8 sps:$4 sm:$0xff]   ;;  %v2314_v20 = vld [vmem:[#allocation12 + $0x4b8] sm:$0xff] }
 0x98e   : > { %4027 = vmatpush1.bf16.msra.mxu0 %v6682_v29 }
 0x98f   : > { %4028 = vmatprep.subr.bf16.mxu0 %v6699_v31 }
 0x990   : > { %5781 = vmatpush1.bf16.msra.mxu1 %v7450_v32  ;;  %v7471_v32 = vld [vmem:[#allocation13 + $0x1e0] ss:$8 sps:$4 sm:$0xff]  }
 0x991   : > { %5782 = vmatprep.subr.bf16.mxu1 %v7455_v24 }
 0x992   : > { %4029 = vmatpush1.bf16.msra.mxu0 %v6698_v39 }
 0x993   : > { %4084 = vmatprep.subr.bf16.mxu0 %v6463_v6 }
 0x994   : > { %5783 = vmatpush1.bf16.msra.mxu1 %v7453_v10 }
 0x995   : > { %4031 = vmatmul.mubr.bf16.vlgmr.msra.gmra.mrb[48].mxu0 %v8650_v53  ;;  %5784 = vmatprep.subr.bf16.mxu1 %v7458_v46 }
 0x996   : > { %4085 = vmatpush1.bf16.msra.mxu0 %v6462_v49  ;;  %4116 = vmatprep.mubr.bf16.mxu0 %v8654_v16  ;;  %v6510_v16 = vcombine.low %v2218_v0, %v2226_v1  ;;  %v7474_v0 = vld [vmem:[#allocation13 + $0x1f0] ss:$8 sps:$4 sm:$0xff]   ;;  %v6574_v1 = vcombine.low %v2282_v33, %v2290_v35 }
 0x997   : > { %4086 = vmatprep.subr.bf16.mxu0 %v6479_v50 }
 0x998   : > { %5785 = vmatpush1.bf16.msra.mxu1 %v7456_v51 }
 0x999   : > { %5786 = vmatprep.subr.bf16.mxu1 %v7461_v55 }
 0x99a   : > { %4087 = vmatpush1.bf16.msra.mxu0 %v6478_v59  ;;  %v6575_v59 = vcombine.high %v2282_v33, %v2290_v35  ;;  %v7483_v33 = vld [vmem:[#allocation13 + $0x220] ss:$8 sps:$4 sm:$0xff]   ;;  %v2346_v35 = vld [vmem:[#allocation12 + $0x5b8] sm:$0xff] }
 0x99b   : > { %4088 = vmatprep.subr.bf16.mxu0 %v6495_v62 }
 0x99c   : > { %5787 = vmatpush1.bf16.msra.mxu1 %v7459_v63 }
 0x99d   : > { %5788 = vmatprep.subr.bf16.mxu1 %v7464_v2  ;;  %v2298_v2 = vld [vmem:[#allocation12 + $0x438] sm:$0xff] }
 0x99e   : > { %4089 = vmatpush1.bf16.msra.mxu0 %v6494_v56  ;;  %v2306_v56 = vld [vmem:[#allocation12 + $0x478] sm:$0xff] }
 0x99f   : > { %4090 = vmatprep.subr.bf16.mxu0 %v6511_v3 }
 0x9a0   : > { %5789 = vmatpush1.bf16.msra.mxu1 %v7462_v58 }
 0x9a1   : > { %5790 = vmatprep.subr.bf16.mxu1 %v7467_v8  ;;  %v7479_v8 = vld [vmem:[#allocation13 + $0x204] ss:$8 sps:$4 sm:$0xff]  }
 0x9a2   : > { %4091 = vmatpush1.bf16.msra.mxu0 %v6510_v16 }
 0x9a3   : > { %4092 = vmatprep.subr.bf16.mxu0 %v6527_v57 }
 0x9a4   : > { %5791 = vmatpush1.bf16.msra.mxu1 %v7465_v14 }
 0x9a5   : > { %5792 = vmatprep.subr.bf16.mxu1 %v7470_v38 }
 0x9a6   : > { %4093 = vmatpush1.bf16.msra.mxu0 %v6526_v30  ;;  %v6591_v30 = vcombine.high %v2298_v2, %v2306_v56 }
 0x9a7   : > { %4094 = vmatprep.subr.bf16.mxu0 %v6543_v34 }
 0x9a8   : > { %v3860_v29 = vpop.f32.mrb[36].mxu0  ;;  %v4075_v31 = vpop.f32.mrb[20].mxu1  ;;  %5793 = vmatpush1.bf16.msra.mxu1 %v7468_v19 }
 0x9a9   : > { %v3861_v24 = vadd.f32 %v3860_v29, %v2434_v37  ;;  %v4076_v39 = vadd.f32 %v4075_v31, %v2474_v21  ;;  %v3862_v6 = vpop.f32.mrb[37].mxu0  ;;  %v4077_v10 = vpop.f32.mrb[21].mxu1  ;;  %5794 = vmatprep.subr.bf16.mxu1 %v7473_v22  ;;  %v6590_v22 = vcombine.low %v2298_v2, %v2306_v56  ;;  %v7485_v29 = vld [vmem:[#allocation13 + $0x224] ss:$8 sps:$4 sm:$0xff]  }
 0x9aa   : > { %v3863_v4 = vadd.f32 %v3862_v6, %v2438_v23  ;;  %v4078_v46 = vadd.f32 %v4077_v10, %v2478_v26  ;;  %v3864_v49 = vpop.f32.mrb[38].mxu0  ;;  %v4079_v50 = vpop.f32.mrb[22].mxu1  ;;  %4095 = vmatpush1.bf16.msra.mxu0 %v6542_v27  ;;  %v2330_v27 = vld [vmem:[#allocation12 + $0x538] sm:$0xff]  ;;  %v7497_v2 = vld [vmem:[#allocation13 + $0x264] ss:$8 sps:$4 sm:$0xff]  }
 0x9ab   : > { %v3865_v51 = vadd.f32 %v3864_v49, %v2434_v37  ;;  %v4080_v52 = vadd.f32 %v4079_v50, %v2474_v21  ;;  %v3866_v15 = vpop.f32.mrb[39].mxu0  ;;  %v4081_v55 = vpop.f32.mrb[23].mxu1  ;;  %4096 = vmatprep.subr.bf16.mxu0 %v6559_v28  ;;  %v4129_v3 = vmax.f32 %v3861_v24, 0.0  ;;  %v4139_v58 = vmax.f32 %v4076_v39, 0.0  ;;  %v2322_v37 = vld [vmem:[#allocation12 + $0x4f8] sm:$0xff] }
 0x9ac   : > { %v3867_v62 = vadd.f32 %v3866_v15, %v2438_v23  ;;  %v4082_v63 = vadd.f32 %v4081_v55, %v2478_v26  ;;  %5795 = vmatpush1.bf16.msra.mxu1 %v7471_v32  ;;  %v4130_v16 = vmax.f32 %v3863_v4, 0.0  ;;  %v4140_v57 = vmax.f32 %v4078_v46, 0.0  ;;  %v7482_v21 = vld [vmem:[#allocation13 + $0x214] ss:$8 sps:$4 sm:$0xff]   ;;  %v7480_v26 = vld [vmem:[#allocation13 + $0x210] ss:$8 sps:$4 sm:$0xff]  }
 0x9ad   : > { %v4145_v5 = vmax.f32 %v3865_v51, 0.0  ;;  %v4155_v54 = vmax.f32 %v4080_v52, 0.0  ;;  %5796 = vmatprep.subr.bf16.mxu1 %v7476_v44  ;;  %v6607_v23 = vcombine.high %v2314_v20, %v2322_v37  ;;  %v2338_v28 = vld [vmem:[#allocation12 + $0x578] sm:$0xff]  ;;  %v6606_v31 = vcombine.low %v2314_v20, %v2322_v37  ;;  %v7491_v49 = vld [vmem:[#allocation13 + $0x244] ss:$8 sps:$4 sm:$0xff]  }
 0x9ae   : > { %v4146_v14 = vmax.f32 %v3867_v62, 0.0  ;;  %v4156_v17 = vmax.f32 %v4082_v63, 0.0  ;;  %4097 = vmatpush1.bf16.msra.mxu0 %v6558_v7  ;;  %v6623_v32 = vcombine.high %v2330_v27, %v2338_v28  ;;  %v2354_v24 = vld [vmem:[#allocation12 + $0x5f8] sm:$0xff]  ;;  %v6622_v6 = vcombine.low %v2330_v27, %v2338_v28  ;;  %v7489_v51 = vld [vmem:[#allocation13 + $0x240] ss:$8 sps:$4 sm:$0xff]  }
 0x9af   : > { %v4161_v18 = vpack.c.bf16 %v4145_v5, %v4129_v3  ;;  %v8701_v38 = vpack.c.bf16 %v4155_v54, %v4139_v58  ;;  %4098 = vmatprep.subr.bf16.mxu0 %v6575_v59  ;;  %v7488_v39 = vld [vmem:[#allocation13 + $0x234] ss:$8 sps:$4 sm:$0xff]   ;;  %v6639_v10 = vcombine.high %v2346_v35, %v2354_v24  ;;  %v7486_v44 = vld [vmem:[#allocation13 + $0x230] ss:$8 sps:$4 sm:$0xff]   ;;  %v6638_v50 = vcombine.low %v2346_v35, %v2354_v24  ;;  %v7495_v58 = vld [vmem:[#allocation13 + $0x260] ss:$8 sps:$4 sm:$0xff]  }
 0x9b0   : > { %v4162_v34 = vpack.c.bf16 %v4146_v14, %v4130_v16  ;;  %v8703_v19 = vpack.c.bf16 %v4156_v17, %v4140_v57  ;;  %5797 = vmatpush1.bf16.msra.mxu1 %v7474_v0  ;;  %v2362_v4 = vld [vmem:[#allocation12 + $0x638] sm:$0xff]  ;;  %v7503_v17 = vld [vmem:[#allocation13 + $0x284] ss:$8 sps:$4 sm:$0xff]   ;;  %v7507_v37 = vld [vmem:[#allocation13 + $0x2a0] ss:$8 sps:$4 sm:$0xff]  }
 0x9b1   : > { %5809 = vmatprep.subr.bf16.mxu1 %v7479_v8  ;;  %v2370_v46 = vld [vmem:[#allocation12 + $0x678] sm:$0xff]  ;;  %v7509_v20 = vld [vmem:[#allocation13 + $0x2a4] ss:$8 sps:$4 sm:$0xff]  }
 0x9b2   : > { %4099 = vmatpush1.bf16.msra.mxu0 %v6574_v1  ;;  %5798 = vmatprep.mubr.bf16.mxu1 %v4162_v34  ;;  %v6655_v7 = vcombine.high %v2362_v4, %v2370_v46  ;;  %v2378_v52 = vld [vmem:[#allocation12 + $0x6b8] sm:$0xff]  ;;  %v6654_v59 = vcombine.low %v2362_v4, %v2370_v46 }
 0x9b3   : > { %5799 = vmatmul.mubr.bf16.vlgmr.msra.gmra.mrb[24].mxu1 %v4161_v18  ;;  %4100 = vmatprep.subr.bf16.mxu0 %v6591_v30  ;;  %v2386_v15 = vld [vmem:[#allocation12 + $0x6f8] sm:$0xff]  ;;  %v7501_v30 = vld [vmem:[#allocation13 + $0x280] ss:$8 sps:$4 sm:$0xff]  }
 0x9b4   : > { %5810 = vmatpush1.bf16.msra.mxu1 %v7477_v36  ;;  %v7494_v55 = vld [vmem:[#allocation13 + $0x254] ss:$8 sps:$4 sm:$0xff]   ;;  %v6671_v62 = vcombine.high %v2378_v52, %v2386_v15  ;;  %v7492_v63 = vld [vmem:[#allocation13 + $0x250] ss:$8 sps:$4 sm:$0xff]   ;;  %v6670_v56 = vcombine.low %v2378_v52, %v2386_v15 }
 0x9b5   : > { %5811 = vmatprep.subr.bf16.mxu1 %v7482_v21  ;;  %v2394_v0 = vld [vmem:[#allocation12 + $0x738] sm:$0xff] }
 0x9b6   : > { %4101 = vmatpush1.bf16.msra.mxu0 %v6590_v22  ;;  %v2402_v1 = vld [vmem:[#allocation12 + $0x778] sm:$0xff] }
 0x9b7   : > { %4102 = vmatprep.subr.bf16.mxu0 %v6607_v23  ;;  %v6687_v3 = vcombine.high %v2394_v0, %v2402_v1  ;;  %v2410_v5 = vld [vmem:[#allocation12 + $0x7b8] sm:$0xff]  ;;  %v6686_v16 = vcombine.low %v2394_v0, %v2402_v1  ;;  %v7515_v23 = vld [vmem:[#allocation13 + $0x2c4] ss:$8 sps:$4 sm:$0xff]   ;;  %v7531_v0 = vld [vmem:[#allocation13 + $0x320] ss:$8 sps:$4 sm:$0xff]  }
 0x9b8   : > { %5812 = vmatpush1.bf16.msra.mxu1 %v7480_v26  ;;  %v2418_v54 = vld [vmem:[#allocation12 + $0x7f8] sm:$0xff]  ;;  %v7513_v26 = vld [vmem:[#allocation13 + $0x2c0] ss:$8 sps:$4 sm:$0xff]  }
 0x9b9   : > { %5813 = vmatprep.subr.bf16.mxu1 %v7485_v29  ;;  %v7500_v8 = vld [vmem:[#allocation13 + $0x274] ss:$8 sps:$4 sm:$0xff]   ;;  %v6703_v57 = vcombine.high %v2410_v5, %v2418_v54  ;;  %v7498_v14 = vld [vmem:[#allocation13 + $0x270] ss:$8 sps:$4 sm:$0xff]   ;;  %v6702_v18 = vcombine.low %v2410_v5, %v2418_v54  ;;  %v7521_v29 = vld [vmem:[#allocation13 + $0x2e4] ss:$8 sps:$4 sm:$0xff]  }
 0x9ba   : > { %4103 = vmatpush1.bf16.msra.mxu0 %v6606_v31  ;;  %v7506_v34 = vld [vmem:[#allocation13 + $0x294] ss:$8 sps:$4 sm:$0xff]   ;;  %v7504_v36 = vld [vmem:[#allocation13 + $0x290] ss:$8 sps:$4 sm:$0xff]   ;;  %v2446_v31 = vrot.slane %v8672_v45, %v8497_v13  ;;  %v7545_v54 = vld [vmem:[#allocation13 + $0x364] ss:$8 sps:$4 sm:$0xff]  }
 0x9bb   : > { %4104 = vmatprep.subr.bf16.mxu0 %v6623_v32  ;;  %v7512_v21 = vld [vmem:[#allocation13 + $0x2b4] ss:$8 sps:$4 sm:$0xff]   ;;  %v7510_v22 = vld [vmem:[#allocation13 + $0x2b0] ss:$8 sps:$4 sm:$0xff]  }
 0x9bc   : > { %5814 = vmatpush1.bf16.msra.mxu1 %v7483_v33  ;;  %v7518_v27 = vld [vmem:[#allocation13 + $0x2d4] ss:$8 sps:$4 sm:$0xff]   ;;  %v7516_v28 = vld [vmem:[#allocation13 + $0x2d0] ss:$8 sps:$4 sm:$0xff]   ;;  %v7519_v33 = vld [vmem:[#allocation13 + $0x2e0] ss:$8 sps:$4 sm:$0xff]  }
 0x9bd   : > { %5815 = vmatprep.subr.bf16.mxu1 %v7488_v39  ;;  %v7524_v39 = vld [vmem:[#allocation13 + $0x2f4] ss:$8 sps:$4 sm:$0xff]   ;;  %v7540_v5 = vld [vmem:[#allocation13 + $0x350] ss:$8 sps:$4 sm:$0xff]  }
 0x9be   : > { %4105 = vmatpush1.bf16.msra.mxu0 %v6622_v6  ;;  %v7536_v1 = vld [vmem:[#allocation13 + $0x334] ss:$8 sps:$4 sm:$0xff]  }
 0x9bf   : > { %4106 = vmatprep.subr.bf16.mxu0 %v6639_v10 }
 0x9c0   : > { %5816 = vmatpush1.bf16.msra.mxu1 %v7486_v44 }
 0x9c1   : > { %5817 = vmatprep.subr.bf16.mxu1 %v7491_v49  ;;  %v7522_v49 = vld [vmem:[#allocation13 + $0x2f0] ss:$8 sps:$4 sm:$0xff]  }
 0x9c2   : > { %4107 = vmatpush1.bf16.msra.mxu0 %v6638_v50 }
 0x9c3   : > { %4108 = vmatprep.subr.bf16.mxu0 %v6655_v7  ;;  %v7527_v7 = vld [vmem:[#allocation13 + $0x304] ss:$8 sps:$4 sm:$0xff]  }
 0x9c4   : > { %5818 = vmatpush1.bf16.msra.mxu1 %v7489_v51 }
 0x9c5   : > { %5819 = vmatprep.subr.bf16.mxu1 %v7494_v55  ;;  %v7525_v55 = vld [vmem:[#allocation13 + $0x300] ss:$8 sps:$4 sm:$0xff]  }
 0x9c6   : > { %4109 = vmatpush1.bf16.msra.mxu0 %v6654_v59  ;;  %v7530_v59 = vld [vmem:[#allocation13 + $0x314] ss:$8 sps:$4 sm:$0xff]  }
 0x9c7   : > { %4110 = vmatprep.subr.bf16.mxu0 %v6671_v62  ;;  %v7528_v62 = vld [vmem:[#allocation13 + $0x310] ss:$8 sps:$4 sm:$0xff]  }
 0x9c8   : > { %5820 = vmatpush1.bf16.msra.mxu1 %v7492_v63  ;;  %v7533_v63 = vld [vmem:[#allocation13 + $0x324] ss:$8 sps:$4 sm:$0xff]  }
 0x9c9   : > { %5821 = vmatprep.subr.bf16.mxu1 %v7497_v2  ;;  %v7534_v2 = vld [vmem:[#allocation13 + $0x330] ss:$8 sps:$4 sm:$0xff]  }
 0x9ca   : > { %4111 = vmatpush1.bf16.msra.mxu0 %v6670_v56  ;;  %v7539_v56 = vld [vmem:[#allocation13 + $0x344] ss:$8 sps:$4 sm:$0xff]  }
 0x9cb   : > { %4112 = vmatprep.subr.bf16.mxu0 %v6687_v3  ;;  %v7537_v3 = vld [vmem:[#allocation13 + $0x340] ss:$8 sps:$4 sm:$0xff]  }
 0x9cc   : > { %5822 = vmatpush1.bf16.msra.mxu1 %v7495_v58  ;;  %v7542_v58 = vld [vmem:[#allocation13 + $0x354] ss:$8 sps:$4 sm:$0xff]  }
 0x9cd   : > { %5823 = vmatprep.subr.bf16.mxu1 %v7500_v8  ;;  %v7543_v8 = vld [vmem:[#allocation13 + $0x360] ss:$8 sps:$4 sm:$0xff]  }
 0x9ce   : > { %4113 = vmatpush1.bf16.msra.mxu0 %v6686_v16  ;;  %v7548_v16 = vld [vmem:[#allocation13 + $0x374] ss:$8 sps:$4 sm:$0xff]  }
 0x9cf   : > { %4114 = vmatprep.subr.bf16.mxu0 %v6703_v57  ;;  %v7546_v57 = vld [vmem:[#allocation13 + $0x370] ss:$8 sps:$4 sm:$0xff]  }
 0x9d0   : > { %5824 = vmatpush1.bf16.msra.mxu1 %v7498_v14  ;;  %v7551_v14 = vld [vmem:[#allocation13 + $0x384] ss:$8 sps:$4 sm:$0xff]  }
 0x9d1   : > { %5825 = vmatprep.subr.bf16.mxu1 %v7503_v17  ;;  %v7549_v17 = vld [vmem:[#allocation13 + $0x380] ss:$8 sps:$4 sm:$0xff]  }
 0x9d2   : > { %4115 = vmatpush1.bf16.msra.mxu0 %v6702_v18  ;;  %v7554_v18 = vld [vmem:[#allocation13 + $0x394] ss:$8 sps:$4 sm:$0xff]  }
 0x9d4   : > { %5826 = vmatpush1.bf16.msra.mxu1 %v7501_v30  ;;  %v7552_v30 = vld [vmem:[#allocation13 + $0x390] ss:$8 sps:$4 sm:$0xff]  }
 0x9d5   : > { %4117 = vmatmul.mubr.bf16.vlgmr.msra.gmra.mrb[52].mxu0 %v8650_v53  ;;  %5827 = vmatprep.subr.bf16.mxu1 %v7506_v34  ;;  %v2442_v53 = vrot.slane %v8672_v45, %v8494_v12  ;;  %v7557_v34 = vld [vmem:[#allocation13 + $0x3a4] ss:$8 sps:$4 sm:$0xff]  }
 0x9d8   : > { %5828 = vmatpush1.bf16.msra.mxu1 %v7504_v36  ;;  %v7555_v36 = vld [vmem:[#allocation13 + $0x3a0] ss:$8 sps:$4 sm:$0xff]  }
 0x9d9   : > { %5829 = vmatprep.subr.bf16.mxu1 %v7509_v20  ;;  %v7560_v20 = vld [vmem:[#allocation13 + $0x3b4] ss:$8 sps:$4 sm:$0xff]  }
 0x9dc   : > { %5830 = vmatpush1.bf16.msra.mxu1 %v7507_v37  ;;  %v7558_v37 = vld [vmem:[#allocation13 + $0x3b0] ss:$8 sps:$4 sm:$0xff]  }
 0x9dd   : > { %5831 = vmatprep.subr.bf16.mxu1 %v7512_v21  ;;  %v7563_v21 = vld [vmem:[#allocation13 + $0x3c4] ss:$8 sps:$4 sm:$0xff]  }
 0x9e0   : > { %5832 = vmatpush1.bf16.msra.mxu1 %v7510_v22  ;;  %v7561_v22 = vld [vmem:[#allocation13 + $0x3c0] ss:$8 sps:$4 sm:$0xff]  }
 0x9e1   : > { %5833 = vmatprep.subr.bf16.mxu1 %v7515_v23  ;;  %v7566_v23 = vld [vmem:[#allocation13 + $0x3d4] ss:$8 sps:$4 sm:$0xff]  }
 0x9e4   : > { %5834 = vmatpush1.bf16.msra.mxu1 %v7513_v26  ;;  %v2449_v26 = vsub.s32 6, %v8459_v41 }
 0x9e5   : > { %5835 = vmatprep.subr.bf16.mxu1 %v7518_v27  ;;  %v2453_v27 = vsub.s32 7, %v8459_v41  ;;  %v7671_v41 = vld [vmem:[#allocation13 + $0x604] ss:$8 sps:$4 sm:$0xff]  }
 0x9e8   : > { %v3903_v32 = vpop.f32.mrb[40].mxu0  ;;  %5836 = vmatpush1.bf16.msra.mxu1 %v7516_v28  ;;  %v7564_v28 = vld [vmem:[#allocation13 + $0x3d0] ss:$8 sps:$4 sm:$0xff]  }
 0x9e9   : > { %v3904_v35 = vadd.f32 %v3903_v32, %v2442_v53  ;;  %v3905_v24 = vpop.f32.mrb[41].mxu0  ;;  %5837 = vmatprep.subr.bf16.mxu1 %v7521_v29  ;;  %v7569_v29 = vld [vmem:[#allocation13 + $0x3e4] ss:$8 sps:$4 sm:$0xff]  }
 0x9ea   : > { %v3906_v6 = vadd.f32 %v3905_v24, %v2446_v31  ;;  %v3907_v10 = vpop.f32.mrb[42].mxu0 }
 0x9eb   : > { %v3908_v44 = vadd.f32 %v3907_v10, %v2442_v53  ;;  %v3909_v4 = vpop.f32.mrb[43].mxu0  ;;  %v4131_v50 = vmax.f32 %v3904_v35, 0.0  ;;  %v2450_v53 = vrot.slane %v8672_v45, %v2449_v26 }
 0x9ec   : > { %v3910_v46 = vadd.f32 %v3909_v4, %v2446_v31  ;;  %5838 = vmatpush1.bf16.msra.mxu1 %v7519_v33  ;;  %v4132_v51 = vmax.f32 %v3906_v6, 0.0  ;;  %v2454_v31 = vrot.slane %v8672_v45, %v2453_v27  ;;  %v7567_v33 = vld [vmem:[#allocation13 + $0x3e0] ss:$8 sps:$4 sm:$0xff]  }
 0x9ed   : > { %v4147_v12 = vmax.f32 %v3908_v44, 0.0  ;;  %5839 = vmatprep.subr.bf16.mxu1 %v7524_v39  ;;  %v7572_v39 = vld [vmem:[#allocation13 + $0x3f4] ss:$8 sps:$4 sm:$0xff]  }
 0x9ee   : > { %v4148_v13 = vmax.f32 %v3910_v46, 0.0 }
 0x9ef   : > { %v4163_v52 = vpack.c.bf16 %v4147_v12, %v4131_v50 }
 0x9f0   : > { %v4164_v15 = vpack.c.bf16 %v4148_v13, %v4132_v51  ;;  %5840 = vmatpush1.bf16.msra.mxu1 %v7522_v49  ;;  %v7570_v49 = vld [vmem:[#allocation13 + $0x3f0] ss:$8 sps:$4 sm:$0xff]  }
 0x9f1   : > { %5852 = vmatprep.subr.bf16.mxu1 %v7527_v7  ;;  %v7575_v7 = vld [vmem:[#allocation13 + $0x404] ss:$8 sps:$4 sm:$0xff]  }
 0x9f2   : > { %5841 = vmatprep.mubr.bf16.mxu1 %v4164_v15  ;;  %v7573_v15 = vld [vmem:[#allocation13 + $0x400] ss:$8 sps:$4 sm:$0xff]  }
 0x9f3   : > { %5842 = vmatmul.mubr.bf16.vlgmr.msra.gmra.mrb[24].mxu1 %v4163_v52 }
 0x9f4   : > { %5853 = vmatpush1.bf16.msra.mxu1 %v7525_v55  ;;  %v7578_v55 = vld [vmem:[#allocation13 + $0x414] ss:$8 sps:$4 sm:$0xff]  }
 0x9f5   : > { %5854 = vmatprep.subr.bf16.mxu1 %v7530_v59  ;;  %v7576_v59 = vld [vmem:[#allocation13 + $0x410] ss:$8 sps:$4 sm:$0xff]  }
 0x9f8   : > { %5855 = vmatpush1.bf16.msra.mxu1 %v7528_v62  ;;  %v7581_v62 = vld [vmem:[#allocation13 + $0x424] ss:$8 sps:$4 sm:$0xff]  }
 0x9f9   : > { %5856 = vmatprep.subr.bf16.mxu1 %v7533_v63  ;;  %v7579_v63 = vld [vmem:[#allocation13 + $0x420] ss:$8 sps:$4 sm:$0xff]  }
 0x9fc   : > { %5857 = vmatpush1.bf16.msra.mxu1 %v7531_v0  ;;  %v7584_v0 = vld [vmem:[#allocation13 + $0x434] ss:$8 sps:$4 sm:$0xff]  }
 0x9fd   : > { %5858 = vmatprep.subr.bf16.mxu1 %v7536_v1  ;;  %v7582_v1 = vld [vmem:[#allocation13 + $0x430] ss:$8 sps:$4 sm:$0xff]  }
 0xa00   : > { %5859 = vmatpush1.bf16.msra.mxu1 %v7534_v2  ;;  %v7587_v2 = vld [vmem:[#allocation13 + $0x444] ss:$8 sps:$4 sm:$0xff]  }
 0xa01   : > { %5860 = vmatprep.subr.bf16.mxu1 %v7539_v56  ;;  %v7585_v56 = vld [vmem:[#allocation13 + $0x440] ss:$8 sps:$4 sm:$0xff]  }
 0xa04   : > { %5861 = vmatpush1.bf16.msra.mxu1 %v7537_v3  ;;  %v7590_v3 = vld [vmem:[#allocation13 + $0x454] ss:$8 sps:$4 sm:$0xff]  }
 0xa05   : > { %5862 = vmatprep.subr.bf16.mxu1 %v7542_v58  ;;  %v7588_v58 = vld [vmem:[#allocation13 + $0x450] ss:$8 sps:$4 sm:$0xff]  }
 0xa08   : > { %5863 = vmatpush1.bf16.msra.mxu1 %v7540_v5  ;;  %v7593_v5 = vld [vmem:[#allocation13 + $0x464] ss:$8 sps:$4 sm:$0xff]  }
 0xa09   : > { %5864 = vmatprep.subr.bf16.mxu1 %v7545_v54  ;;  %v7596_v54 = vld [vmem:[#allocation13 + $0x474] ss:$8 sps:$4 sm:$0xff]  }
 0xa0c   : > { %5865 = vmatpush1.bf16.msra.mxu1 %v7543_v8  ;;  %v7594_v8 = vld [vmem:[#allocation13 + $0x470] ss:$8 sps:$4 sm:$0xff]  }
 0xa0d   : > { %5866 = vmatprep.subr.bf16.mxu1 %v7548_v16  ;;  %v7599_v16 = vld [vmem:[#allocation13 + $0x484] ss:$8 sps:$4 sm:$0xff]  }
 0xa10   : > { %5867 = vmatpush1.bf16.msra.mxu1 %v7546_v57  ;;  %v7597_v57 = vld [vmem:[#allocation13 + $0x480] ss:$8 sps:$4 sm:$0xff]  }
 0xa11   : > { %5868 = vmatprep.subr.bf16.mxu1 %v7551_v14  ;;  %v7602_v14 = vld [vmem:[#allocation13 + $0x494] ss:$8 sps:$4 sm:$0xff]  }
 0xa14   : > { %5869 = vmatpush1.bf16.msra.mxu1 %v7549_v17  ;;  %v7600_v17 = vld [vmem:[#allocation13 + $0x490] ss:$8 sps:$4 sm:$0xff]  }
 0xa15   : > { %5870 = vmatprep.subr.bf16.mxu1 %v7554_v18  ;;  %v7605_v18 = vld [vmem:[#allocation13 + $0x4a4] ss:$8 sps:$4 sm:$0xff]  }
 0xa18   : > { %5871 = vmatpush1.bf16.msra.mxu1 %v7552_v30  ;;  %v7603_v30 = vld [vmem:[#allocation13 + $0x4a0] ss:$8 sps:$4 sm:$0xff]  }
 0xa19   : > { %5872 = vmatprep.subr.bf16.mxu1 %v7557_v34  ;;  %v7608_v34 = vld [vmem:[#allocation13 + $0x4b4] ss:$8 sps:$4 sm:$0xff]  }
 0xa1c   : > { %5873 = vmatpush1.bf16.msra.mxu1 %v7555_v36  ;;  %v7606_v36 = vld [vmem:[#allocation13 + $0x4b0] ss:$8 sps:$4 sm:$0xff]  }
 0xa1d   : > { %5874 = vmatprep.subr.bf16.mxu1 %v7560_v20  ;;  %v7611_v20 = vld [vmem:[#allocation13 + $0x4c4] ss:$8 sps:$4 sm:$0xff]  }
 0xa20   : > { %5875 = vmatpush1.bf16.msra.mxu1 %v7558_v37  ;;  %v7609_v37 = vld [vmem:[#allocation13 + $0x4c0] ss:$8 sps:$4 sm:$0xff]  }
 0xa21   : > { %5876 = vmatprep.subr.bf16.mxu1 %v7563_v21  ;;  %v7614_v21 = vld [vmem:[#allocation13 + $0x4d4] ss:$8 sps:$4 sm:$0xff]  }
 0xa24   : > { %5877 = vmatpush1.bf16.msra.mxu1 %v7561_v22  ;;  %v7612_v22 = vld [vmem:[#allocation13 + $0x4d0] ss:$8 sps:$4 sm:$0xff]  }
 0xa25   : > { %5878 = vmatprep.subr.bf16.mxu1 %v7566_v23  ;;  %v8722_v23 = vld [vmem:[%s8868_s10 + $0x8] sm:$0xff] }
 0xa28   : > { %v3946_v32 = vpop.f32.mrb[44].mxu0  ;;  %5879 = vmatpush1.bf16.msra.mxu1 %v7564_v28  ;;  %v2466_v28 = vrot.slane %v8722_v23, %v8475_v60 }
 0xa29   : > { %v3947_v35 = vadd.f32 %v3946_v32, %v2450_v53  ;;  %v3948_v24 = vpop.f32.mrb[45].mxu0  ;;  %5880 = vmatprep.subr.bf16.mxu1 %v7569_v29  ;;  %v2470_v29 = vrot.slane %v8722_v23, %v8478_v61  ;;  %v7615_v32 = vld [vmem:[#allocation13 + $0x4e0] ss:$8 sps:$4 sm:$0xff]  }
 0xa2a   : > { %v3949_v6 = vadd.f32 %v3948_v24, %v2454_v31  ;;  %v3950_v10 = vpop.f32.mrb[46].mxu0  ;;  %v7620_v24 = vld [vmem:[#allocation13 + $0x4f4] ss:$8 sps:$4 sm:$0xff]  }
 0xa2b   : > { %v3951_v44 = vadd.f32 %v3950_v10, %v2450_v53  ;;  %v3952_v4 = vpop.f32.mrb[47].mxu0  ;;  %v4133_v50 = vmax.f32 %v3947_v35, 0.0  ;;  %v7617_v53 = vld [vmem:[#allocation13 + $0x4e4] ss:$8 sps:$4 sm:$0xff]  }
 0xa2c   : > { %v3953_v46 = vadd.f32 %v3952_v4, %v2454_v31  ;;  %5881 = vmatpush1.bf16.msra.mxu1 %v7567_v33  ;;  %v4134_v51 = vmax.f32 %v3949_v6, 0.0 }
 0xa2d   : > { %v4149_v12 = vmax.f32 %v3951_v44, 0.0  ;;  %5882 = vmatprep.subr.bf16.mxu1 %v7572_v39 }
 0xa2e   : > { %v4150_v45 = vmax.f32 %v3953_v46, 0.0  ;;  %v7618_v46 = vld [vmem:[#allocation13 + $0x4f0] ss:$8 sps:$4 sm:$0xff]  }
 0xa2f   : > { %v4165_v13 = vpack.c.bf16 %v4149_v12, %v4133_v50  ;;  %v7623_v50 = vld [vmem:[#allocation13 + $0x504] ss:$8 sps:$4 sm:$0xff]  }
 0xa30   : > { %v4166_v52 = vpack.c.bf16 %v4150_v45, %v4134_v51  ;;  %5883 = vmatpush1.bf16.msra.mxu1 %v7570_v49  ;;  %v7621_v45 = vld [vmem:[#allocation13 + $0x500] ss:$8 sps:$4 sm:$0xff]  }
 0xa31   : > { %5895 = vmatprep.subr.bf16.mxu1 %v7575_v7 }
 0xa32   : > { %5884 = vmatprep.mubr.bf16.mxu1 %v4166_v52  ;;  %v7624_v52 = vld [vmem:[#allocation13 + $0x510] ss:$8 sps:$4 sm:$0xff]  }
 0xa33   : > { %5885 = vmatmul.mubr.bf16.vlgmr.msra.gmra.mrb[24].mxu1 %v4165_v13  ;;  %v7626_v13 = vld [vmem:[#allocation13 + $0x514] ss:$8 sps:$4 sm:$0xff]  }
 0xa34   : > { %5896 = vmatpush1.bf16.msra.mxu1 %v7573_v15  ;;  %5927 = vmatprep.mubr.bf16.mxu1 %v8689_v25  ;;  %v7591_v25 = vld [vmem:[#allocation13 + $0x460] ss:$8 sps:$4 sm:$0xff]   ;;  %v7629_v15 = vld [vmem:[#allocation13 + $0x524] ss:$8 sps:$4 sm:$0xff]  }
 0xa35   : > { %5897 = vmatprep.subr.bf16.mxu1 %v7578_v55  ;;  %v7627_v55 = vld [vmem:[#allocation13 + $0x520] ss:$8 sps:$4 sm:$0xff]  }
 0xa38   : > { %5898 = vmatpush1.bf16.msra.mxu1 %v7576_v59  ;;  %v7632_v59 = vld [vmem:[#allocation13 + $0x534] ss:$8 sps:$4 sm:$0xff]  }
 0xa39   : > { %5899 = vmatprep.subr.bf16.mxu1 %v7581_v62  ;;  %v7630_v62 = vld [vmem:[#allocation13 + $0x530] ss:$8 sps:$4 sm:$0xff]  }
 0xa3c   : > { %5900 = vmatpush1.bf16.msra.mxu1 %v7579_v63  ;;  %v7635_v63 = vld [vmem:[#allocation13 + $0x544] ss:$8 sps:$4 sm:$0xff]  }
 0xa3d   : > { %5901 = vmatprep.subr.bf16.mxu1 %v7584_v0  ;;  %v7633_v0 = vld [vmem:[#allocation13 + $0x540] ss:$8 sps:$4 sm:$0xff]  }
 0xa40   : > { %5902 = vmatpush1.bf16.msra.mxu1 %v7582_v1  ;;  %v7638_v1 = vld [vmem:[#allocation13 + $0x554] ss:$8 sps:$4 sm:$0xff]  }
 0xa41   : > { %5903 = vmatprep.subr.bf16.mxu1 %v7587_v2  ;;  %v7636_v2 = vld [vmem:[#allocation13 + $0x550] ss:$8 sps:$4 sm:$0xff]  }
 0xa44   : > { %5904 = vmatpush1.bf16.msra.mxu1 %v7585_v56  ;;  %v7639_v56 = vld [vmem:[#allocation13 + $0x560] ss:$8 sps:$4 sm:$0xff]  }
 0xa45   : > { %5905 = vmatprep.subr.bf16.mxu1 %v7590_v3  ;;  %v7644_v3 = vld [vmem:[#allocation13 + $0x574] ss:$8 sps:$4 sm:$0xff]  }
 0xa48   : > { %5906 = vmatpush1.bf16.msra.mxu1 %v7588_v58  ;;  %v7642_v58 = vld [vmem:[#allocation13 + $0x570] ss:$8 sps:$4 sm:$0xff]  }
 0xa49   : > { %5907 = vmatprep.subr.bf16.mxu1 %v7593_v5  ;;  %v7647_v5 = vld [vmem:[#allocation13 + $0x584] ss:$8 sps:$4 sm:$0xff]  }
 0xa4c   : > { %5908 = vmatpush1.bf16.msra.mxu1 %v7591_v25  ;;  %v7645_v25 = vld [vmem:[#allocation13 + $0x580] ss:$8 sps:$4 sm:$0xff]  }
 0xa4d   : > { %5909 = vmatprep.subr.bf16.mxu1 %v7596_v54  ;;  %v7650_v54 = vld [vmem:[#allocation13 + $0x594] ss:$8 sps:$4 sm:$0xff]  }
 0xa50   : > { %5910 = vmatpush1.bf16.msra.mxu1 %v7594_v8  ;;  %v7648_v8 = vld [vmem:[#allocation13 + $0x590] ss:$8 sps:$4 sm:$0xff]  }
 0xa51   : > { %5911 = vmatprep.subr.bf16.mxu1 %v7599_v16  ;;  %v7653_v16 = vld [vmem:[#allocation13 + $0x5a4] ss:$8 sps:$4 sm:$0xff]  }
 0xa54   : > { %5912 = vmatpush1.bf16.msra.mxu1 %v7597_v57  ;;  %v7651_v57 = vld [vmem:[#allocation13 + $0x5a0] ss:$8 sps:$4 sm:$0xff]  }
 0xa55   : > { %5913 = vmatprep.subr.bf16.mxu1 %v7602_v14  ;;  %v7656_v14 = vld [vmem:[#allocation13 + $0x5b4] ss:$8 sps:$4 sm:$0xff]  }
 0xa58   : > { %5914 = vmatpush1.bf16.msra.mxu1 %v7600_v17  ;;  %v7654_v17 = vld [vmem:[#allocation13 + $0x5b0] ss:$8 sps:$4 sm:$0xff]  }
 0xa59   : > { %5915 = vmatprep.subr.bf16.mxu1 %v7605_v18  ;;  %v7659_v18 = vld [vmem:[#allocation13 + $0x5c4] ss:$8 sps:$4 sm:$0xff]  }
 0xa5c   : > { %5916 = vmatpush1.bf16.msra.mxu1 %v7603_v30  ;;  %v7657_v30 = vld [vmem:[#allocation13 + $0x5c0] ss:$8 sps:$4 sm:$0xff]  }
 0xa5d   : > { %5917 = vmatprep.subr.bf16.mxu1 %v7608_v34  ;;  %v7662_v34 = vld [vmem:[#allocation13 + $0x5d4] ss:$8 sps:$4 sm:$0xff]  }
 0xa60   : > { %5918 = vmatpush1.bf16.msra.mxu1 %v7606_v36  ;;  %v7660_v36 = vld [vmem:[#allocation13 + $0x5d0] ss:$8 sps:$4 sm:$0xff]  }
 0xa61   : > { %5919 = vmatprep.subr.bf16.mxu1 %v7611_v20  ;;  %v2482_v20 = vrot.slane %v8722_v23, %v2449_v26 }
 0xa64   : > { %5920 = vmatpush1.bf16.msra.mxu1 %v7609_v37  ;;  %v7665_v37 = vld [vmem:[#allocation13 + $0x5e4] ss:$8 sps:$4 sm:$0xff]  }
 0xa65   : > { %5921 = vmatprep.subr.bf16.mxu1 %v7614_v21  ;;  %v2486_v21 = vrot.slane %v8722_v23, %v2453_v27 }
 0xa68   : > { %v4032_v31 = vpop.f32.mrb[48].mxu0  ;;  %5922 = vmatpush1.bf16.msra.mxu1 %v7612_v22 }
 0xa69   : > { %v4033_v33 = vadd.f32 %v4032_v31, %v2466_v28  ;;  %v4034_v35 = vpop.f32.mrb[49].mxu0  ;;  %5923 = vmatprep.subr.bf16.mxu1 %v7617_v53  ;;  %v7668_v31 = vld [vmem:[#allocation13 + $0x5f4] ss:$8 sps:$4 sm:$0xff]  }
 0xa6a   : > { %v4035_v39 = vadd.f32 %v4034_v35, %v2470_v29  ;;  %v4036_v6 = vpop.f32.mrb[50].mxu0 }
 0xa6b   : > { %v4037_v10 = vadd.f32 %v4036_v6, %v2466_v28  ;;  %v4038_v44 = vpop.f32.mrb[51].mxu0  ;;  %v4137_v49 = vmax.f32 %v4033_v33, 0.0  ;;  %v7663_v28 = vld [vmem:[#allocation13 + $0x5e0] ss:$8 sps:$4 sm:$0xff]   ;;  %v7666_v6 = vld [vmem:[#allocation13 + $0x5f0] ss:$8 sps:$4 sm:$0xff]  }
 0xa6c   : > { %v4039_v4 = vadd.f32 %v4038_v44, %v2470_v29  ;;  %5924 = vmatpush1.bf16.msra.mxu1 %v7615_v32  ;;  %v4138_v12 = vmax.f32 %v4035_v39, 0.0 }
 0xa6d   : > { %v4153_v60 = vmax.f32 %v4037_v10, 0.0  ;;  %5925 = vmatprep.subr.bf16.mxu1 %v7620_v24 }
 0xa6e   : > { %v4154_v61 = vmax.f32 %v4039_v4, 0.0 }
 0xa6f   : > { %v8728_v7 = vpack.c.bf16 %v4153_v60, %v4137_v49  ;;  %v7674_v49 = vld [vmem:[#allocation13 + $0x614] ss:$8 sps:$4 sm:$0xff]   ;;  %v7672_v60 = vld [vmem:[#allocation13 + $0x610] ss:$8 sps:$4 sm:$0xff]  }
 0xa70   : > { %v4170_v51 = vpack.c.bf16 %v4154_v61, %v4138_v12  ;;  %5926 = vmatpush1.bf16.msra.mxu1 %v7618_v46  ;;  %v7669_v46 = vld [vmem:[#allocation13 + $0x600] ss:$8 sps:$4 sm:$0xff]   ;;  %v7680_v61 = vld [vmem:[#allocation13 + $0x634] ss:$8 sps:$4 sm:$0xff]  }
 0xa71   : > { %5938 = vmatprep.subr.bf16.mxu1 %v7623_v50  ;;  %v7677_v50 = vld [vmem:[#allocation13 + $0x624] ss:$8 sps:$4 sm:$0xff]   ;;  %v7675_v12 = vld [vmem:[#allocation13 + $0x620] ss:$8 sps:$4 sm:$0xff]  }
 0xa73   : > { %5928 = vmatmul.mubr.bf16.vlgmr.msra.gmra.mrb[24].mxu1 %v8687_v40  ;;  %v7641_v40 = vld [vmem:[#allocation13 + $0x564] ss:$8 sps:$4 sm:$0xff]  }
 0xa74   : > { %5939 = vmatpush1.bf16.msra.mxu1 %v7621_v45  ;;  %5970 = vmatprep.mubr.bf16.mxu1 %v4170_v51  ;;  %v7678_v51 = vld [vmem:[#allocation13 + $0x630] ss:$8 sps:$4 sm:$0xff]   ;;  %v7683_v45 = vld [vmem:[#allocation13 + $0x644] ss:$8 sps:$4 sm:$0xff]  }
 0xa75   : > { %5940 = vmatprep.subr.bf16.mxu1 %v7626_v13  ;;  %v7681_v13 = vld [vmem:[#allocation13 + $0x640] ss:$8 sps:$4 sm:$0xff]  }
 0xa78   : > { %5941 = vmatpush1.bf16.msra.mxu1 %v7624_v52  ;;  %v7686_v52 = vld [vmem:[#allocation13 + $0x654] ss:$8 sps:$4 sm:$0xff]  }
 0xa79   : > { %5942 = vmatprep.subr.bf16.mxu1 %v7629_v15  ;;  %v7689_v15 = vld [vmem:[#allocation13 + $0x664] ss:$8 sps:$4 sm:$0xff]  }
 0xa7c   : > { %5943 = vmatpush1.bf16.msra.mxu1 %v7627_v55  ;;  %v7692_v55 = vld [vmem:[#allocation13 + $0x674] ss:$8 sps:$4 sm:$0xff]  }
 0xa7d   : > { %5944 = vmatprep.subr.bf16.mxu1 %v7632_v59  ;;  %v7690_v59 = vld [vmem:[#allocation13 + $0x670] ss:$8 sps:$4 sm:$0xff]  }
 0xa80   : > { %5945 = vmatpush1.bf16.msra.mxu1 %v7630_v62  ;;  %v7695_v62 = vld [vmem:[#allocation13 + $0x684] ss:$8 sps:$4 sm:$0xff]  }
 0xa81   : > { %5946 = vmatprep.subr.bf16.mxu1 %v7635_v63  ;;  %v7693_v63 = vld [vmem:[#allocation13 + $0x680] ss:$8 sps:$4 sm:$0xff]  }
 0xa84   : > { %5947 = vmatpush1.bf16.msra.mxu1 %v7633_v0  ;;  %v7698_v0 = vld [vmem:[#allocation13 + $0x694] ss:$8 sps:$4 sm:$0xff]  }
 0xa85   : > { %5948 = vmatprep.subr.bf16.mxu1 %v7638_v1  ;;  %v7696_v1 = vld [vmem:[#allocation13 + $0x690] ss:$8 sps:$4 sm:$0xff]  }
 0xa88   : > { %5949 = vmatpush1.bf16.msra.mxu1 %v7636_v2  ;;  %v7701_v2 = vld [vmem:[#allocation13 + $0x6a4] ss:$8 sps:$4 sm:$0xff]  }
 0xa89   : > { %5950 = vmatprep.subr.bf16.mxu1 %v7641_v40  ;;  %v7699_v40 = vld [vmem:[#allocation13 + $0x6a0] ss:$8 sps:$4 sm:$0xff]  }
 0xa8c   : > { %5951 = vmatpush1.bf16.msra.mxu1 %v7639_v56  ;;  %v7704_v56 = vld [vmem:[#allocation13 + $0x6b4] ss:$8 sps:$4 sm:$0xff]  }
 0xa8d   : > { %5952 = vmatprep.subr.bf16.mxu1 %v7644_v3  ;;  %v7702_v3 = vld [vmem:[#allocation13 + $0x6b0] ss:$8 sps:$4 sm:$0xff]  }
 0xa90   : > { %5953 = vmatpush1.bf16.msra.mxu1 %v7642_v58  ;;  %v7707_v58 = vld [vmem:[#allocation13 + $0x6c4] ss:$8 sps:$4 sm:$0xff]  }
 0xa91   : > { %5954 = vmatprep.subr.bf16.mxu1 %v7647_v5  ;;  %v7705_v5 = vld [vmem:[#allocation13 + $0x6c0] ss:$8 sps:$4 sm:$0xff]  }
 0xa94   : > { %5955 = vmatpush1.bf16.msra.mxu1 %v7645_v25  ;;  %v7710_v25 = vld [vmem:[#allocation13 + $0x6d4] ss:$8 sps:$4 sm:$0xff]  }
 0xa95   : > { %5956 = vmatprep.subr.bf16.mxu1 %v7650_v54  ;;  %v7708_v54 = vld [vmem:[#allocation13 + $0x6d0] ss:$8 sps:$4 sm:$0xff]  }
 0xa98   : > { %5957 = vmatpush1.bf16.msra.mxu1 %v7648_v8  ;;  %v7713_v8 = vld [vmem:[#allocation13 + $0x6e4] ss:$8 sps:$4 sm:$0xff]  }
 0xa99   : > { %5958 = vmatprep.subr.bf16.mxu1 %v7653_v16  ;;  %v7711_v16 = vld [vmem:[#allocation13 + $0x6e0] ss:$8 sps:$4 sm:$0xff]  }
 0xa9c   : > { %5959 = vmatpush1.bf16.msra.mxu1 %v7651_v57  ;;  %v7716_v57 = vld [vmem:[#allocation13 + $0x6f4] ss:$8 sps:$4 sm:$0xff]  }
 0xa9d   : > { %5960 = vmatprep.subr.bf16.mxu1 %v7656_v14  ;;  %v7714_v14 = vld [vmem:[#allocation13 + $0x6f0] ss:$8 sps:$4 sm:$0xff]  }
 0xaa0   : > { %5961 = vmatpush1.bf16.msra.mxu1 %v7654_v17  ;;  %v7719_v17 = vld [vmem:[#allocation13 + $0x704] ss:$8 sps:$4 sm:$0xff]  }
 0xaa1   : > { %5962 = vmatprep.subr.bf16.mxu1 %v7659_v18  ;;  %v7717_v18 = vld [vmem:[#allocation13 + $0x700] ss:$8 sps:$4 sm:$0xff]  }
 0xaa4   : > { %5963 = vmatpush1.bf16.msra.mxu1 %v7657_v30  ;;  %v7722_v30 = vld [vmem:[#allocation13 + $0x714] ss:$8 sps:$4 sm:$0xff]  }
 0xaa5   : > { %5964 = vmatprep.subr.bf16.mxu1 %v7662_v34  ;;  %v7720_v34 = vld [vmem:[#allocation13 + $0x710] ss:$8 sps:$4 sm:$0xff]  }
 0xaa8   : > { %v4118_v22 = vpop.f32.mrb[52].mxu0  ;;  %5965 = vmatpush1.bf16.msra.mxu1 %v7660_v36  ;;  %v7725_v36 = vld [vmem:[#allocation13 + $0x724] ss:$8 sps:$4 sm:$0xff]  }
 0xaa9   : > { %v4119_v53 = vadd.f32 %v4118_v22, %v2482_v20  ;;  %v4120_v29 = vpop.f32.mrb[53].mxu0  ;;  %5966 = vmatprep.subr.bf16.mxu1 %v7665_v37  ;;  %v7728_v37 = vld [vmem:[#allocation13 + $0x734] ss:$8 sps:$4 sm:$0xff]   ;;  %v7731_v22 = vld [vmem:[#allocation13 + $0x744] ss:$8 sps:$4 sm:$0xff]  }
 0xaaa   : > { %v4121_v32 = vadd.f32 %v4120_v29, %v2486_v21  ;;  %v4122_v33 = vpop.f32.mrb[54].mxu0  ;;  %v7737_v29 = vld [vmem:[#allocation13 + $0x764] ss:$8 sps:$4 sm:$0xff]  }
 0xaab   : > { %v4123_v35 = vadd.f32 %v4122_v33, %v2482_v20  ;;  %v4124_v24 = vpop.f32.mrb[55].mxu0  ;;  %v4141_v26 = vmax.f32 %v4119_v53, 0.0  ;;  %v7723_v20 = vld [vmem:[#allocation13 + $0x720] ss:$8 sps:$4 sm:$0xff]   ;;  %v7734_v53 = vld [vmem:[#allocation13 + $0x754] ss:$8 sps:$4 sm:$0xff]  }
 0xaac   : > { %v4125_v39 = vadd.f32 %v4124_v24, %v2486_v21  ;;  %5967 = vmatpush1.bf16.msra.mxu1 %v7663_v28  ;;  %v4142_v44 = vmax.f32 %v4121_v32, 0.0  ;;  %v7726_v21 = vld [vmem:[#allocation13 + $0x730] ss:$8 sps:$4 sm:$0xff]   ;;  %v7729_v28 = vld [vmem:[#allocation13 + $0x740] ss:$8 sps:$4 sm:$0xff]  }
 0xaad   : > { %v4157_v10 = vmax.f32 %v4123_v35, 0.0  ;;  %5968 = vmatprep.subr.bf16.mxu1 %v7668_v31  ;;  %v7735_v31 = vld [vmem:[#allocation13 + $0x760] ss:$8 sps:$4 sm:$0xff]   ;;  %v7740_v32 = vld [vmem:[#allocation13 + $0x774] ss:$8 sps:$4 sm:$0xff]  }
 0xaae   : > { %v4158_v27 = vmax.f32 %v4125_v39, 0.0  ;;  %v7738_v33 = vld [vmem:[#allocation13 + $0x770] ss:$8 sps:$4 sm:$0xff]   ;;  %v7743_v35 = vld [vmem:[#allocation13 + $0x784] ss:$8 sps:$4 sm:$0xff]  }
 0xaaf   : > { %v8737_v23 = vpack.c.bf16 %v4157_v10, %v4141_v26  ;;  %v7741_v24 = vld [vmem:[#allocation13 + $0x780] ss:$8 sps:$4 sm:$0xff]   ;;  %v7746_v39 = vld [vmem:[#allocation13 + $0x794] ss:$8 sps:$4 sm:$0xff]   ;;  %v7749_v26 = vld [vmem:[#allocation13 + $0x7a4] ss:$8 sps:$4 sm:$0xff]  }
 0xab0   : > { %v8739_v4 = vpack.c.bf16 %v4158_v27, %v4142_v44  ;;  %5969 = vmatpush1.bf16.msra.mxu1 %v7666_v6  ;;  %v7744_v6 = vld [vmem:[#allocation13 + $0x790] ss:$8 sps:$4 sm:$0xff]   ;;  %v7747_v10 = vld [vmem:[#allocation13 + $0x7a0] ss:$8 sps:$4 sm:$0xff]   ;;  %v7755_v27 = vld [vmem:[#allocation13 + $0x7c4] ss:$8 sps:$4 sm:$0xff]  }
 0xab1   : > { %5981 = vmatprep.subr.bf16.mxu1 %v7671_v41  ;;  %v7752_v41 = vld [vmem:[#allocation13 + $0x7b4] ss:$8 sps:$4 sm:$0xff]   ;;  %v7750_v44 = vld [vmem:[#allocation13 + $0x7b0] ss:$8 sps:$4 sm:$0xff]  }
 0xab3   : > { %5971 = vmatmul.mubr.bf16.vlgmr.msra.gmra.mrb[24].mxu1 %v8728_v7  ;;  %v7684_v7 = vld [vmem:[#allocation13 + $0x650] ss:$8 sps:$4 sm:$0xff]  }
 0xab4   : > { %5982 = vmatpush1.bf16.msra.mxu1 %v7669_v46  ;;  %6013 = vmatprep.mubr.bf16.mxu1 %v8703_v19  ;;  %v7687_v19 = vld [vmem:[#allocation13 + $0x660] ss:$8 sps:$4 sm:$0xff]   ;;  %v7758_v46 = vld [vmem:[#allocation13 + $0x7d4] ss:$8 sps:$4 sm:$0xff]  }
 0xab5   : > { %5983 = vmatprep.subr.bf16.mxu1 %v7674_v49  ;;  %v7756_v49 = vld [vmem:[#allocation13 + $0x7d0] ss:$8 sps:$4 sm:$0xff]  }
 0xab8   : > { %5984 = vmatpush1.bf16.msra.mxu1 %v7672_v60  ;;  %v7761_v60 = vld [vmem:[#allocation13 + $0x7e4] ss:$8 sps:$4 sm:$0xff]  }
 0xab9   : > { %5985 = vmatprep.subr.bf16.mxu1 %v7677_v50  ;;  %v7759_v50 = vld [vmem:[#allocation13 + $0x7e0] ss:$8 sps:$4 sm:$0xff]  }
 0xabc   : > { %5986 = vmatpush1.bf16.msra.mxu1 %v7675_v12  ;;  %v7764_v12 = vld [vmem:[#allocation13 + $0x7f4] ss:$8 sps:$4 sm:$0xff]  }
 0xabd   : > { %5987 = vmatprep.subr.bf16.mxu1 %v7680_v61  ;;  %v7762_v61 = vld [vmem:[#allocation13 + $0x7f0] ss:$8 sps:$4 sm:$0xff]  }
 0xac0   : > { %5988 = vmatpush1.bf16.msra.mxu1 %v7678_v51  ;;  %v4431_v51 = vld [vmem:[%s8869_s8] sm:$0x3] }
 0xac1   : > { %5989 = vmatprep.subr.bf16.mxu1 %v7683_v45  ;;  %v4436_v45 = vrot.slane %v4431_v51, %v8462_v42 }
 0xac4   : > { %5990 = vmatpush1.bf16.msra.mxu1 %v7681_v13  ;;  %v4440_v13 = vrot.slane %v4431_v51, %v8468_v43 }
 0xac5   : > { %5991 = vmatprep.subr.bf16.mxu1 %v7686_v52 }
 0xac8   : > { %5992 = vmatpush1.bf16.msra.mxu1 %v7684_v7 }
 0xac9   : > { %5993 = vmatprep.subr.bf16.mxu1 %v7689_v15 }
 0xacc   : > { %5994 = vmatpush1.bf16.msra.mxu1 %v7687_v19 }
 0xacd   : > { %5995 = vmatprep.subr.bf16.mxu1 %v7692_v55 }
 0xad0   : > { %5996 = vmatpush1.bf16.msra.mxu1 %v7690_v59 }
 0xad1   : > { %5997 = vmatprep.subr.bf16.mxu1 %v7695_v62 }
 0xad4   : > { %5998 = vmatpush1.bf16.msra.mxu1 %v7693_v63 }
 0xad5   : > { %5999 = vmatprep.subr.bf16.mxu1 %v7698_v0 }
 0xad8   : > { %6000 = vmatpush1.bf16.msra.mxu1 %v7696_v1 }
 0xad9   : > { %6001 = vmatprep.subr.bf16.mxu1 %v7701_v2 }
 0xadc   : > { %6002 = vmatpush1.bf16.msra.mxu1 %v7699_v40 }
 0xadd   : > { %6003 = vmatprep.subr.bf16.mxu1 %v7704_v56 }
 0xae0   : > { %6004 = vmatpush1.bf16.msra.mxu1 %v7702_v3 }
 0xae1   : > { %6005 = vmatprep.subr.bf16.mxu1 %v7707_v58 }
 0xae4   : > { %6006 = vmatpush1.bf16.msra.mxu1 %v7705_v5 }
 0xae5   : > { %6007 = vmatprep.subr.bf16.mxu1 %v7710_v25 }
 0xae8   : > { %6008 = vmatpush1.bf16.msra.mxu1 %v7708_v54 }
 0xae9   : > { %6009 = vmatprep.subr.bf16.mxu1 %v7713_v8 }
 0xaec   : > { %6010 = vmatpush1.bf16.msra.mxu1 %v7711_v16 }
 0xaed   : > { %6011 = vmatprep.subr.bf16.mxu1 %v7716_v57 }
 0xaf0   : > { %6012 = vmatpush1.bf16.msra.mxu1 %v7714_v14 }
 0xaf1   : > { %6024 = vmatprep.subr.bf16.mxu1 %v7719_v17 }
 0xaf3   : > { %6014 = vmatmul.mubr.bf16.vlgmr.msra.gmra.mrb[24].mxu1 %v8701_v38  ;;  %v7732_v38 = vld [vmem:[#allocation13 + $0x750] ss:$8 sps:$4 sm:$0xff]  }
 0xaf4   : > { %6025 = vmatpush1.bf16.msra.mxu1 %v7717_v18  ;;  %6056 = vmatprep.mubr.bf16.mxu1 %v8739_v4  ;;  %v7753_v4 = vld [vmem:[#allocation13 + $0x7c0] ss:$8 sps:$4 sm:$0xff]  }
 0xaf5   : > { %6026 = vmatprep.subr.bf16.mxu1 %v7722_v30 }
 0xaf8   : > { %6027 = vmatpush1.bf16.msra.mxu1 %v7720_v34 }
 0xaf9   : > { %6028 = vmatprep.subr.bf16.mxu1 %v7725_v36 }
 0xafc   : > { %6029 = vmatpush1.bf16.msra.mxu1 %v7723_v20 }
 0xafd   : > { %6030 = vmatprep.subr.bf16.mxu1 %v7728_v37 }
 0xb00   : > { %6031 = vmatpush1.bf16.msra.mxu1 %v7726_v21  ;;  %v6103_v21 = vld [vmem:[%s8871_s28] sm:$0x3]  ;;  %s8771_s28 = scalar_lea.hbm %s8873_s6, %s6966_s13 }
 0xb01   : > { %6032 = vmatprep.subr.bf16.mxu1 %v7731_v22  ;;  %v6119_v22 = vld [vmem:[%s8872_s16] sm:$0x3]  ;;  %s7982_s16 = scalar_lea.vmem %s7981_s15, 1024 }
 0xb02   : > { %p7984_p4 = scmp.lt.s32.totalorder %s7982_s16, %s7976_s24 }
 0xb04   : > { %6033 = vmatpush1.bf16.msra.mxu1 %v7729_v28  ;;  %v6108_v28 = vrot.slane %v6103_v21, %v8462_v42  ;;  %p7985_p9 = por %p7984_p4, %p7983_p2 }
 0xb05   : > { %6034 = vmatprep.subr.bf16.mxu1 %v7734_v53  ;;  %v6112_v53 = vrot.slane %v6103_v21, %v8468_v43 }
 0xb06   : > { %p7986_p8 = pnand %p7985_p9, %p7979_p11 }
 0xb08   : > { %6035 = vmatpush1.bf16.msra.mxu1 %v7732_v38 }
 0xb09   : > { %6036 = vmatprep.subr.bf16.mxu1 %v7737_v29  ;;  %v6124_v29 = vrot.slane %v6119_v22, %v8462_v42 }
 0xb0c   : > { %6037 = vmatpush1.bf16.msra.mxu1 %v7735_v31  ;;  %v6128_v31 = vrot.slane %v6119_v22, %v8468_v43 }
 0xb0d   : > { %6038 = vmatprep.subr.bf16.mxu1 %v7740_v32 }
 0xb10   : > { %6039 = vmatpush1.bf16.msra.mxu1 %v7738_v33 }
 0xb11   : > { %6040 = vmatprep.subr.bf16.mxu1 %v7743_v35 }
 0xb14   : > { %6041 = vmatpush1.bf16.msra.mxu1 %v7741_v24 }
 0xb15   : > { %6042 = vmatprep.subr.bf16.mxu1 %v7746_v39 }
 0xb18   : > { %6043 = vmatpush1.bf16.msra.mxu1 %v7744_v6 }
 0xb19   : > { %6044 = vmatprep.subr.bf16.mxu1 %v7749_v26 }
 0xb1c   : > { %6045 = vmatpush1.bf16.msra.mxu1 %v7747_v10 }
 0xb1d   : > { %6046 = vmatprep.subr.bf16.mxu1 %v7752_v41 }
 0xb20   : > { %6047 = vmatpush1.bf16.msra.mxu1 %v7750_v44 }
 0xb21   : > { %6048 = vmatprep.subr.bf16.mxu1 %v7755_v27 }
 0xb24   : > { %6049 = vmatpush1.bf16.msra.mxu1 %v7753_v4 }
 0xb25   : > { %6050 = vmatprep.subr.bf16.mxu1 %v7758_v46 }
 0xb28   : > { %6051 = vmatpush1.bf16.msra.mxu1 %v7756_v49 }
 0xb29   : > { %6052 = vmatprep.subr.bf16.mxu1 %v7761_v60 }
 0xb2c   : > { %6053 = vmatpush1.bf16.msra.mxu1 %v7759_v50 }
 0xb2d   : > { %6054 = vmatprep.subr.bf16.mxu1 %v7764_v12 }
 0xb30   : > { %6055 = vmatpush1.bf16.msra.mxu1 %v7762_v61 }
 0xb33   : > { %6057 = vmatmul.mubr.bf16.vlgmr.msra.gmra.mrb[24].mxu1 %v8737_v23 }
 0xc06   : > { %v6058_v52 = vpop.f32.mrb[24].mxu1 }
 0xc07   : > { %v7031_v7 = vadd.f32 %v6058_v52, %v4436_v45  ;;  %v6060_v15 = vpop.f32.mrb[25].mxu1 }
 0xc08   : > { %v7032_v19 = vadd.f32 %v6060_v15, %v4440_v13  ;;  %v6062_v55 = vpop.f32.mrb[26].mxu1 }
 0xc09   : > { %v6067_v59 = vadd.f32 %v7031_v7, %v8640_v47  ;;  %v7033_v62 = vadd.f32 %v6062_v55, %v4436_v45  ;;  %v6064_v63 = vpop.f32.mrb[27].mxu1 }
 0xc0a   : > { %v6068_v0 = vadd.f32 %v7032_v19, %v8642_v48  ;;  %v7034_v23 = vadd.f32 %v6064_v63, %v4440_v13 }
 0xc0b   : > { %v6069_v1 = vadd.f32 %v7033_v62, %v8644_v9 }
 0xc0c   : > { %v6070_v2 = vadd.f32 %v7034_v23, %v8646_v11  ;;  %v6071_v40 = vadd.f32 %v6068_v0, %v6067_v59 }
 0xc0e   : > { %6072 = vadd.xlane.f32.xlu0 %v6071_v40  ;;  %v6074_v56 = vadd.f32 %v6070_v2, %v6069_v1 }
 0xc10   : > { %6075 = vadd.xlane.f32.xlu1 %v6074_v56 }
 0xc9b   : > { %v6073_v3 = vpop.xlane.xlu0 %6072 }
 0xc9c   : > { %v6077_v58 = vmul.f32 0.00390625, %v6073_v3 }
 0xc9d   : > { %v6076_v5 = vpop.xlane.xlu1 %6075 }
 0xc9e   : > { %v6079_v25 = vsub.f32 %v6067_v59, %v6077_v58  ;;  %v6080_v54 = vsub.f32 %v6068_v0, %v6077_v58  ;;  %v6078_v8 = vmul.f32 0.00390625, %v6076_v5 }
 0xca0   : > { %v6081_v47 = vsub.f32 %v6069_v1, %v6078_v8  ;;  %v6082_v16 = vsub.f32 %v6070_v2, %v6078_v8  ;;  %v6083_v57 = vmul.f32 %v6079_v25, %v6079_v25  ;;  %v6084_v14 = vmul.f32 %v6080_v54, %v6080_v54 }
 0xca2   : > { %v6087_v48 = vadd.f32 %v6084_v14, %v6083_v57  ;;  %v6085_v17 = vmul.f32 %v6081_v47, %v6081_v47  ;;  %v6086_v18 = vmul.f32 %v6082_v16, %v6082_v16 }
 0xca4   : > { %6088 = vadd.xlane.f32.xlu0 %v6087_v48  ;;  %v6090_v9 = vadd.f32 %v6086_v18, %v6085_v17 }
 0xca6   : > { %6091 = vadd.xlane.f32.xlu1 %v6090_v9 }
 0xd31   : > { %v6089_v11 = vpop.xlane.xlu0 %6088 }
 0xd32   : > { %v6093_v30 = vmul.f32 0.00390625, %v6089_v11 }
 0xd33   : > { %v6092_v34 = vpop.xlane.xlu1 %6091 }
 0xd34   : > { %v6095_v36 = vadd.f32 1e-05, %v6093_v30  ;;  %v6094_v20 = vmul.f32 0.00390625, %v6092_v34 }
 0xd36   : > { %7801 = vrsqrt.f32 %v6095_v36  ;;  %v6096_v37 = vadd.f32 1e-05, %v6094_v20 }
 0xd38   : > { %7803 = vrsqrt.f32 %v6096_v37 }
 0xd40   : > { %v7802_v38 = vpop.eup %7801 }
 0xd41   : > { %v6099_v32 = vmul.f32 %v7802_v38, %v6079_v25  ;;  %v6100_v33 = vmul.f32 %v7802_v38, %v6080_v54 }
 0xd42   : > { %v7804_v35 = vpop.eup %7803 }
 0xd43   : > { %v6115_v24 = vmul.f32 %v6108_v28, %v6099_v32  ;;  %v6116_v39 = vmul.f32 %v6112_v53, %v6100_v33  ;;  %v6101_v6 = vmul.f32 %v7804_v35, %v6081_v47  ;;  %v6102_v26 = vmul.f32 %v7804_v35, %v6082_v16 }
 0xd45   : > { %v6131_v10 = vadd.f32 %v6124_v29, %v6115_v24  ;;  %v6132_v41 = vadd.f32 %v6128_v31, %v6116_v39  ;;  %v6117_v44 = vmul.f32 %v6108_v28, %v6101_v6  ;;  %v6118_v27 = vmul.f32 %v6112_v53, %v6102_v26 }
 0xd47   : > { %6135 = vst [vmem:[%s543_s12] sm:$0xff] %v6131_v10  ;;  %6136 = vst [vmem:[%s543_s12 + $0x8] sm:$0xff] %v6132_v41  ;;  %v6133_v42 = vadd.f32 %v6124_v29, %v6117_v44  ;;  %v6134_v43 = vadd.f32 %v6128_v31, %v6118_v27 }
 0xd49   : > { %6137 = vst [vmem:[%s543_s12 + $0x10] sm:$0xff] %v6133_v42  ;;  %6138 = vst [vmem:[%s543_s12 + $0x18] sm:$0xff] %v6134_v43 }
 0xd4a   : > { %7989 = shalt.err (!%p7986_p8)
}
 0xd4b   : > { %s7990_s13 = scalar_lea.hbm %s8771_s28, 512  ;;  %s7994_s21 = scalar_lea.hbm %s8873_s6, 1024 }
 0xd4c   : > { %p7991_p3 = scmp.ne.s32.totalorder %s8771_s28, %s7990_s13  ;;  %p7995_p0 = scmp.lt.u32.totalorder %s8771_s28, %s8873_s6 }
 0xd4d   : > { %p7996_p1 = scmp.lt.u32.totalorder %s7994_s21, %s7990_s13  ;;  %p7998_p6 = scmp.lt.u32.totalorder %s7990_s13, %s8771_s28 }
 0xd4e   : > { %p7992_p12 = pnand %p7991_p3, %p8874_p5 }
 0xd4f   : > { %p7997_p7 = por %p7996_p1, %p7995_p0 }
 0xd50   : > { %p7993_p13 = pneg %p7992_p12 }
 0xd51   : > { %p7999_p10 = por %p7998_p6, %p7997_p7 }
 0xd53   : > { %p8000_p11 = pnand %p7999_p10, %p7993_p13 }
 0xd55   : > { %8003 = shalt.err (!%p8000_p11)
}
 0xd56   : > { %s8090_s24 = smov 256   ;;  %s8091_s16 = smov 16  }
 0xd57   : > { %7085 = dma.vmem_to_hbm [thread:$0]  (%p8874_p5), %s8773_s14, 512, %s8771_s28, %s6140_s23, %s8090_s24, %s8090_s24, %s8091_s16  }
 0xd58 PF: > { %s6171_s12 = sand.u32 1, %s8050_s25   ;;  %p8875_p2 = scmp.ne.s32.totalorder %s8863_s22, 0 }
 0xd59   : > { %p8876_p4 = scmp.ge.s32.totalorder %s8070_s30, 2  ;;  %s6172_s13 = scalar_lea.sflag [#allocation6], %s6171_s12 }
 0xd5b   : > { %p7108_p9 = pnand %p8876_p4, %p8875_p2 }
 0xd5d   : > { %8045 = dma.done.wait (!%p7108_p9), %s6172_s13, 512  }
 0xd5e   : > { %8047 = vsyncadd (!%p7108_p9), %s6172_s13, 4294966784  ;;  %s32_s30 = sadd.s32 1, %s8070_s30   ;;  %s8877_s25 = smov %s8054_s26 }
 0xd5f   : > { %p29_p8 = scmp.ge.s32.totalorder %s32_s30, 4   ;;  %s8878_s26 = smov %s8058_s27 }
 0xd60   : > { %s8879_s27 = smov %s8363_s20  ;;  %s8880_s28 = smov %s8066_s29 }
 0xd61   : > { %s8881_s29 = smov %s8883_s19  ;;  %31 = sbr.rel (!%p29_p8) target bundleno = 16 (0x10), region = 143 }
 0xd68   :  { %6177 = vsyncpa [#allocation5], 1 }
 0xd69   :  { %6179 = vsyncpa [#allocation5 + $0x1], 1 }
 0xd6a   :  { %6180 = vsyncpa [#allocation8], 1 }
 0xd6b   :  { %6181 = vsyncpa [#allocation11], 1 }
 0xd6c   :  { %6182 = vsyncpa [#allocation14], 1 }
 0xd6d   :  { %6183 = vsyncpa [#allocation6], 1 }
 0xd6e   :  { %6185 = vsyncpa [#allocation6 + $0x1], 1 }

</bundles_post_ra>
